<compile_context>
chip_gen: v7x
topology: tpu7x:2x2x1
jax: 0.10.0
libtpu: 0.0.40
codegen_flags: <defaults>
</compile_context>

<pallas_src>
import functools

import jax
import jax.numpy as jnp
from jax import lax
from jax.experimental import pallas as pl
from jax.experimental.pallas import tpu as pltpu

_LANE = 128


def _round_up(n, m):
    return ((n + m - 1) // m) * m


# ------------------------------ Pallas kernel ------------------------------

def _causal_conv_stream(y, y_prev, w_ref, b_ref, row, kernel_size, dilation):
    """Causal dilated conv over one L-tile as a single im2col MXU dot.

    y:      (TL, Cp_in) f32 current tile of the conv input.
    y_prev: (TL, Cp_in) f32 previous tile (carried causal state; zeros at tile 0).
    w_ref:  (k*Cp_in, Cp_out) bf16 weights, row j*Cp_in + c == tap j, in-channel c.
    b_ref:  (1, Cp_out) f32 bias.
    row:    (TL, 1) int32 iota over sublanes.

    out[t] = b + sum_j W_j @ input[t - (k-1-j)*dilation]; rows reaching before the
    tile start come from y_prev.  Requires (k-1)*dilation <= TL (asserted in wrapper).
    """
    tl = y.shape[0]
    parts = []
    for j in range(kernel_size):
        s = (kernel_size - 1 - j) * dilation
        if s == 0:
            xs = y
        else:
            s_roll = s % tl
            cur = pltpu.roll(y, s_roll, axis=0) if s_roll else y
            prv = pltpu.roll(y_prev, s_roll, axis=0) if s_roll else y_prev
            # rows r >= s take current tile shifted; rows r < s take the tail of the
            # previous tile (roll wraps it to the right place).
            xs = jnp.where(row >= s, cur, prv)
        parts.append(xs.astype(jnp.bfloat16))
    xcat = parts[0] if kernel_size == 1 else jnp.concatenate(parts, axis=1)
    out = jnp.dot(xcat, w_ref[...], preferred_element_type=jnp.float32)
    return out + b_ref[...]


def _tcn_fused_kernel(*refs, kernel_size, dilations, has_ds):
    """refs = (x_ref, per-layer [w1,b1,w2,b2,(wd,bd)], o_ref,
               pad_scratch, per-layer [state_in, state_mid])."""
    n_layers = len(dilations)
    n_scratch = 1 + 2 * n_layers

    x_ref = refs[0]
    o_ref = refs[-(n_scratch + 1)]
    wrefs = refs[1:-(n_scratch + 1)]
    scratch = refs[-n_scratch:]
    pad_ref = scratch[0]
    state_refs = scratch[1:]

    tl = pad_ref.shape[0]
    c_in = x_ref.shape[2]
    lt = pl.program_id(1)

    @pl.when(lt == 0)
    def _():
        # Start of a new sequence on this core: causal history = zeros (matches the
        # PyTorch left zero-padding), and zero the channel-pad lanes of the staging buf.
        pad_ref[...] = jnp.zeros_like(pad_ref)
        for r in state_refs:
            r[...] = jnp.zeros_like(r)

    # In-kernel channel zero-pad: HBM input stays at true width c_in (bf16).
    pad_ref[:, 0:c_in] = x_ref[0].astype(jnp.float32)
    y = pad_ref[...]                                   # (TL, Cp0) f32

    row = lax.broadcasted_iota(jnp.int32, (tl, 1), 0)

    idx = 0
    for li, d in enumerate(dilations):
        w1, b1, w2, b2 = wrefs[idx:idx + 4]
        idx += 4
        if has_ds[li]:
            wd, bd = wrefs[idx:idx + 2]
            idx += 2
        st_in, st_mid = state_refs[2 * li], state_refs[2 * li + 1]

        y_prev = st_in[...]
        h_prev = st_mid[...]

        # conv1 -> chomp -> relu -> dropout(identity)
        h = jnp.maximum(
            _causal_conv_stream(y, y_prev, w1, b1, row, kernel_size, d), 0.0)
        # conv2 -> chomp -> relu -> dropout(identity)
        out = jnp.maximum(
            _causal_conv_stream(h, h_prev, w2, b2, row, kernel_size, d), 0.0)

        # Carry this tile's activations as causal history for the next L tile.
        st_in[...] = y
        st_mid[...] = h

        if has_ds[li]:
            res = jnp.dot(y.astype(jnp.bfloat16), wd[...],
                          preferred_element_type=jnp.float32) + bd[...]
        else:
            res = y
        y = jnp.maximum(out + res, 0.0)

    o_ref[0] = y


def tcn_forward(x_ncl, params, *, kernel_size, tl=512):
    """Full TemporalConvNet forward.  x_ncl: (B, C_in, L) PyTorch layout, float32."""
    B, c_in, L = x_ncl.shape
    n_layers = len(params)
    cp_in0 = params[0]["cp_in"]
    cp_out_last = params[-1]["cp_out"]
    c_out = params[-1]["c_out"]

    # --- choose an L tile: multiple of 16 (bf16 sublanes), >= max causal shift ---
    max_shift = (kernel_size - 1) * (2 ** (n_layers - 1))
    tl = max(16, min(_round_up(tl, 16), _round_up(L, 16)), _round_up(max_shift, 16))
    n_tiles = -(-L // tl)
    tl = max(_round_up(-(-L // n_tiles), 16), _round_up(max_shift, 16))
    L_pad = n_tiles * tl
    assert max_shift <= tl, "causal receptive field must fit in one L tile"

    # NCL -> NLC, bf16 input feed, pad L (at the end; causal => never affects valid rows).
    x = jnp.transpose(x_ncl, (0, 2, 1)).astype(jnp.bfloat16)     # (B, L, Cin)
    if L_pad != L:
        x = jnp.pad(x, ((0, 0), (0, L_pad - L), (0, 0)))

    weight_args, dilations, has_ds = [], [], []
    for i, p in enumerate(params):
        dilations.append(2 ** i)
        has_ds.append("wd_k" in p)
        weight_args += [p["w1_k"], p["b1_k"], p["w2_k"], p["b2_k"]]
        if "wd_k" in p:
            weight_args += [p["wd_k"], p["bd_k"]]

    kernel = functools.partial(
        _tcn_fused_kernel,
        kernel_size=kernel_size,
        dilations=tuple(dilations),
        has_ds=tuple(has_ds),
    )

    # persistent VMEM scratch: input-pad staging + per-layer carried causal state
    scratch_shapes = [pltpu.VMEM((tl, cp_in0), jnp.float32)]
    for p in params:
        scratch_shapes.append(pltpu.VMEM((tl, p["cp_in"]), jnp.float32))   # prev layer-input tile
        scratch_shapes.append(pltpu.VMEM((tl, p["cp_out"]), jnp.float32))  # prev conv1-output tile

    x_spec = pl.BlockSpec((1, tl, c_in), lambda b, t: (b, t, 0))
    o_spec = pl.BlockSpec((1, tl, cp_out_last), lambda b, t: (b, t, 0))

    # --- advisory cost estimate for the XLA scheduler ---
    w_bytes = int(sum(a.size * a.dtype.itemsize for a in weight_args))
    flops_per_row = 0
    for p in params:
        flops_per_row += 2 * kernel_size * p["cp_in"] * p["cp_out"]
        flops_per_row += 2 * kernel_size * p["cp_out"] * p["cp_out"]
        if "wd_k" in p:
            flops_per_row += 2 * p["cp_in"] * p["cp_out"]
    cost = pl.CostEstimate(
        flops=int(flops_per_row) * B * L_pad,
        transcendentals=0,
        bytes_accessed=int(x.size) * 2 + B * L_pad * cp_out_last * 4 + w_bytes,
    )

    # --- explicit VMEM budget (weights worst-case 2x buffered + I/O blocks + state + temps) ---
    max_cp = max(max(p["cp_in"], p["cp_out"]) for p in params)
    state_bytes = 4 * tl * cp_in0 + sum(4 * tl * (p["cp_in"] + p["cp_out"]) for p in params)
    io_bytes = 2 * (tl * c_in * 2 + tl * cp_out_last * 4)
    temp_bytes = 8 * tl * max_cp * 4 + 2 * kernel_size * tl * max_cp * 2
    need = 2 * w_bytes + io_bytes + state_bytes + temp_bytes
    vmem_limit = int(min(max(2 * need, 32 * 1024 * 1024), 56 * 1024 * 1024))

    def run(weight_pipeline_mode):
        if weight_pipeline_mode is None:
            w_specs = [pl.BlockSpec(a.shape, lambda b, t: (0, 0)) for a in weight_args]
        else:
            w_specs = [pl.BlockSpec(a.shape, lambda b, t: (0, 0),
                                    pipeline_mode=weight_pipeline_mode)
                       for a in weight_args]
        return pl.pallas_call(
            kernel,
            out_shape=jax.ShapeDtypeStruct((B, L_pad, cp_out_last), jnp.float32),
            grid_spec=pltpu.PrefetchScalarGridSpec(
                num_scalar_prefetch=0,
                grid=(B, L_pad // tl),
                in_specs=[x_spec] + w_specs,
                out_specs=o_spec,
                scratch_shapes=scratch_shapes),
            compiler_params=pltpu.CompilerParams(
                dimension_semantics=("parallel", "arbitrary"),
                vmem_limit_bytes=vmem_limit),
            cost_estimate=cost,
        )(x, *weight_args)

    try:
        # Grid-invariant weights/biases: single-buffered (halves weight-resident VMEM).
        y_pad = run(pl.Buffered(1))
    except Exception:
        # Fallback if this JAX build rejects pipeline_mode on pallas_call BlockSpecs.
        y_pad = run(None)

    y = y_pad[:, :L, :c_out]               # drop L + channel padding
    return jnp.transpose(y, (0, 2, 1))     # -> (B, C_out, L) PyTorch layout


# ------------------------ parameter construction (glue) ------------------------

def _weight_norm(v, g):
    # PyTorch weight_norm(dim=0): w[o] = g[o] * v[o] / ||v[o]||_2
    norm = jnp.sqrt(jnp.sum(v * v, axis=(1, 2), keepdims=True))
    return g[:, None, None] * v / norm


def _to_im2col(w_pt, cp_in, cp_out):
    # (O, I, K) PyTorch -> (K, I, O) -> zero pad channels -> (K*cp_in, cp_out) bf16
    k = w_pt.shape[2]
    w = jnp.transpose(w_pt, (2, 1, 0))
    w = jnp.pad(w, ((0, 0), (0, cp_in - w.shape[1]), (0, cp_out - w.shape[2])))
    return w.reshape(k * cp_in, cp_out).astype(jnp.bfloat16)


def _pad_bias(b_pt, cp_out):
    return jnp.pad(b_pt, (0, cp_out - b_pt.shape[0]))[None, :].astype(jnp.float32)


def init_tcn_params(key, num_inputs, num_channels, kernel_size):
    params = []
    in_c = num_inputs
    for out_c in num_channels:
        key, k1, k2, k3, k4, k5, k6, k7, k8 = jax.random.split(key, 9)
        v1 = 0.01 * jax.random.normal(k1, (out_c, in_c, kernel_size), jnp.float32)
        g1 = 1.0 + 0.1 * jax.random.normal(k2, (out_c,), jnp.float32)
        w1_pt = _weight_norm(v1, g1)                       # (O, I, K) PyTorch layout
        b1_pt = 0.05 * jax.random.normal(k3, (out_c,), jnp.float32)

        v2 = 0.01 * jax.random.normal(k4, (out_c, out_c, kernel_size), jnp.float32)
        g2 = 1.0 + 0.1 * jax.random.normal(k5, (out_c,), jnp.float32)
        w2_pt = _weight_norm(v2, g2)
        b2_pt = 0.05 * jax.random.normal(k6, (out_c,), jnp.float32)

        cp_in = _round_up(in_c, _LANE)
        cp_out = _round_up(out_c, _LANE)

        p = {
            "c_in": in_c, "c_out": out_c, "cp_in": cp_in, "cp_out": cp_out,
            # kernel-facing layout: im2col bf16 weights, lane-padded f32 biases
            "w1_k": _to_im2col(w1_pt, cp_in, cp_out),
            "b1_k": _pad_bias(b1_pt, cp_out),
            "w2_k": _to_im2col(w2_pt, cp_out, cp_out),
            "b2_k": _pad_bias(b2_pt, cp_out),
            # PyTorch-layout f32 copies for the pure-JAX reference
            "w1_pt": w1_pt, "b1_pt": b1_pt,
            "w2_pt": w2_pt, "b2_pt": b2_pt,
        }

        if in_c != out_c:  # downsample 1x1 conv on the residual path
            wd_pt = 0.01 * jax.random.normal(k7, (out_c, in_c, 1), jnp.float32)
            bd_pt = 0.05 * jax.random.normal(k8, (out_c,), jnp.float32)
            wd = jnp.transpose(wd_pt[:, :, 0], (1, 0))     # (Cin, Cout)
            wd = jnp.pad(wd, ((0, cp_in - in_c), (0, cp_out - out_c)))
            p["wd_k"] = wd.astype(jnp.bfloat16)
            p["bd_k"] = _pad_bias(bd_pt, cp_out)
            p["wd_pt"] = wd_pt
            p["bd_pt"] = bd_pt

        params.append(p)
        in_c = out_c
    return params


# ------------- pure-JAX reference (mirrors bf16 input feed + bf16 matmul precision) -------------

def ref_block(x_ncl, p, dilation, kernel_size):
    pad = (kernel_size - 1) * dilation
    L = x_ncl.shape[2]

    def conv(inp, w, b):
        y = lax.conv_general_dilated(
            inp.astype(jnp.bfloat16), w.astype(jnp.bfloat16),
            window_strides=(1,), padding=[(pad, pad)],
            rhs_dilation=(dilation,),
            dimension_numbers=("NCH", "OIH", "NCH"),
            preferred_element_type=jnp.float32)
        y = y[:, :, :L]  # Chomp1d
        return y + b[None, :, None]

    h = jnp.maximum(conv(x_ncl, p["w1_pt"], p["b1_pt"]), 0.0)
    out = jnp.maximum(conv(h, p["w2_pt"], p["b2_pt"]), 0.0)
    if "wd_pt" in p:
        res = lax.conv_general_dilated(
            x_ncl.astype(jnp.bfloat16), p["wd_pt"].astype(jnp.bfloat16),
            (1,), [(0, 0)], dimension_numbers=("NCH", "OIH", "NCH"),
            preferred_element_type=jnp.float32) + p["bd_pt"][None, :, None]
    else:
        res = x_ncl
    return jnp.maximum(out + res, 0.0)


def ref_tcn(x_ncl, params, kernel_size):
    # The kernel reads a bf16 input feed; mirror that rounding here.
    y = x_ncl.astype(jnp.bfloat16).astype(jnp.float32)
    for i, p in enumerate(params):
        y = ref_block(y, p, 2 ** i, kernel_size)
    return y


if __name__ == "__main__":
    key = jax.random.PRNGKey(0)
    B, L = 2, 32
    num_inputs = 4
    num_channels = [8, 8, 16]   # dilations 1, 2, 4; layer 1 exercises identity residual
    kernel_size = 2

    key, kx = jax.random.split(key)
    x_ncl = jax.random.normal(kx, (B, num_inputs, L), jnp.float32)  # PyTorch NCL input
    params = init_tcn_params(key, num_inputs, num_channels, kernel_size)

    # tl=16 forces two L tiles so the carried-causal-state streaming path is exercised.
    out = tcn_forward(x_ncl, params, kernel_size=kernel_size, tl=16)
    out = jax.block_until_ready(out)

    ref = ref_tcn(x_ncl, params, kernel_size)
    assert out.shape == (B, num_channels[-1], L)
    assert jnp.allclose(out, ref, rtol=1e-2, atol=1e-2), "Pallas TCN mismatch vs reference"

    print("KERNEL_OK")
</pallas_src>

<mosaic_0001>
module attributes {stable_mosaic.version = 11 : i64} {
  func.func @_tcn_fused_kernel(%arg0: i32, %arg1: i32, %arg2: memref<1x16x4xbf16, #tpu.memory_space<vmem>>, %arg3: memref<256x128xbf16, #tpu.memory_space<vmem>>, %arg4: memref<1x128xf32, #tpu.memory_space<vmem>>, %arg5: memref<256x128xbf16, #tpu.memory_space<vmem>>, %arg6: memref<1x128xf32, #tpu.memory_space<vmem>>, %arg7: memref<128x128xbf16, #tpu.memory_space<vmem>>, %arg8: memref<1x128xf32, #tpu.memory_space<vmem>>, %arg9: memref<256x128xbf16, #tpu.memory_space<vmem>>, %arg10: memref<1x128xf32, #tpu.memory_space<vmem>>, %arg11: memref<256x128xbf16, #tpu.memory_space<vmem>>, %arg12: memref<1x128xf32, #tpu.memory_space<vmem>>, %arg13: memref<256x128xbf16, #tpu.memory_space<vmem>>, %arg14: memref<1x128xf32, #tpu.memory_space<vmem>>, %arg15: memref<256x128xbf16, #tpu.memory_space<vmem>>, %arg16: memref<1x128xf32, #tpu.memory_space<vmem>>, %arg17: memref<128x128xbf16, #tpu.memory_space<vmem>>, %arg18: memref<1x128xf32, #tpu.memory_space<vmem>>, %arg19: memref<1x16x128xf32, #tpu.memory_space<vmem>>, %arg20: memref<16x128xf32, #tpu.memory_space<vmem>>, %arg21: memref<16x128xf32, #tpu.memory_space<vmem>>, %arg22: memref<16x128xf32, #tpu.memory_space<vmem>>, %arg23: memref<16x128xf32, #tpu.memory_space<vmem>>, %arg24: memref<16x128xf32, #tpu.memory_space<vmem>>, %arg25: memref<16x128xf32, #tpu.memory_space<vmem>>, %arg26: memref<16x128xf32, #tpu.memory_space<vmem>>) attributes {dimension_semantics = [#tpu.dimension_semantics<parallel>, #tpu.dimension_semantics<arbitrary>], iteration_bounds = array<i64: 2, 2>, scalar_prefetch = 0 : i64, scratch_operands = 7 : i64, tpu.core_type = #tpu.core_type<tc>, window_params = [{transform_indices = @transform_0, window_bounds = array<i64: 1, 16, 4>}, {pipeline_mode = #tpu.pipeline_mode<synchronous>, transform_indices = @transform_1, window_bounds = array<i64: 256, 128>}, {pipeline_mode = #tpu.pipeline_mode<synchronous>, transform_indices = @transform_2, window_bounds = array<i64: 1, 128>}, {pipeline_mode = #tpu.pipeline_mode<synchronous>, transform_indices = @transform_3, window_bounds = array<i64: 256, 128>}, {pipeline_mode = #tpu.pipeline_mode<synchronous>, transform_indices = @transform_4, window_bounds = array<i64: 1, 128>}, {pipeline_mode = #tpu.pipeline_mode<synchronous>, transform_indices = @transform_5, window_bounds = array<i64: 128, 128>}, {pipeline_mode = #tpu.pipeline_mode<synchronous>, transform_indices = @transform_6, window_bounds = array<i64: 1, 128>}, {pipeline_mode = #tpu.pipeline_mode<synchronous>, transform_indices = @transform_7, window_bounds = array<i64: 256, 128>}, {pipeline_mode = #tpu.pipeline_mode<synchronous>, transform_indices = @transform_8, window_bounds = array<i64: 1, 128>}, {pipeline_mode = #tpu.pipeline_mode<synchronous>, transform_indices = @transform_9, window_bounds = array<i64: 256, 128>}, {pipeline_mode = #tpu.pipeline_mode<synchronous>, transform_indices = @transform_10, window_bounds = array<i64: 1, 128>}, {pipeline_mode = #tpu.pipeline_mode<synchronous>, transform_indices = @transform_11, window_bounds = array<i64: 256, 128>}, {pipeline_mode = #tpu.pipeline_mode<synchronous>, transform_indices = @transform_12, window_bounds = array<i64: 1, 128>}, {pipeline_mode = #tpu.pipeline_mode<synchronous>, transform_indices = @transform_13, window_bounds = array<i64: 256, 128>}, {pipeline_mode = #tpu.pipeline_mode<synchronous>, transform_indices = @transform_14, window_bounds = array<i64: 1, 128>}, {pipeline_mode = #tpu.pipeline_mode<synchronous>, transform_indices = @transform_15, window_bounds = array<i64: 128, 128>}, {pipeline_mode = #tpu.pipeline_mode<synchronous>, transform_indices = @transform_16, window_bounds = array<i64: 1, 128>}, {transform_indices = @transform_17, window_bounds = array<i64: 1, 16, 128>}]} {
    %c0_i32 = arith.constant 0 : i32
    %0 = arith.cmpi eq, %arg1, %c0_i32 : i32
    %1 = arith.extui %0 : i1 to i32
    %c0_i32_0 = arith.constant 0 : i32
    %2 = arith.cmpi ne, %1, %c0_i32_0 : i32
    scf.if %2 {
      %cst_97 = arith.constant 0.000000e+00 : f32
      %147 = vector.broadcast %cst_97 : f32 to vector<16x128xf32>
      %c0_98 = arith.constant 0 : index
      %c0_99 = arith.constant 0 : index
      %148 = vector.load %arg20[%c0_98, %c0_99] : memref<16x128xf32, #tpu.memory_space<vmem>>, vector<16x128xf32>
      tpu.vector_store %arg20[%c0_98, %c0_99], %147 {strides = array<i32>} : memref<16x128xf32, #tpu.memory_space<vmem>>, vector<16x128xf32>,
      %cst_100 = arith.constant 0.000000e+00 : f32
      %149 = vector.broadcast %cst_100 : f32 to vector<16x128xf32>
      %c0_101 = arith.constant 0 : index
      %c0_102 = arith.constant 0 : index
      %150 = vector.load %arg21[%c0_101, %c0_102] : memref<16x128xf32, #tpu.memory_space<vmem>>, vector<16x128xf32>
      tpu.vector_store %arg21[%c0_101, %c0_102], %149 {strides = array<i32>} : memref<16x128xf32, #tpu.memory_space<vmem>>, vector<16x128xf32>,
      %cst_103 = arith.constant 0.000000e+00 : f32
      %151 = vector.broadcast %cst_103 : f32 to vector<16x128xf32>
      %c0_104 = arith.constant 0 : index
      %c0_105 = arith.constant 0 : index
      %152 = vector.load %arg22[%c0_104, %c0_105] : memref<16x128xf32, #tpu.memory_space<vmem>>, vector<16x128xf32>
      tpu.vector_store %arg22[%c0_104, %c0_105], %151 {strides = array<i32>} : memref<16x128xf32, #tpu.memory_space<vmem>>, vector<16x128xf32>,
      %cst_106 = arith.constant 0.000000e+00 : f32
      %153 = vector.broadcast %cst_106 : f32 to vector<16x128xf32>
      %c0_107 = arith.constant 0 : index
      %c0_108 = arith.constant 0 : index
      %154 = vector.load %arg23[%c0_107, %c0_108] : memref<16x128xf32, #tpu.memory_space<vmem>>, vector<16x128xf32>
      tpu.vector_store %arg23[%c0_107, %c0_108], %153 {strides = array<i32>} : memref<16x128xf32, #tpu.memory_space<vmem>>, vector<16x128xf32>,
      %cst_109 = arith.constant 0.000000e+00 : f32
      %155 = vector.broadcast %cst_109 : f32 to vector<16x128xf32>
      %c0_110 = arith.constant 0 : index
      %c0_111 = arith.constant 0 : index
      %156 = vector.load %arg24[%c0_110, %c0_111] : memref<16x128xf32, #tpu.memory_space<vmem>>, vector<16x128xf32>
      tpu.vector_store %arg24[%c0_110, %c0_111], %155 {strides = array<i32>} : memref<16x128xf32, #tpu.memory_space<vmem>>, vector<16x128xf32>,
      %cst_112 = arith.constant 0.000000e+00 : f32
      %157 = vector.broadcast %cst_112 : f32 to vector<16x128xf32>
      %c0_113 = arith.constant 0 : index
      %c0_114 = arith.constant 0 : index
      %158 = vector.load %arg25[%c0_113, %c0_114] : memref<16x128xf32, #tpu.memory_space<vmem>>, vector<16x128xf32>
      tpu.vector_store %arg25[%c0_113, %c0_114], %157 {strides = array<i32>} : memref<16x128xf32, #tpu.memory_space<vmem>>, vector<16x128xf32>,
      %cst_115 = arith.constant 0.000000e+00 : f32
      %159 = vector.broadcast %cst_115 : f32 to vector<16x128xf32>
      %c0_116 = arith.constant 0 : index
      %c0_117 = arith.constant 0 : index
      %160 = vector.load %arg26[%c0_116, %c0_117] : memref<16x128xf32, #tpu.memory_space<vmem>>, vector<16x128xf32>
      tpu.vector_store %arg26[%c0_116, %c0_117], %159 {strides = array<i32>} : memref<16x128xf32, #tpu.memory_space<vmem>>, vector<16x128xf32>,
    } else {
    }
    %c0 = arith.constant 0 : index
    %c0_1 = arith.constant 0 : index
    %c0_2 = arith.constant 0 : index
    %3 = vector.load %arg2[%c0, %c0_1, %c0_2] : memref<1x16x4xbf16, #tpu.memory_space<vmem>>, vector<1x16x4xbf16>
    %4 = vector.shape_cast %3 : vector<1x16x4xbf16> to vector<16x4xbf16>
    %5 = arith.extf %4 : vector<16x4xbf16> to vector<16x4xf32>
    %c0_3 = arith.constant 0 : index
    %c0_4 = arith.constant 0 : index
    %6 = vector.load %arg20[%c0_3, %c0_4] : memref<16x128xf32, #tpu.memory_space<vmem>>, vector<16x4xf32>
    tpu.vector_store %arg20[%c0_3, %c0_4], %5 {strides = array<i32>} : memref<16x128xf32, #tpu.memory_space<vmem>>, vector<16x4xf32>,
    %c0_5 = arith.constant 0 : index
    %c0_6 = arith.constant 0 : index
    %7 = vector.load %arg20[%c0_5, %c0_6] : memref<16x128xf32, #tpu.memory_space<vmem>>, vector<16x128xf32>
    %8 = tpu.iota {dimensions = array<i32: 0>} : vector<16x1xi32>
    %c0_7 = arith.constant 0 : index
    %c0_8 = arith.constant 0 : index
    %9 = vector.load %arg21[%c0_7, %c0_8] : memref<16x128xf32, #tpu.memory_space<vmem>>, vector<16x128xf32>
    %c0_9 = arith.constant 0 : index
    %c0_10 = arith.constant 0 : index
    %10 = vector.load %arg22[%c0_9, %c0_10] : memref<16x128xf32, #tpu.memory_space<vmem>>, vector<16x128xf32>
    %c1_i32 = arith.constant 1 : i32
    %11 = tpu.dynamic_rotate %7 by %c1_i32 dim 0 : vector<16x128xf32>, i32 -> vector<16x128xf32>
    %c1_i32_11 = arith.constant 1 : i32
    %12 = tpu.dynamic_rotate %9 by %c1_i32_11 dim 0 : vector<16x128xf32>, i32 -> vector<16x128xf32>
    %c1_i32_12 = arith.constant 1 : i32
    %13 = vector.broadcast %c1_i32_12 : i32 to vector<16x1xi32>
    %14 = arith.cmpi sge, %8, %13 : vector<16x1xi32>
    %15 = vector.shape_cast %14 : vector<16x1xi1> to vector<16x1xi1>
    %16 = vector.broadcast %15 : vector<16x1xi1> to vector<16x128xi1>
    %17 = arith.select %16, %11, %12 : vector<16x128xi1>, vector<16x128xf32>
    %18 = arith.truncf %17 : vector<16x128xf32> to vector<16x128xbf16>
    %19 = arith.truncf %7 : vector<16x128xf32> to vector<16x128xbf16>
    %20 = tpu.concatenate %18, %19 in 1 : vector<16x128xbf16>, vector<16x128xbf16> -> vector<16x256xbf16>
    %c0_13 = arith.constant 0 : index
    %c0_14 = arith.constant 0 : index
    %21 = vector.load %arg3[%c0_13, %c0_14] : memref<256x128xbf16, #tpu.memory_space<vmem>>, vector<256x128xbf16>
    %cst = arith.constant dense<0.000000e+00> : vector<16x128xf32>
    %22 = tpu.matmul %20, %21, %cst {dimension_numbers = #tpu.dot_dimension_numbers<[1], [0], [0], [1], [0, 0, 1, 1], [], []>} : vector<16x256xbf16>, vector<256x128xbf16>, vector<16x128xf32> -> vector<16x128xf32>
    %c0_15 = arith.constant 0 : index
    %c0_16 = arith.constant 0 : index
    %23 = vector.load %arg4[%c0_15, %c0_16] : memref<1x128xf32, #tpu.memory_space<vmem>>, vector<1x128xf32>
    %24 = vector.broadcast %23 : vector<1x128xf32> to vector<16x128xf32>
    %25 = arith.addf %22, %24 : vector<16x128xf32>
    %cst_17 = arith.constant 0.000000e+00 : f32
    %26 = vector.broadcast %cst_17 : f32 to vector<16x128xf32>
    %27 = arith.maximumf %25, %26 : vector<16x128xf32>
    %c1_i32_18 = arith.constant 1 : i32
    %28 = tpu.dynamic_rotate %27 by %c1_i32_18 dim 0 : vector<16x128xf32>, i32 -> vector<16x128xf32>
    %c1_i32_19 = arith.constant 1 : i32
    %29 = tpu.dynamic_rotate %10 by %c1_i32_19 dim 0 : vector<16x128xf32>, i32 -> vector<16x128xf32>
    %c1_i32_20 = arith.constant 1 : i32
    %30 = vector.broadcast %c1_i32_20 : i32 to vector<16x1xi32>
    %31 = arith.cmpi sge, %8, %30 : vector<16x1xi32>
    %32 = vector.shape_cast %31 : vector<16x1xi1> to vector<16x1xi1>
    %33 = vector.broadcast %32 : vector<16x1xi1> to vector<16x128xi1>
    %34 = arith.select %33, %28, %29 : vector<16x128xi1>, vector<16x128xf32>
    %35 = arith.truncf %34 : vector<16x128xf32> to vector<16x128xbf16>
    %36 = arith.truncf %27 : vector<16x128xf32> to vector<16x128xbf16>
    %37 = tpu.concatenate %35, %36 in 1 : vector<16x128xbf16>, vector<16x128xbf16> -> vector<16x256xbf16>
    %c0_21 = arith.constant 0 : index
    %c0_22 = arith.constant 0 : index
    %38 = vector.load %arg5[%c0_21, %c0_22] : memref<256x128xbf16, #tpu.memory_space<vmem>>, vector<256x128xbf16>
    %cst_23 = arith.constant dense<0.000000e+00> : vector<16x128xf32>
    %39 = tpu.matmul %37, %38, %cst_23 {dimension_numbers = #tpu.dot_dimension_numbers<[1], [0], [0], [1], [0, 0, 1, 1], [], []>} : vector<16x256xbf16>, vector<256x128xbf16>, vector<16x128xf32> -> vector<16x128xf32>
    %c0_24 = arith.constant 0 : index
    %c0_25 = arith.constant 0 : index
    %40 = vector.load %arg6[%c0_24, %c0_25] : memref<1x128xf32, #tpu.memory_space<vmem>>, vector<1x128xf32>
    %41 = vector.broadcast %40 : vector<1x128xf32> to vector<16x128xf32>
    %42 = arith.addf %39, %41 : vector<16x128xf32>
    %cst_26 = arith.constant 0.000000e+00 : f32
    %43 = vector.broadcast %cst_26 : f32 to vector<16x128xf32>
    %44 = arith.maximumf %42, %43 : vector<16x128xf32>
    %c0_27 = arith.constant 0 : index
    %c0_28 = arith.constant 0 : index
    %45 = vector.load %arg21[%c0_27, %c0_28] : memref<16x128xf32, #tpu.memory_space<vmem>>, vector<16x128xf32>
    tpu.vector_store %arg21[%c0_27, %c0_28], %7 {strides = array<i32>} : memref<16x128xf32, #tpu.memory_space<vmem>>, vector<16x128xf32>,
    %c0_29 = arith.constant 0 : index
    %c0_30 = arith.constant 0 : index
    %46 = vector.load %arg22[%c0_29, %c0_30] : memref<16x128xf32, #tpu.memory_space<vmem>>, vector<16x128xf32>
    tpu.vector_store %arg22[%c0_29, %c0_30], %27 {strides = array<i32>} : memref<16x128xf32, #tpu.memory_space<vmem>>, vector<16x128xf32>,
    %47 = arith.truncf %7 : vector<16x128xf32> to vector<16x128xbf16>
    %c0_31 = arith.constant 0 : index
    %c0_32 = arith.constant 0 : index
    %48 = vector.load %arg7[%c0_31, %c0_32] : memref<128x128xbf16, #tpu.memory_space<vmem>>, vector<128x128xbf16>
    %cst_33 = arith.constant dense<0.000000e+00> : vector<16x128xf32>
    %49 = tpu.matmul %47, %48, %cst_33 {dimension_numbers = #tpu.dot_dimension_numbers<[1], [0], [0], [1], [0, 0, 1, 1], [], []>} : vector<16x128xbf16>, vector<128x128xbf16>, vector<16x128xf32> -> vector<16x128xf32>
    %c0_34 = arith.constant 0 : index
    %c0_35 = arith.constant 0 : index
    %50 = vector.load %arg8[%c0_34, %c0_35] : memref<1x128xf32, #tpu.memory_space<vmem>>, vector<1x128xf32>
    %51 = vector.broadcast %50 : vector<1x128xf32> to vector<16x128xf32>
    %52 = arith.addf %49, %51 : vector<16x128xf32>
    %53 = arith.addf %44, %52 : vector<16x128xf32>
    %cst_36 = arith.constant 0.000000e+00 : f32
    %54 = vector.broadcast %cst_36 : f32 to vector<16x128xf32>
    %55 = arith.maximumf %53, %54 : vector<16x128xf32>
    %c0_37 = arith.constant 0 : index
    %c0_38 = arith.constant 0 : index
    %56 = vector.load %arg23[%c0_37, %c0_38] : memref<16x128xf32, #tpu.memory_space<vmem>>, vector<16x128xf32>
    %c0_39 = arith.constant 0 : index
    %c0_40 = arith.constant 0 : index
    %57 = vector.load %arg24[%c0_39, %c0_40] : memref<16x128xf32, #tpu.memory_space<vmem>>, vector<16x128xf32>
    %c2_i32 = arith.constant 2 : i32
    %58 = tpu.dynamic_rotate %55 by %c2_i32 dim 0 : vector<16x128xf32>, i32 -> vector<16x128xf32>
    %c2_i32_41 = arith.constant 2 : i32
    %59 = tpu.dynamic_rotate %56 by %c2_i32_41 dim 0 : vector<16x128xf32>, i32 -> vector<16x128xf32>
    %c2_i32_42 = arith.constant 2 : i32
    %60 = vector.broadcast %c2_i32_42 : i32 to vector<16x1xi32>
    %61 = arith.cmpi sge, %8, %60 : vector<16x1xi32>
    %62 = vector.shape_cast %61 : vector<16x1xi1> to vector<16x1xi1>
    %63 = vector.broadcast %62 : vector<16x1xi1> to vector<16x128xi1>
    %64 = arith.select %63, %58, %59 : vector<16x128xi1>, vector<16x128xf32>
    %65 = arith.truncf %64 : vector<16x128xf32> to vector<16x128xbf16>
    %66 = arith.truncf %55 : vector<16x128xf32> to vector<16x128xbf16>
    %67 = tpu.concatenate %65, %66 in 1 : vector<16x128xbf16>, vector<16x128xbf16> -> vector<16x256xbf16>
    %c0_43 = arith.constant 0 : index
    %c0_44 = arith.constant 0 : index
    %68 = vector.load %arg9[%c0_43, %c0_44] : memref<256x128xbf16, #tpu.memory_space<vmem>>, vector<256x128xbf16>
    %cst_45 = arith.constant dense<0.000000e+00> : vector<16x128xf32>
    %69 = tpu.matmul %67, %68, %cst_45 {dimension_numbers = #tpu.dot_dimension_numbers<[1], [0], [0], [1], [0, 0, 1, 1], [], []>} : vector<16x256xbf16>, vector<256x128xbf16>, vector<16x128xf32> -> vector<16x128xf32>
    %c0_46 = arith.constant 0 : index
    %c0_47 = arith.constant 0 : index
    %70 = vector.load %arg10[%c0_46, %c0_47] : memref<1x128xf32, #tpu.memory_space<vmem>>, vector<1x128xf32>
    %71 = vector.broadcast %70 : vector<1x128xf32> to vector<16x128xf32>
    %72 = arith.addf %69, %71 : vector<16x128xf32>
    %cst_48 = arith.constant 0.000000e+00 : f32
    %73 = vector.broadcast %cst_48 : f32 to vector<16x128xf32>
    %74 = arith.maximumf %72, %73 : vector<16x128xf32>
    %c2_i32_49 = arith.constant 2 : i32
    %75 = tpu.dynamic_rotate %74 by %c2_i32_49 dim 0 : vector<16x128xf32>, i32 -> vector<16x128xf32>
    %c2_i32_50 = arith.constant 2 : i32
    %76 = tpu.dynamic_rotate %57 by %c2_i32_50 dim 0 : vector<16x128xf32>, i32 -> vector<16x128xf32>
    %c2_i32_51 = arith.constant 2 : i32
    %77 = vector.broadcast %c2_i32_51 : i32 to vector<16x1xi32>
    %78 = arith.cmpi sge, %8, %77 : vector<16x1xi32>
    %79 = vector.shape_cast %78 : vector<16x1xi1> to vector<16x1xi1>
    %80 = vector.broadcast %79 : vector<16x1xi1> to vector<16x128xi1>
    %81 = arith.select %80, %75, %76 : vector<16x128xi1>, vector<16x128xf32>
    %82 = arith.truncf %81 : vector<16x128xf32> to vector<16x128xbf16>
    %83 = arith.truncf %74 : vector<16x128xf32> to vector<16x128xbf16>
    %84 = tpu.concatenate %82, %83 in 1 : vector<16x128xbf16>, vector<16x128xbf16> -> vector<16x256xbf16>
    %c0_52 = arith.constant 0 : index
    %c0_53 = arith.constant 0 : index
    %85 = vector.load %arg11[%c0_52, %c0_53] : memref<256x128xbf16, #tpu.memory_space<vmem>>, vector<256x128xbf16>
    %cst_54 = arith.constant dense<0.000000e+00> : vector<16x128xf32>
    %86 = tpu.matmul %84, %85, %cst_54 {dimension_numbers = #tpu.dot_dimension_numbers<[1], [0], [0], [1], [0, 0, 1, 1], [], []>} : vector<16x256xbf16>, vector<256x128xbf16>, vector<16x128xf32> -> vector<16x128xf32>
    %c0_55 = arith.constant 0 : index
    %c0_56 = arith.constant 0 : index
    %87 = vector.load %arg12[%c0_55, %c0_56] : memref<1x128xf32, #tpu.memory_space<vmem>>, vector<1x128xf32>
    %88 = vector.broadcast %87 : vector<1x128xf32> to vector<16x128xf32>
    %89 = arith.addf %86, %88 : vector<16x128xf32>
    %cst_57 = arith.constant 0.000000e+00 : f32
    %90 = vector.broadcast %cst_57 : f32 to vector<16x128xf32>
    %91 = arith.maximumf %89, %90 : vector<16x128xf32>
    %c0_58 = arith.constant 0 : index
    %c0_59 = arith.constant 0 : index
    %92 = vector.load %arg23[%c0_58, %c0_59] : memref<16x128xf32, #tpu.memory_space<vmem>>, vector<16x128xf32>
    tpu.vector_store %arg23[%c0_58, %c0_59], %55 {strides = array<i32>} : memref<16x128xf32, #tpu.memory_space<vmem>>, vector<16x128xf32>,
    %c0_60 = arith.constant 0 : index
    %c0_61 = arith.constant 0 : index
    %93 = vector.load %arg24[%c0_60, %c0_61] : memref<16x128xf32, #tpu.memory_space<vmem>>, vector<16x128xf32>
    tpu.vector_store %arg24[%c0_60, %c0_61], %74 {strides = array<i32>} : memref<16x128xf32, #tpu.memory_space<vmem>>, vector<16x128xf32>,
    %94 = arith.addf %91, %55 : vector<16x128xf32>
    %cst_62 = arith.constant 0.000000e+00 : f32
    %95 = vector.broadcast %cst_62 : f32 to vector<16x128xf32>
    %96 = arith.maximumf %94, %95 : vector<16x128xf32>
    %c0_63 = arith.constant 0 : index
    %c0_64 = arith.constant 0 : index
    %97 = vector.load %arg25[%c0_63, %c0_64] : memref<16x128xf32, #tpu.memory_space<vmem>>, vector<16x128xf32>
    %c0_65 = arith.constant 0 : index
    %c0_66 = arith.constant 0 : index
    %98 = vector.load %arg26[%c0_65, %c0_66] : memref<16x128xf32, #tpu.memory_space<vmem>>, vector<16x128xf32>
    %c4_i32 = arith.constant 4 : i32
    %99 = tpu.dynamic_rotate %96 by %c4_i32 dim 0 : vector<16x128xf32>, i32 -> vector<16x128xf32>
    %c4_i32_67 = arith.constant 4 : i32
    %100 = tpu.dynamic_rotate %97 by %c4_i32_67 dim 0 : vector<16x128xf32>, i32 -> vector<16x128xf32>
    %c4_i32_68 = arith.constant 4 : i32
    %101 = vector.broadcast %c4_i32_68 : i32 to vector<16x1xi32>
    %102 = arith.cmpi sge, %8, %101 : vector<16x1xi32>
    %103 = vector.shape_cast %102 : vector<16x1xi1> to vector<16x1xi1>
    %104 = vector.broadcast %103 : vector<16x1xi1> to vector<16x128xi1>
    %105 = arith.select %104, %99, %100 : vector<16x128xi1>, vector<16x128xf32>
    %106 = arith.truncf %105 : vector<16x128xf32> to vector<16x128xbf16>
    %107 = arith.truncf %96 : vector<16x128xf32> to vector<16x128xbf16>
    %108 = tpu.concatenate %106, %107 in 1 : vector<16x128xbf16>, vector<16x128xbf16> -> vector<16x256xbf16>
    %c0_69 = arith.constant 0 : index
    %c0_70 = arith.constant 0 : index
    %109 = vector.load %arg13[%c0_69, %c0_70] : memref<256x128xbf16, #tpu.memory_space<vmem>>, vector<256x128xbf16>
    %cst_71 = arith.constant dense<0.000000e+00> : vector<16x128xf32>
    %110 = tpu.matmul %108, %109, %cst_71 {dimension_numbers = #tpu.dot_dimension_numbers<[1], [0], [0], [1], [0, 0, 1, 1], [], []>} : vector<16x256xbf16>, vector<256x128xbf16>, vector<16x128xf32> -> vector<16x128xf32>
    %c0_72 = arith.constant 0 : index
    %c0_73 = arith.constant 0 : index
    %111 = vector.load %arg14[%c0_72, %c0_73] : memref<1x128xf32, #tpu.memory_space<vmem>>, vector<1x128xf32>
    %112 = vector.broadcast %111 : vector<1x128xf32> to vector<16x128xf32>
    %113 = arith.addf %110, %112 : vector<16x128xf32>
    %cst_74 = arith.constant 0.000000e+00 : f32
    %114 = vector.broadcast %cst_74 : f32 to vector<16x128xf32>
    %115 = arith.maximumf %113, %114 : vector<16x128xf32>
    %c4_i32_75 = arith.constant 4 : i32
    %116 = tpu.dynamic_rotate %115 by %c4_i32_75 dim 0 : vector<16x128xf32>, i32 -> vector<16x128xf32>
    %c4_i32_76 = arith.constant 4 : i32
    %117 = tpu.dynamic_rotate %98 by %c4_i32_76 dim 0 : vector<16x128xf32>, i32 -> vector<16x128xf32>
    %c4_i32_77 = arith.constant 4 : i32
    %118 = vector.broadcast %c4_i32_77 : i32 to vector<16x1xi32>
    %119 = arith.cmpi sge, %8, %118 : vector<16x1xi32>
    %120 = vector.shape_cast %119 : vector<16x1xi1> to vector<16x1xi1>
    %121 = vector.broadcast %120 : vector<16x1xi1> to vector<16x128xi1>
    %122 = arith.select %121, %116, %117 : vector<16x128xi1>, vector<16x128xf32>
    %123 = arith.truncf %122 : vector<16x128xf32> to vector<16x128xbf16>
    %124 = arith.truncf %115 : vector<16x128xf32> to vector<16x128xbf16>
    %125 = tpu.concatenate %123, %124 in 1 : vector<16x128xbf16>, vector<16x128xbf16> -> vector<16x256xbf16>
    %c0_78 = arith.constant 0 : index
    %c0_79 = arith.constant 0 : index
    %126 = vector.load %arg15[%c0_78, %c0_79] : memref<256x128xbf16, #tpu.memory_space<vmem>>, vector<256x128xbf16>
    %cst_80 = arith.constant dense<0.000000e+00> : vector<16x128xf32>
    %127 = tpu.matmul %125, %126, %cst_80 {dimension_numbers = #tpu.dot_dimension_numbers<[1], [0], [0], [1], [0, 0, 1, 1], [], []>} : vector<16x256xbf16>, vector<256x128xbf16>, vector<16x128xf32> -> vector<16x128xf32>
    %c0_81 = arith.constant 0 : index
    %c0_82 = arith.constant 0 : index
    %128 = vector.load %arg16[%c0_81, %c0_82] : memref<1x128xf32, #tpu.memory_space<vmem>>, vector<1x128xf32>
    %129 = vector.broadcast %128 : vector<1x128xf32> to vector<16x128xf32>
    %130 = arith.addf %127, %129 : vector<16x128xf32>
    %cst_83 = arith.constant 0.000000e+00 : f32
    %131 = vector.broadcast %cst_83 : f32 to vector<16x128xf32>
    %132 = arith.maximumf %130, %131 : vector<16x128xf32>
    %c0_84 = arith.constant 0 : index
    %c0_85 = arith.constant 0 : index
    %133 = vector.load %arg25[%c0_84, %c0_85] : memref<16x128xf32, #tpu.memory_space<vmem>>, vector<16x128xf32>
    tpu.vector_store %arg25[%c0_84, %c0_85], %96 {strides = array<i32>} : memref<16x128xf32, #tpu.memory_space<vmem>>, vector<16x128xf32>,
    %c0_86 = arith.constant 0 : index
    %c0_87 = arith.constant 0 : index
    %134 = vector.load %arg26[%c0_86, %c0_87] : memref<16x128xf32, #tpu.memory_space<vmem>>, vector<16x128xf32>
    tpu.vector_store %arg26[%c0_86, %c0_87], %115 {strides = array<i32>} : memref<16x128xf32, #tpu.memory_space<vmem>>, vector<16x128xf32>,
    %135 = arith.truncf %96 : vector<16x128xf32> to vector<16x128xbf16>
    %c0_88 = arith.constant 0 : index
    %c0_89 = arith.constant 0 : index
    %136 = vector.load %arg17[%c0_88, %c0_89] : memref<128x128xbf16, #tpu.memory_space<vmem>>, vector<128x128xbf16>
    %cst_90 = arith.constant dense<0.000000e+00> : vector<16x128xf32>
    %137 = tpu.matmul %135, %136, %cst_90 {dimension_numbers = #tpu.dot_dimension_numbers<[1], [0], [0], [1], [0, 0, 1, 1], [], []>} : vector<16x128xbf16>, vector<128x128xbf16>, vector<16x128xf32> -> vector<16x128xf32>
    %c0_91 = arith.constant 0 : index
    %c0_92 = arith.constant 0 : index
    %138 = vector.load %arg18[%c0_91, %c0_92] : memref<1x128xf32, #tpu.memory_space<vmem>>, vector<1x128xf32>
    %139 = vector.broadcast %138 : vector<1x128xf32> to vector<16x128xf32>
    %140 = arith.addf %137, %139 : vector<16x128xf32>
    %141 = arith.addf %132, %140 : vector<16x128xf32>
    %cst_93 = arith.constant 0.000000e+00 : f32
    %142 = vector.broadcast %cst_93 : f32 to vector<16x128xf32>
    %143 = arith.maximumf %141, %142 : vector<16x128xf32>
    %c0_94 = arith.constant 0 : index
    %c0_95 = arith.constant 0 : index
    %c0_96 = arith.constant 0 : index
    %144 = vector.load %arg19[%c0_94, %c0_95, %c0_96] : memref<1x16x128xf32, #tpu.memory_space<vmem>>, vector<1x16x128xf32>
    %145 = vector.shape_cast %144 : vector<1x16x128xf32> to vector<16x128xf32>
    %146 = vector.shape_cast %143 : vector<16x128xf32> to vector<1x16x128xf32>
    tpu.vector_store %arg19[%c0_94, %c0_95, %c0_96], %146 {strides = array<i32>} : memref<1x16x128xf32, #tpu.memory_space<vmem>>, vector<1x16x128xf32>,
    return
  }
  func.func @transform_0(%arg0: i32, %arg1: i32) -> (i32, i32, i32) {
    %c0_i32 = arith.constant 0 : i32
    %c0_i32_0 = arith.constant 0 : i32
    return %arg0, %arg1, %c0_i32 : i32, i32, i32
  }
  func.func @transform_1(%arg0: i32, %arg1: i32) -> (i32, i32) {
    %c0_i32 = arith.constant 0 : i32
    %c0_i32_0 = arith.constant 0 : i32
    %c0_i32_1 = arith.constant 0 : i32
    return %c0_i32, %c0_i32_0 : i32, i32
  }
  func.func @transform_2(%arg0: i32, %arg1: i32) -> (i32, i32) {
    %c0_i32 = arith.constant 0 : i32
    %c0_i32_0 = arith.constant 0 : i32
    %c0_i32_1 = arith.constant 0 : i32
    return %c0_i32, %c0_i32_0 : i32, i32
  }
  func.func @transform_3(%arg0: i32, %arg1: i32) -> (i32, i32) {
    %c0_i32 = arith.constant 0 : i32
    %c0_i32_0 = arith.constant 0 : i32
    %c0_i32_1 = arith.constant 0 : i32
    return %c0_i32, %c0_i32_0 : i32, i32
  }
  func.func @transform_4(%arg0: i32, %arg1: i32) -> (i32, i32) {
    %c0_i32 = arith.constant 0 : i32
    %c0_i32_0 = arith.constant 0 : i32
    %c0_i32_1 = arith.constant 0 : i32
    return %c0_i32, %c0_i32_0 : i32, i32
  }
  func.func @transform_5(%arg0: i32, %arg1: i32) -> (i32, i32) {
    %c0_i32 = arith.constant 0 : i32
    %c0_i32_0 = arith.constant 0 : i32
    %c0_i32_1 = arith.constant 0 : i32
    return %c0_i32, %c0_i32_0 : i32, i32
  }
  func.func @transform_6(%arg0: i32, %arg1: i32) -> (i32, i32) {
    %c0_i32 = arith.constant 0 : i32
    %c0_i32_0 = arith.constant 0 : i32
    %c0_i32_1 = arith.constant 0 : i32
    return %c0_i32, %c0_i32_0 : i32, i32
  }
  func.func @transform_7(%arg0: i32, %arg1: i32) -> (i32, i32) {
    %c0_i32 = arith.constant 0 : i32
    %c0_i32_0 = arith.constant 0 : i32
    %c0_i32_1 = arith.constant 0 : i32
    return %c0_i32, %c0_i32_0 : i32, i32
  }
  func.func @transform_8(%arg0: i32, %arg1: i32) -> (i32, i32) {
    %c0_i32 = arith.constant 0 : i32
    %c0_i32_0 = arith.constant 0 : i32
    %c0_i32_1 = arith.constant 0 : i32
    return %c0_i32, %c0_i32_0 : i32, i32
  }
  func.func @transform_9(%arg0: i32, %arg1: i32) -> (i32, i32) {
    %c0_i32 = arith.constant 0 : i32
    %c0_i32_0 = arith.constant 0 : i32
    %c0_i32_1 = arith.constant 0 : i32
    return %c0_i32, %c0_i32_0 : i32, i32
  }
  func.func @transform_10(%arg0: i32, %arg1: i32) -> (i32, i32) {
    %c0_i32 = arith.constant 0 : i32
    %c0_i32_0 = arith.constant 0 : i32
    %c0_i32_1 = arith.constant 0 : i32
    return %c0_i32, %c0_i32_0 : i32, i32
  }
  func.func @transform_11(%arg0: i32, %arg1: i32) -> (i32, i32) {
    %c0_i32 = arith.constant 0 : i32
    %c0_i32_0 = arith.constant 0 : i32
    %c0_i32_1 = arith.constant 0 : i32
    return %c0_i32, %c0_i32_0 : i32, i32
  }
  func.func @transform_12(%arg0: i32, %arg1: i32) -> (i32, i32) {
    %c0_i32 = arith.constant 0 : i32
    %c0_i32_0 = arith.constant 0 : i32
    %c0_i32_1 = arith.constant 0 : i32
    return %c0_i32, %c0_i32_0 : i32, i32
  }
  func.func @transform_13(%arg0: i32, %arg1: i32) -> (i32, i32) {
    %c0_i32 = arith.constant 0 : i32
    %c0_i32_0 = arith.constant 0 : i32
    %c0_i32_1 = arith.constant 0 : i32
    return %c0_i32, %c0_i32_0 : i32, i32
  }
  func.func @transform_14(%arg0: i32, %arg1: i32) -> (i32, i32) {
    %c0_i32 = arith.constant 0 : i32
    %c0_i32_0 = arith.constant 0 : i32
    %c0_i32_1 = arith.constant 0 : i32
    return %c0_i32, %c0_i32_0 : i32, i32
  }
  func.func @transform_15(%arg0: i32, %arg1: i32) -> (i32, i32) {
    %c0_i32 = arith.constant 0 : i32
    %c0_i32_0 = arith.constant 0 : i32
    %c0_i32_1 = arith.constant 0 : i32
    return %c0_i32, %c0_i32_0 : i32, i32
  }
  func.func @transform_16(%arg0: i32, %arg1: i32) -> (i32, i32) {
    %c0_i32 = arith.constant 0 : i32
    %c0_i32_0 = arith.constant 0 : i32
    %c0_i32_1 = arith.constant 0 : i32
    return %c0_i32, %c0_i32_0 : i32, i32
  }
  func.func @transform_17(%arg0: i32, %arg1: i32) -> (i32, i32, i32) {
    %c0_i32 = arith.constant 0 : i32
    %c0_i32_0 = arith.constant 0 : i32
    return %arg0, %arg1, %c0_i32 : i32, i32, i32
  }
}

module attributes {stable_mosaic.version = 11 : i64} {
  func.func @_tcn_fused_kernel(%arg0: i32, %arg1: i32, %arg2: memref<1x16x4xbf16, #tpu.memory_space<vmem>>, %arg3: memref<256x128xbf16, #tpu.memory_space<vmem>>, %arg4: memref<1x128xf32, #tpu.memory_space<vmem>>, %arg5: memref<256x128xbf16, #tpu.memory_space<vmem>>, %arg6: memref<1x128xf32, #tpu.memory_space<vmem>>, %arg7: memref<128x128xbf16, #tpu.memory_space<vmem>>, %arg8: memref<1x128xf32, #tpu.memory_space<vmem>>, %arg9: memref<256x128xbf16, #tpu.memory_space<vmem>>, %arg10: memref<1x128xf32, #tpu.memory_space<vmem>>, %arg11: memref<256x128xbf16, #tpu.memory_space<vmem>>, %arg12: memref<1x128xf32, #tpu.memory_space<vmem>>, %arg13: memref<256x128xbf16, #tpu.memory_space<vmem>>, %arg14: memref<1x128xf32, #tpu.memory_space<vmem>>, %arg15: memref<256x128xbf16, #tpu.memory_space<vmem>>, %arg16: memref<1x128xf32, #tpu.memory_space<vmem>>, %arg17: memref<128x128xbf16, #tpu.memory_space<vmem>>, %arg18: memref<1x128xf32, #tpu.memory_space<vmem>>, %arg19: memref<1x16x128xf32, #tpu.memory_space<vmem>>, %arg20: memref<16x128xf32, #tpu.memory_space<vmem>>, %arg21: memref<16x128xf32, #tpu.memory_space<vmem>>, %arg22: memref<16x128xf32, #tpu.memory_space<vmem>>, %arg23: memref<16x128xf32, #tpu.memory_space<vmem>>, %arg24: memref<16x128xf32, #tpu.memory_space<vmem>>, %arg25: memref<16x128xf32, #tpu.memory_space<vmem>>, %arg26: memref<16x128xf32, #tpu.memory_space<vmem>>) attributes {dimension_semantics = [#tpu.dimension_semantics<parallel>, #tpu.dimension_semantics<arbitrary>], iteration_bounds = array<i64: 2, 2>, scalar_prefetch = 0 : i64, scratch_operands = 7 : i64, tpu.core_type = #tpu.core_type<tc>, window_params = [{transform_indices = @transform_0, window_bounds = array<i64: 1, 16, 4>}, {pipeline_mode = #tpu.pipeline_mode<synchronous>, transform_indices = @transform_1, window_bounds = array<i64: 256, 128>}, {pipeline_mode = #tpu.pipeline_mode<synchronous>, transform_indices = @transform_2, window_bounds = array<i64: 1, 128>}, {pipeline_mode = #tpu.pipeline_mode<synchronous>, transform_indices = @transform_3, window_bounds = array<i64: 256, 128>}, {pipeline_mode = #tpu.pipeline_mode<synchronous>, transform_indices = @transform_4, window_bounds = array<i64: 1, 128>}, {pipeline_mode = #tpu.pipeline_mode<synchronous>, transform_indices = @transform_5, window_bounds = array<i64: 128, 128>}, {pipeline_mode = #tpu.pipeline_mode<synchronous>, transform_indices = @transform_6, window_bounds = array<i64: 1, 128>}, {pipeline_mode = #tpu.pipeline_mode<synchronous>, transform_indices = @transform_7, window_bounds = array<i64: 256, 128>}, {pipeline_mode = #tpu.pipeline_mode<synchronous>, transform_indices = @transform_8, window_bounds = array<i64: 1, 128>}, {pipeline_mode = #tpu.pipeline_mode<synchronous>, transform_indices = @transform_9, window_bounds = array<i64: 256, 128>}, {pipeline_mode = #tpu.pipeline_mode<synchronous>, transform_indices = @transform_10, window_bounds = array<i64: 1, 128>}, {pipeline_mode = #tpu.pipeline_mode<synchronous>, transform_indices = @transform_11, window_bounds = array<i64: 256, 128>}, {pipeline_mode = #tpu.pipeline_mode<synchronous>, transform_indices = @transform_12, window_bounds = array<i64: 1, 128>}, {pipeline_mode = #tpu.pipeline_mode<synchronous>, transform_indices = @transform_13, window_bounds = array<i64: 256, 128>}, {pipeline_mode = #tpu.pipeline_mode<synchronous>, transform_indices = @transform_14, window_bounds = array<i64: 1, 128>}, {pipeline_mode = #tpu.pipeline_mode<synchronous>, transform_indices = @transform_15, window_bounds = array<i64: 128, 128>}, {pipeline_mode = #tpu.pipeline_mode<synchronous>, transform_indices = @transform_16, window_bounds = array<i64: 1, 128>}, {transform_indices = @transform_17, window_bounds = array<i64: 1, 16, 128>}]} {
    %c0_i32 = arith.constant 0 : i32
    %0 = arith.cmpi eq, %arg1, %c0_i32 : i32
    %1 = arith.extui %0 : i1 to i32
    %c0_i32_0 = arith.constant 0 : i32
    %2 = arith.cmpi ne, %1, %c0_i32_0 : i32
    scf.if %2 {
      %cst_97 = arith.constant 0.000000e+00 : f32
      %147 = vector.broadcast %cst_97 : f32 to vector<16x128xf32>
      %c0_98 = arith.constant 0 : index
      %c0_99 = arith.constant 0 : index
      %148 = vector.load %arg20[%c0_98, %c0_99] : memref<16x128xf32, #tpu.memory_space<vmem>>, vector<16x128xf32>
      tpu.vector_store %arg20[%c0_98, %c0_99], %147 {strides = array<i32>} : memref<16x128xf32, #tpu.memory_space<vmem>>, vector<16x128xf32>,
      %cst_100 = arith.constant 0.000000e+00 : f32
      %149 = vector.broadcast %cst_100 : f32 to vector<16x128xf32>
      %c0_101 = arith.constant 0 : index
      %c0_102 = arith.constant 0 : index
      %150 = vector.load %arg21[%c0_101, %c0_102] : memref<16x128xf32, #tpu.memory_space<vmem>>, vector<16x128xf32>
      tpu.vector_store %arg21[%c0_101, %c0_102], %149 {strides = array<i32>} : memref<16x128xf32, #tpu.memory_space<vmem>>, vector<16x128xf32>,
      %cst_103 = arith.constant 0.000000e+00 : f32
      %151 = vector.broadcast %cst_103 : f32 to vector<16x128xf32>
      %c0_104 = arith.constant 0 : index
      %c0_105 = arith.constant 0 : index
      %152 = vector.load %arg22[%c0_104, %c0_105] : memref<16x128xf32, #tpu.memory_space<vmem>>, vector<16x128xf32>
      tpu.vector_store %arg22[%c0_104, %c0_105], %151 {strides = array<i32>} : memref<16x128xf32, #tpu.memory_space<vmem>>, vector<16x128xf32>,
      %cst_106 = arith.constant 0.000000e+00 : f32
      %153 = vector.broadcast %cst_106 : f32 to vector<16x128xf32>
      %c0_107 = arith.constant 0 : index
      %c0_108 = arith.constant 0 : index
      %154 = vector.load %arg23[%c0_107, %c0_108] : memref<16x128xf32, #tpu.memory_space<vmem>>, vector<16x128xf32>
      tpu.vector_store %arg23[%c0_107, %c0_108], %153 {strides = array<i32>} : memref<16x128xf32, #tpu.memory_space<vmem>>, vector<16x128xf32>,
      %cst_109 = arith.constant 0.000000e+00 : f32
      %155 = vector.broadcast %cst_109 : f32 to vector<16x128xf32>
      %c0_110 = arith.constant 0 : index
      %c0_111 = arith.constant 0 : index
      %156 = vector.load %arg24[%c0_110, %c0_111] : memref<16x128xf32, #tpu.memory_space<vmem>>, vector<16x128xf32>
      tpu.vector_store %arg24[%c0_110, %c0_111], %155 {strides = array<i32>} : memref<16x128xf32, #tpu.memory_space<vmem>>, vector<16x128xf32>,
      %cst_112 = arith.constant 0.000000e+00 : f32
      %157 = vector.broadcast %cst_112 : f32 to vector<16x128xf32>
      %c0_113 = arith.constant 0 : index
      %c0_114 = arith.constant 0 : index
      %158 = vector.load %arg25[%c0_113, %c0_114] : memref<16x128xf32, #tpu.memory_space<vmem>>, vector<16x128xf32>
      tpu.vector_store %arg25[%c0_113, %c0_114], %157 {strides = array<i32>} : memref<16x128xf32, #tpu.memory_space<vmem>>, vector<16x128xf32>,
      %cst_115 = arith.constant 0.000000e+00 : f32
      %159 = vector.broadcast %cst_115 : f32 to vector<16x128xf32>
      %c0_116 = arith.constant 0 : index
      %c0_117 = arith.constant 0 : index
      %160 = vector.load %arg26[%c0_116, %c0_117] : memref<16x128xf32, #tpu.memory_space<vmem>>, vector<16x128xf32>
      tpu.vector_store %arg26[%c0_116, %c0_117], %159 {strides = array<i32>} : memref<16x128xf32, #tpu.memory_space<vmem>>, vector<16x128xf32>,
    } else {
    }
    %c0 = arith.constant 0 : index
    %c0_1 = arith.constant 0 : index
    %c0_2 = arith.constant 0 : index
    %3 = vector.load %arg2[%c0, %c0_1, %c0_2] : memref<1x16x4xbf16, #tpu.memory_space<vmem>>, vector<1x16x4xbf16>
    %4 = vector.shape_cast %3 : vector<1x16x4xbf16> to vector<16x4xbf16>
    %5 = arith.extf %4 : vector<16x4xbf16> to vector<16x4xf32>
    %c0_3 = arith.constant 0 : index
    %c0_4 = arith.constant 0 : index
    %6 = vector.load %arg20[%c0_3, %c0_4] : memref<16x128xf32, #tpu.memory_space<vmem>>, vector<16x4xf32>
    tpu.vector_store %arg20[%c0_3, %c0_4], %5 {strides = array<i32>} : memref<16x128xf32, #tpu.memory_space<vmem>>, vector<16x4xf32>,
    %c0_5 = arith.constant 0 : index
    %c0_6 = arith.constant 0 : index
    %7 = vector.load %arg20[%c0_5, %c0_6] : memref<16x128xf32, #tpu.memory_space<vmem>>, vector<16x128xf32>
    %8 = tpu.iota {dimensions = array<i32: 0>} : vector<16x1xi32>
    %c0_7 = arith.constant 0 : index
    %c0_8 = arith.constant 0 : index
    %9 = vector.load %arg21[%c0_7, %c0_8] : memref<16x128xf32, #tpu.memory_space<vmem>>, vector<16x128xf32>
    %c0_9 = arith.constant 0 : index
    %c0_10 = arith.constant 0 : index
    %10 = vector.load %arg22[%c0_9, %c0_10] : memref<16x128xf32, #tpu.memory_space<vmem>>, vector<16x128xf32>
    %c1_i32 = arith.constant 1 : i32
    %11 = tpu.dynamic_rotate %7 by %c1_i32 dim 0 : vector<16x128xf32>, i32 -> vector<16x128xf32>
    %c1_i32_11 = arith.constant 1 : i32
    %12 = tpu.dynamic_rotate %9 by %c1_i32_11 dim 0 : vector<16x128xf32>, i32 -> vector<16x128xf32>
    %c1_i32_12 = arith.constant 1 : i32
    %13 = vector.broadcast %c1_i32_12 : i32 to vector<16x1xi32>
    %14 = arith.cmpi sge, %8, %13 : vector<16x1xi32>
    %15 = vector.shape_cast %14 : vector<16x1xi1> to vector<16x1xi1>
    %16 = vector.broadcast %15 : vector<16x1xi1> to vector<16x128xi1>
    %17 = arith.select %16, %11, %12 : vector<16x128xi1>, vector<16x128xf32>
    %18 = arith.truncf %17 : vector<16x128xf32> to vector<16x128xbf16>
    %19 = arith.truncf %7 : vector<16x128xf32> to vector<16x128xbf16>
    %20 = tpu.concatenate %18, %19 in 1 : vector<16x128xbf16>, vector<16x128xbf16> -> vector<16x256xbf16>
    %c0_13 = arith.constant 0 : index
    %c0_14 = arith.constant 0 : index
    %21 = vector.load %arg3[%c0_13, %c0_14] : memref<256x128xbf16, #tpu.memory_space<vmem>>, vector<256x128xbf16>
    %cst = arith.constant dense<0.000000e+00> : vector<16x128xf32>
    %22 = tpu.matmul %20, %21, %cst {dimension_numbers = #tpu.dot_dimension_numbers<[1], [0], [0], [1], [0, 0, 1, 1], [], []>} : vector<16x256xbf16>, vector<256x128xbf16>, vector<16x128xf32> -> vector<16x128xf32>
    %c0_15 = arith.constant 0 : index
    %c0_16 = arith.constant 0 : index
    %23 = vector.load %arg4[%c0_15, %c0_16] : memref<1x128xf32, #tpu.memory_space<vmem>>, vector<1x128xf32>
    %24 = vector.broadcast %23 : vector<1x128xf32> to vector<16x128xf32>
    %25 = arith.addf %22, %24 : vector<16x128xf32>
    %cst_17 = arith.constant 0.000000e+00 : f32
    %26 = vector.broadcast %cst_17 : f32 to vector<16x128xf32>
    %27 = arith.maximumf %25, %26 : vector<16x128xf32>
    %c1_i32_18 = arith.constant 1 : i32
    %28 = tpu.dynamic_rotate %27 by %c1_i32_18 dim 0 : vector<16x128xf32>, i32 -> vector<16x128xf32>
    %c1_i32_19 = arith.constant 1 : i32
    %29 = tpu.dynamic_rotate %10 by %c1_i32_19 dim 0 : vector<16x128xf32>, i32 -> vector<16x128xf32>
    %c1_i32_20 = arith.constant 1 : i32
    %30 = vector.broadcast %c1_i32_20 : i32 to vector<16x1xi32>
    %31 = arith.cmpi sge, %8, %30 : vector<16x1xi32>
    %32 = vector.shape_cast %31 : vector<16x1xi1> to vector<16x1xi1>
    %33 = vector.broadcast %32 : vector<16x1xi1> to vector<16x128xi1>
    %34 = arith.select %33, %28, %29 : vector<16x128xi1>, vector<16x128xf32>
    %35 = arith.truncf %34 : vector<16x128xf32> to vector<16x128xbf16>
    %36 = arith.truncf %27 : vector<16x128xf32> to vector<16x128xbf16>
    %37 = tpu.concatenate %35, %36 in 1 : vector<16x128xbf16>, vector<16x128xbf16> -> vector<16x256xbf16>
    %c0_21 = arith.constant 0 : index
    %c0_22 = arith.constant 0 : index
    %38 = vector.load %arg5[%c0_21, %c0_22] : memref<256x128xbf16, #tpu.memory_space<vmem>>, vector<256x128xbf16>
    %cst_23 = arith.constant dense<0.000000e+00> : vector<16x128xf32>
    %39 = tpu.matmul %37, %38, %cst_23 {dimension_numbers = #tpu.dot_dimension_numbers<[1], [0], [0], [1], [0, 0, 1, 1], [], []>} : vector<16x256xbf16>, vector<256x128xbf16>, vector<16x128xf32> -> vector<16x128xf32>
    %c0_24 = arith.constant 0 : index
    %c0_25 = arith.constant 0 : index
    %40 = vector.load %arg6[%c0_24, %c0_25] : memref<1x128xf32, #tpu.memory_space<vmem>>, vector<1x128xf32>
    %41 = vector.broadcast %40 : vector<1x128xf32> to vector<16x128xf32>
    %42 = arith.addf %39, %41 : vector<16x128xf32>
    %cst_26 = arith.constant 0.000000e+00 : f32
    %43 = vector.broadcast %cst_26 : f32 to vector<16x128xf32>
    %44 = arith.maximumf %42, %43 : vector<16x128xf32>
    %c0_27 = arith.constant 0 : index
    %c0_28 = arith.constant 0 : index
    %45 = vector.load %arg21[%c0_27, %c0_28] : memref<16x128xf32, #tpu.memory_space<vmem>>, vector<16x128xf32>
    tpu.vector_store %arg21[%c0_27, %c0_28], %7 {strides = array<i32>} : memref<16x128xf32, #tpu.memory_space<vmem>>, vector<16x128xf32>,
    %c0_29 = arith.constant 0 : index
    %c0_30 = arith.constant 0 : index
    %46 = vector.load %arg22[%c0_29, %c0_30] : memref<16x128xf32, #tpu.memory_space<vmem>>, vector<16x128xf32>
    tpu.vector_store %arg22[%c0_29, %c0_30], %27 {strides = array<i32>} : memref<16x128xf32, #tpu.memory_space<vmem>>, vector<16x128xf32>,
    %47 = arith.truncf %7 : vector<16x128xf32> to vector<16x128xbf16>
    %c0_31 = arith.constant 0 : index
    %c0_32 = arith.constant 0 : index
    %48 = vector.load %arg7[%c0_31, %c0_32] : memref<128x128xbf16, #tpu.memory_space<vmem>>, vector<128x128xbf16>
    %cst_33 = arith.constant dense<0.000000e+00> : vector<16x128xf32>
    %49 = tpu.matmul %47, %48, %cst_33 {dimension_numbers = #tpu.dot_dimension_numbers<[1], [0], [0], [1], [0, 0, 1, 1], [], []>} : vector<16x128xbf16>, vector<128x128xbf16>, vector<16x128xf32> -> vector<16x128xf32>
    %c0_34 = arith.constant 0 : index
    %c0_35 = arith.constant 0 : index
    %50 = vector.load %arg8[%c0_34, %c0_35] : memref<1x128xf32, #tpu.memory_space<vmem>>, vector<1x128xf32>
    %51 = vector.broadcast %50 : vector<1x128xf32> to vector<16x128xf32>
    %52 = arith.addf %49, %51 : vector<16x128xf32>
    %53 = arith.addf %44, %52 : vector<16x128xf32>
    %cst_36 = arith.constant 0.000000e+00 : f32
    %54 = vector.broadcast %cst_36 : f32 to vector<16x128xf32>
    %55 = arith.maximumf %53, %54 : vector<16x128xf32>
    %c0_37 = arith.constant 0 : index
    %c0_38 = arith.constant 0 : index
    %56 = vector.load %arg23[%c0_37, %c0_38] : memref<16x128xf32, #tpu.memory_space<vmem>>, vector<16x128xf32>
    %c0_39 = arith.constant 0 : index
    %c0_40 = arith.constant 0 : index
    %57 = vector.load %arg24[%c0_39, %c0_40] : memref<16x128xf32, #tpu.memory_space<vmem>>, vector<16x128xf32>
    %c2_i32 = arith.constant 2 : i32
    %58 = tpu.dynamic_rotate %55 by %c2_i32 dim 0 : vector<16x128xf32>, i32 -> vector<16x128xf32>
    %c2_i32_41 = arith.constant 2 : i32
    %59 = tpu.dynamic_rotate %56 by %c2_i32_41 dim 0 : vector<16x128xf32>, i32 -> vector<16x128xf32>
    %c2_i32_42 = arith.constant 2 : i32
    %60 = vector.broadcast %c2_i32_42 : i32 to vector<16x1xi32>
    %61 = arith.cmpi sge, %8, %60 : vector<16x1xi32>
    %62 = vector.shape_cast %61 : vector<16x1xi1> to vector<16x1xi1>
    %63 = vector.broadcast %62 : vector<16x1xi1> to vector<16x128xi1>
    %64 = arith.select %63, %58, %59 : vector<16x128xi1>, vector<16x128xf32>
    %65 = arith.truncf %64 : vector<16x128xf32> to vector<16x128xbf16>
    %66 = arith.truncf %55 : vector<16x128xf32> to vector<16x128xbf16>
    %67 = tpu.concatenate %65, %66 in 1 : vector<16x128xbf16>, vector<16x128xbf16> -> vector<16x256xbf16>
    %c0_43 = arith.constant 0 : index
    %c0_44 = arith.constant 0 : index
    %68 = vector.load %arg9[%c0_43, %c0_44] : memref<256x128xbf16, #tpu.memory_space<vmem>>, vector<256x128xbf16>
    %cst_45 = arith.constant dense<0.000000e+00> : vector<16x128xf32>
    %69 = tpu.matmul %67, %68, %cst_45 {dimension_numbers = #tpu.dot_dimension_numbers<[1], [0], [0], [1], [0, 0, 1, 1], [], []>} : vector<16x256xbf16>, vector<256x128xbf16>, vector<16x128xf32> -> vector<16x128xf32>
    %c0_46 = arith.constant 0 : index
    %c0_47 = arith.constant 0 : index
    %70 = vector.load %arg10[%c0_46, %c0_47] : memref<1x128xf32, #tpu.memory_space<vmem>>, vector<1x128xf32>
    %71 = vector.broadcast %70 : vector<1x128xf32> to vector<16x128xf32>
    %72 = arith.addf %69, %71 : vector<16x128xf32>
    %cst_48 = arith.constant 0.000000e+00 : f32
    %73 = vector.broadcast %cst_48 : f32 to vector<16x128xf32>
    %74 = arith.maximumf %72, %73 : vector<16x128xf32>
    %c2_i32_49 = arith.constant 2 : i32
    %75 = tpu.dynamic_rotate %74 by %c2_i32_49 dim 0 : vector<16x128xf32>, i32 -> vector<16x128xf32>
    %c2_i32_50 = arith.constant 2 : i32
    %76 = tpu.dynamic_rotate %57 by %c2_i32_50 dim 0 : vector<16x128xf32>, i32 -> vector<16x128xf32>
    %c2_i32_51 = arith.constant 2 : i32
    %77 = vector.broadcast %c2_i32_51 : i32 to vector<16x1xi32>
    %78 = arith.cmpi sge, %8, %77 : vector<16x1xi32>
    %79 = vector.shape_cast %78 : vector<16x1xi1> to vector<16x1xi1>
    %80 = vector.broadcast %79 : vector<16x1xi1> to vector<16x128xi1>
    %81 = arith.select %80, %75, %76 : vector<16x128xi1>, vector<16x128xf32>
    %82 = arith.truncf %81 : vector<16x128xf32> to vector<16x128xbf16>
    %83 = arith.truncf %74 : vector<16x128xf32> to vector<16x128xbf16>
    %84 = tpu.concatenate %82, %83 in 1 : vector<16x128xbf16>, vector<16x128xbf16> -> vector<16x256xbf16>
    %c0_52 = arith.constant 0 : index
    %c0_53 = arith.constant 0 : index
    %85 = vector.load %arg11[%c0_52, %c0_53] : memref<256x128xbf16, #tpu.memory_space<vmem>>, vector<256x128xbf16>
    %cst_54 = arith.constant dense<0.000000e+00> : vector<16x128xf32>
    %86 = tpu.matmul %84, %85, %cst_54 {dimension_numbers = #tpu.dot_dimension_numbers<[1], [0], [0], [1], [0, 0, 1, 1], [], []>} : vector<16x256xbf16>, vector<256x128xbf16>, vector<16x128xf32> -> vector<16x128xf32>
    %c0_55 = arith.constant 0 : index
    %c0_56 = arith.constant 0 : index
    %87 = vector.load %arg12[%c0_55, %c0_56] : memref<1x128xf32, #tpu.memory_space<vmem>>, vector<1x128xf32>
    %88 = vector.broadcast %87 : vector<1x128xf32> to vector<16x128xf32>
    %89 = arith.addf %86, %88 : vector<16x128xf32>
    %cst_57 = arith.constant 0.000000e+00 : f32
    %90 = vector.broadcast %cst_57 : f32 to vector<16x128xf32>
    %91 = arith.maximumf %89, %90 : vector<16x128xf32>
    %c0_58 = arith.constant 0 : index
    %c0_59 = arith.constant 0 : index
    %92 = vector.load %arg23[%c0_58, %c0_59] : memref<16x128xf32, #tpu.memory_space<vmem>>, vector<16x128xf32>
    tpu.vector_store %arg23[%c0_58, %c0_59], %55 {strides = array<i32>} : memref<16x128xf32, #tpu.memory_space<vmem>>, vector<16x128xf32>,
    %c0_60 = arith.constant 0 : index
    %c0_61 = arith.constant 0 : index
    %93 = vector.load %arg24[%c0_60, %c0_61] : memref<16x128xf32, #tpu.memory_space<vmem>>, vector<16x128xf32>
    tpu.vector_store %arg24[%c0_60, %c0_61], %74 {strides = array<i32>} : memref<16x128xf32, #tpu.memory_space<vmem>>, vector<16x128xf32>,
    %94 = arith.addf %91, %55 : vector<16x128xf32>
    %cst_62 = arith.constant 0.000000e+00 : f32
    %95 = vector.broadcast %cst_62 : f32 to vector<16x128xf32>
    %96 = arith.maximumf %94, %95 : vector<16x128xf32>
    %c0_63 = arith.constant 0 : index
    %c0_64 = arith.constant 0 : index
    %97 = vector.load %arg25[%c0_63, %c0_64] : memref<16x128xf32, #tpu.memory_space<vmem>>, vector<16x128xf32>
    %c0_65 = arith.constant 0 : index
    %c0_66 = arith.constant 0 : index
    %98 = vector.load %arg26[%c0_65, %c0_66] : memref<16x128xf32, #tpu.memory_space<vmem>>, vector<16x128xf32>
    %c4_i32 = arith.constant 4 : i32
    %99 = tpu.dynamic_rotate %96 by %c4_i32 dim 0 : vector<16x128xf32>, i32 -> vector<16x128xf32>
    %c4_i32_67 = arith.constant 4 : i32
    %100 = tpu.dynamic_rotate %97 by %c4_i32_67 dim 0 : vector<16x128xf32>, i32 -> vector<16x128xf32>
    %c4_i32_68 = arith.constant 4 : i32
    %101 = vector.broadcast %c4_i32_68 : i32 to vector<16x1xi32>
    %102 = arith.cmpi sge, %8, %101 : vector<16x1xi32>
    %103 = vector.shape_cast %102 : vector<16x1xi1> to vector<16x1xi1>
    %104 = vector.broadcast %103 : vector<16x1xi1> to vector<16x128xi1>
    %105 = arith.select %104, %99, %100 : vector<16x128xi1>, vector<16x128xf32>
    %106 = arith.truncf %105 : vector<16x128xf32> to vector<16x128xbf16>
    %107 = arith.truncf %96 : vector<16x128xf32> to vector<16x128xbf16>
    %108 = tpu.concatenate %106, %107 in 1 : vector<16x128xbf16>, vector<16x128xbf16> -> vector<16x256xbf16>
    %c0_69 = arith.constant 0 : index
    %c0_70 = arith.constant 0 : index
    %109 = vector.load %arg13[%c0_69, %c0_70] : memref<256x128xbf16, #tpu.memory_space<vmem>>, vector<256x128xbf16>
    %cst_71 = arith.constant dense<0.000000e+00> : vector<16x128xf32>
    %110 = tpu.matmul %108, %109, %cst_71 {dimension_numbers = #tpu.dot_dimension_numbers<[1], [0], [0], [1], [0, 0, 1, 1], [], []>} : vector<16x256xbf16>, vector<256x128xbf16>, vector<16x128xf32> -> vector<16x128xf32>
    %c0_72 = arith.constant 0 : index
    %c0_73 = arith.constant 0 : index
    %111 = vector.load %arg14[%c0_72, %c0_73] : memref<1x128xf32, #tpu.memory_space<vmem>>, vector<1x128xf32>
    %112 = vector.broadcast %111 : vector<1x128xf32> to vector<16x128xf32>
    %113 = arith.addf %110, %112 : vector<16x128xf32>
    %cst_74 = arith.constant 0.000000e+00 : f32
    %114 = vector.broadcast %cst_74 : f32 to vector<16x128xf32>
    %115 = arith.maximumf %113, %114 : vector<16x128xf32>
    %c4_i32_75 = arith.constant 4 : i32
    %116 = tpu.dynamic_rotate %115 by %c4_i32_75 dim 0 : vector<16x128xf32>, i32 -> vector<16x128xf32>
    %c4_i32_76 = arith.constant 4 : i32
    %117 = tpu.dynamic_rotate %98 by %c4_i32_76 dim 0 : vector<16x128xf32>, i32 -> vector<16x128xf32>
    %c4_i32_77 = arith.constant 4 : i32
    %118 = vector.broadcast %c4_i32_77 : i32 to vector<16x1xi32>
    %119 = arith.cmpi sge, %8, %118 : vector<16x1xi32>
    %120 = vector.shape_cast %119 : vector<16x1xi1> to vector<16x1xi1>
    %121 = vector.broadcast %120 : vector<16x1xi1> to vector<16x128xi1>
    %122 = arith.select %121, %116, %117 : vector<16x128xi1>, vector<16x128xf32>
    %123 = arith.truncf %122 : vector<16x128xf32> to vector<16x128xbf16>
    %124 = arith.truncf %115 : vector<16x128xf32> to vector<16x128xbf16>
    %125 = tpu.concatenate %123, %124 in 1 : vector<16x128xbf16>, vector<16x128xbf16> -> vector<16x256xbf16>
    %c0_78 = arith.constant 0 : index
    %c0_79 = arith.constant 0 : index
    %126 = vector.load %arg15[%c0_78, %c0_79] : memref<256x128xbf16, #tpu.memory_space<vmem>>, vector<256x128xbf16>
    %cst_80 = arith.constant dense<0.000000e+00> : vector<16x128xf32>
    %127 = tpu.matmul %125, %126, %cst_80 {dimension_numbers = #tpu.dot_dimension_numbers<[1], [0], [0], [1], [0, 0, 1, 1], [], []>} : vector<16x256xbf16>, vector<256x128xbf16>, vector<16x128xf32> -> vector<16x128xf32>
    %c0_81 = arith.constant 0 : index
    %c0_82 = arith.constant 0 : index
    %128 = vector.load %arg16[%c0_81, %c0_82] : memref<1x128xf32, #tpu.memory_space<vmem>>, vector<1x128xf32>
    %129 = vector.broadcast %128 : vector<1x128xf32> to vector<16x128xf32>
    %130 = arith.addf %127, %129 : vector<16x128xf32>
    %cst_83 = arith.constant 0.000000e+00 : f32
    %131 = vector.broadcast %cst_83 : f32 to vector<16x128xf32>
    %132 = arith.maximumf %130, %131 : vector<16x128xf32>
    %c0_84 = arith.constant 0 : index
    %c0_85 = arith.constant 0 : index
    %133 = vector.load %arg25[%c0_84, %c0_85] : memref<16x128xf32, #tpu.memory_space<vmem>>, vector<16x128xf32>
    tpu.vector_store %arg25[%c0_84, %c0_85], %96 {strides = array<i32>} : memref<16x128xf32, #tpu.memory_space<vmem>>, vector<16x128xf32>,
    %c0_86 = arith.constant 0 : index
    %c0_87 = arith.constant 0 : index
    %134 = vector.load %arg26[%c0_86, %c0_87] : memref<16x128xf32, #tpu.memory_space<vmem>>, vector<16x128xf32>
    tpu.vector_store %arg26[%c0_86, %c0_87], %115 {strides = array<i32>} : memref<16x128xf32, #tpu.memory_space<vmem>>, vector<16x128xf32>,
    %135 = arith.truncf %96 : vector<16x128xf32> to vector<16x128xbf16>
    %c0_88 = arith.constant 0 : index
    %c0_89 = arith.constant 0 : index
    %136 = vector.load %arg17[%c0_88, %c0_89] : memref<128x128xbf16, #tpu.memory_space<vmem>>, vector<128x128xbf16>
    %cst_90 = arith.constant dense<0.000000e+00> : vector<16x128xf32>
    %137 = tpu.matmul %135, %136, %cst_90 {dimension_numbers = #tpu.dot_dimension_numbers<[1], [0], [0], [1], [0, 0, 1, 1], [], []>} : vector<16x128xbf16>, vector<128x128xbf16>, vector<16x128xf32> -> vector<16x128xf32>
    %c0_91 = arith.constant 0 : index
    %c0_92 = arith.constant 0 : index
    %138 = vector.load %arg18[%c0_91, %c0_92] : memref<1x128xf32, #tpu.memory_space<vmem>>, vector<1x128xf32>
    %139 = vector.broadcast %138 : vector<1x128xf32> to vector<16x128xf32>
    %140 = arith.addf %137, %139 : vector<16x128xf32>
    %141 = arith.addf %132, %140 : vector<16x128xf32>
    %cst_93 = arith.constant 0.000000e+00 : f32
    %142 = vector.broadcast %cst_93 : f32 to vector<16x128xf32>
    %143 = arith.maximumf %141, %142 : vector<16x128xf32>
    %c0_94 = arith.constant 0 : index
    %c0_95 = arith.constant 0 : index
    %c0_96 = arith.constant 0 : index
    %144 = vector.load %arg19[%c0_94, %c0_95, %c0_96] : memref<1x16x128xf32, #tpu.memory_space<vmem>>, vector<1x16x128xf32>
    %145 = vector.shape_cast %144 : vector<1x16x128xf32> to vector<16x128xf32>
    %146 = vector.shape_cast %143 : vector<16x128xf32> to vector<1x16x128xf32>
    tpu.vector_store %arg19[%c0_94, %c0_95, %c0_96], %146 {strides = array<i32>} : memref<1x16x128xf32, #tpu.memory_space<vmem>>, vector<1x16x128xf32>,
    return
  }
  func.func @transform_0(%arg0: i32, %arg1: i32) -> (i32, i32, i32) {
    %c0_i32 = arith.constant 0 : i32
    %c0_i32_0 = arith.constant 0 : i32
    return %arg0, %arg1, %c0_i32 : i32, i32, i32
  }
  func.func @transform_1(%arg0: i32, %arg1: i32) -> (i32, i32) {
    %c0_i32 = arith.constant 0 : i32
    %c0_i32_0 = arith.constant 0 : i32
    %c0_i32_1 = arith.constant 0 : i32
    return %c0_i32, %c0_i32_0 : i32, i32
  }
  func.func @transform_2(%arg0: i32, %arg1: i32) -> (i32, i32) {
    %c0_i32 = arith.constant 0 : i32
    %c0_i32_0 = arith.constant 0 : i32
    %c0_i32_1 = arith.constant 0 : i32
    return %c0_i32, %c0_i32_0 : i32, i32
  }
  func.func @transform_3(%arg0: i32, %arg1: i32) -> (i32, i32) {
    %c0_i32 = arith.constant 0 : i32
    %c0_i32_0 = arith.constant 0 : i32
    %c0_i32_1 = arith.constant 0 : i32
    return %c0_i32, %c0_i32_0 : i32, i32
  }
  func.func @transform_4(%arg0: i32, %arg1: i32) -> (i32, i32) {
    %c0_i32 = arith.constant 0 : i32
    %c0_i32_0 = arith.constant 0 : i32
    %c0_i32_1 = arith.constant 0 : i32
    return %c0_i32, %c0_i32_0 : i32, i32
  }
  func.func @transform_5(%arg0: i32, %arg1: i32) -> (i32, i32) {
    %c0_i32 = arith.constant 0 : i32
    %c0_i32_0 = arith.constant 0 : i32
    %c0_i32_1 = arith.constant 0 : i32
    return %c0_i32, %c0_i32_0 : i32, i32
  }
  func.func @transform_6(%arg0: i32, %arg1: i32) -> (i32, i32) {
    %c0_i32 = arith.constant 0 : i32
    %c0_i32_0 = arith.constant 0 : i32
    %c0_i32_1 = arith.constant 0 : i32
    return %c0_i32, %c0_i32_0 : i32, i32
  }
  func.func @transform_7(%arg0: i32, %arg1: i32) -> (i32, i32) {
    %c0_i32 = arith.constant 0 : i32
    %c0_i32_0 = arith.constant 0 : i32
    %c0_i32_1 = arith.constant 0 : i32
    return %c0_i32, %c0_i32_0 : i32, i32
  }
  func.func @transform_8(%arg0: i32, %arg1: i32) -> (i32, i32) {
    %c0_i32 = arith.constant 0 : i32
    %c0_i32_0 = arith.constant 0 : i32
    %c0_i32_1 = arith.constant 0 : i32
    return %c0_i32, %c0_i32_0 : i32, i32
  }
  func.func @transform_9(%arg0: i32, %arg1: i32) -> (i32, i32) {
    %c0_i32 = arith.constant 0 : i32
    %c0_i32_0 = arith.constant 0 : i32
    %c0_i32_1 = arith.constant 0 : i32
    return %c0_i32, %c0_i32_0 : i32, i32
  }
  func.func @transform_10(%arg0: i32, %arg1: i32) -> (i32, i32) {
    %c0_i32 = arith.constant 0 : i32
    %c0_i32_0 = arith.constant 0 : i32
    %c0_i32_1 = arith.constant 0 : i32
    return %c0_i32, %c0_i32_0 : i32, i32
  }
  func.func @transform_11(%arg0: i32, %arg1: i32) -> (i32, i32) {
    %c0_i32 = arith.constant 0 : i32
    %c0_i32_0 = arith.constant 0 : i32
    %c0_i32_1 = arith.constant 0 : i32
    return %c0_i32, %c0_i32_0 : i32, i32
  }
  func.func @transform_12(%arg0: i32, %arg1: i32) -> (i32, i32) {
    %c0_i32 = arith.constant 0 : i32
    %c0_i32_0 = arith.constant 0 : i32
    %c0_i32_1 = arith.constant 0 : i32
    return %c0_i32, %c0_i32_0 : i32, i32
  }
  func.func @transform_13(%arg0: i32, %arg1: i32) -> (i32, i32) {
    %c0_i32 = arith.constant 0 : i32
    %c0_i32_0 = arith.constant 0 : i32
    %c0_i32_1 = arith.constant 0 : i32
    return %c0_i32, %c0_i32_0 : i32, i32
  }
  func.func @transform_14(%arg0: i32, %arg1: i32) -> (i32, i32) {
    %c0_i32 = arith.constant 0 : i32
    %c0_i32_0 = arith.constant 0 : i32
    %c0_i32_1 = arith.constant 0 : i32
    return %c0_i32, %c0_i32_0 : i32, i32
  }
  func.func @transform_15(%arg0: i32, %arg1: i32) -> (i32, i32) {
    %c0_i32 = arith.constant 0 : i32
    %c0_i32_0 = arith.constant 0 : i32
    %c0_i32_1 = arith.constant 0 : i32
    return %c0_i32, %c0_i32_0 : i32, i32
  }
  func.func @transform_16(%arg0: i32, %arg1: i32) -> (i32, i32) {
    %c0_i32 = arith.constant 0 : i32
    %c0_i32_0 = arith.constant 0 : i32
    %c0_i32_1 = arith.constant 0 : i32
    return %c0_i32, %c0_i32_0 : i32, i32
  }
  func.func @transform_17(%arg0: i32, %arg1: i32) -> (i32, i32, i32) {
    %c0_i32 = arith.constant 0 : i32
    %c0_i32_0 = arith.constant 0 : i32
    return %arg0, %arg1, %c0_i32 : i32, i32, i32
  }
}

</mosaic_0001>

<bundles_post_ra>
// kernel: tpu_custom_call.1
= control target key start
LH: loop header
LB: loop body
LE: loop exit
PB: predicated region body
PF: predicated region fallthrough
CT: control target
= control target key end

     0   :  { %s3812_s0 = inlined_call_operand.vmem [shape: bf16[2,32,4], index: 0, kind: input, shape index: {}]   ;;  %s3813_s1 = inlined_call_operand.hbm [shape: bf16[256,128], index: 1, kind: input, shape index: {}]   ;;  %s3814_s2 = inlined_call_operand.vmem [shape: f32[1,128], index: 2, kind: input, shape index: {}]   ;;  %s3815_s3 = inlined_call_operand.hbm [shape: bf16[256,128], index: 3, kind: input, shape index: {}]   ;;  %s3816_s4 = inlined_call_operand.vmem [shape: f32[1,128], index: 4, kind: input, shape index: {}]   ;;  %s3817_s5 = inlined_call_operand.hbm [shape: bf16[128,128], index: 5, kind: input, shape index: {}]   ;;  %s3818_s6 = inlined_call_operand.vmem [shape: f32[1,128], index: 6, kind: input, shape index: {}]   ;;  %s3819_s7 = inlined_call_operand.hbm [shape: bf16[256,128], index: 7, kind: input, shape index: {}]   ;;  %s3820_s8 = inlined_call_operand.vmem [shape: f32[1,128], index: 8, kind: input, shape index: {}]   ;;  %s3821_s9 = inlined_call_operand.hbm [shape: bf16[256,128], index: 9, kind: input, shape index: {}]   ;;  %s3822_s10 = inlined_call_operand.vmem [shape: f32[1,128], index: 10, kind: input, shape index: {}]   ;;  %s3823_s11 = inlined_call_operand.hbm [shape: bf16[256,128], index: 11, kind: input, shape index: {}]   ;;  %s3824_s12 = inlined_call_operand.vmem [shape: f32[1,128], index: 12, kind: input, shape index: {}]   ;;  %s3825_s13 = inlined_call_operand.hbm [shape: bf16[256,128], index: 13, kind: input, shape index: {}]   ;;  %s3826_s14 = inlined_call_operand.vmem [shape: f32[1,128], index: 14, kind: input, shape index: {}]   ;;  %s3827_s15 = inlined_call_operand.vmem [shape: bf16[128,128], index: 15, kind: input, shape index: {}]   ;;  %s3828_s16 = inlined_call_operand.vmem [shape: f32[1,128], index: 16, kind: input, shape index: {}]   ;;  %s3829_s17 = inlined_call_operand.hbm [shape: f32[2,32,128], index: 17, kind: output, shape index: {}]  }
   0x1   :  { %3848 = sst [smem:[#allocation37_spill]] %s3812_s0 }
   0x2   :  { %3849 = sst [smem:[#allocation38_spill]] %s3813_s1 }
   0x3   :  { %3850 = sst [smem:[#allocation39_spill]] %s3815_s3 }
   0x4   :  { %3851 = sst [smem:[#allocation40_spill]] %s3819_s7 }
   0x5   :  { %3852 = sst [smem:[#allocation41_spill]] %s3822_s10 }
   0x6   :  { %3853 = sst [smem:[#allocation42_spill]] %s3824_s12 }
   0x7   :  { %3854 = sst [smem:[#allocation43_spill]] %s3826_s14 }
   0x8   :  { %3855 = sst [smem:[#allocation44_spill]] %s3827_s15 }
   0x9   :  { %3856 = sst [smem:[#allocation45_spill]] %s3828_s16 }
   0xa   :  { %3857 = sst [smem:[#allocation46_spill]] %s3829_s17 }
   0xb   :  { %22 = vsyncpa [#allocation10], 0 }
   0xc   :  { %23 = vsyncpa [#allocation13], 0 }
   0xd   :  { %24 = vsyncpa [#allocation16], 0 }
   0xe   :  { %25 = vsyncpa [#allocation19], 0 }
   0xf   :  { %26 = vsyncpa [#allocation11], 0 }
  0x10   :  { %28 = vsyncpa [#allocation11 + $0x1], 0  ;;  %s3319_s24 = smov 0   ;;  %s3321_s25 = smov 0  }
  0x11   :  { %s3323_s26 = smov 0   ;;  %s3325_s27 = smov 0  }
  0x12   :  { %s3327_s28 = smov 0   ;;  %s3329_s29 = smov 0  }
  0x13   :  { %s3331_s0 = smov 0   ;;  %s3333_s30 = smov 0  }
  0x14 LB: > { %3858 = sst [smem:[#allocation27_spill]] %s3184_s24  ;;  %s2301_s18 = sadd.s32 4294967295, %s3212_s30   ;;  %s3212_s30 = sphi %s3333_s30, %s34_s30   ;;  %s3208_s0 = sphi %s3331_s0, %s3898_s0   ;;  %s3204_s29 = sphi %s3329_s29, %s3897_s29   ;;  %s3200_s28 = sphi %s3327_s28, %s3896_s28   ;;  %s3196_s27 = sphi %s3325_s27, %s3895_s27   ;;  %s3192_s26 = sphi %s3323_s26, %s3894_s26   ;;  %s3188_s25 = sphi %s3321_s25, %s3900_s25   ;;  %s3184_s24 = sphi %s3319_s24, %s3899_s24  }
  0x15   : > { %3859 = sst [smem:[#allocation28_spill]] %s3192_s26  ;;  %s2302_s19 = sadd.s32 4294967294, %s3212_s30  }
  0x16   : > { %3860 = sst [smem:[#allocation29_spill]] %s3204_s29  ;;  %s43_s1 = sadd.s32 1, %s3204_s29 }
  0x17   : > { %3861 = sst [smem:[#allocation30_spill]] %s3208_s0  ;;  %s46_s20 = sadd.s32 1, %s3208_s0 }
  0x18   : > { %3862 = sst [smem:[#allocation31_spill]] %s3212_s30  ;;  %p44_p0 = scmp.ge.s32.totalorder %s43_s1, 2 }
  0x19   : > { %s419_s21 = sadd.s32 1, %s3192_s26  ;;  %p429_p1 = scmp.ne.s32.totalorder %s3192_s26, %s3188_s25 }
  0x1a   : > { %p430_p2 = scmp.eq.s32.totalorder %s2301_s18, 3  ;;  %s3902_s1 = smov (%p44_p0, %s43_s1), 0 }
  0x1b   : > { %3863 = sst [smem:[#allocation32_spill]] %s3902_s1  ;;  %s3904_s20 = smov (!%p44_p0, %s46_s20), %s3208_s0 }
  0x1c   : > { %s415_s22 = ssub.s32 %s3204_s29, %s3902_s1  ;;  %p3371_p3 = por %p430_p2, %p429_p1 }
  0x1d   : > { %p48_p4 = scmp.ge.s32.totalorder %s3904_s20, 2  ;;  %p435_p5 = scmp.ne.s32.totalorder %s3188_s25, %s3184_s24 }
  0x1e   : > { %s3864_s23 = scalar_select %p3371_p3, 1, 0 }
  0x1f   : > { %p436_p6 = scmp.eq.s32.totalorder %s2302_s19, 3  ;;  %p2303_p7 = scmp.ge.s32.totalorder %s3212_s30, 1 }
  0x20   : > { %3865 = sst [smem:[#allocation33_spill]] %s3864_s23  ;;  %s3906_s20 = smov (%p48_p4, %s3904_s20), 0 }
  0x21   : > { %3866 = sst [smem:[#allocation34_spill]] %s3906_s20  ;;  %p3380_p8 = por %p436_p6, %p435_p5 }
  0x22   : > { %p443_p9 = scmp.lt.s32.totalorder %s3212_s30, 5  ;;  %s414_s16 = ssub.s32 %s3208_s0, %s3906_s20 }
  0x23   : > { %s3867_s17 = scalar_select %p3380_p8, 1, 0 }
  0x24   : > { %s416_s14 = sor.u32 %s415_s22, %s414_s16  ;;  %p3387_p10 = pnand %p2303_p7, %p443_p9 }
  0x25   : > { %3868 = sst [smem:[#allocation35_spill]] %s3867_s17  ;;  %p417_p11 = scmp.eq.s32.totalorder %s416_s14, 0 }
  0x26   : > { %s3869_s1 = scalar_select %p3387_p10, 1, 0 }
  0x27   : > { %p3391_p12 = scmp.eq.s32.totalorder %s2301_s18, 0  ;;  %p2675_p13 = pneg %p3387_p10 }
  0x28   : > { %s3398_s19 = scalar_select %p417_p11, %s3192_s26, %s419_s21  }
  0x29   : > { %s3870_s29 = scalar_select %p3391_p12, 1, 0 }
  0x2a   : > { %3871 = sst [smem:[#allocation36_spill]] %s3398_s19  ;;  %p3402_p0 = pnand %p3391_p12, %p2675_p13 }
  0x2b   : > { %s3214_s16 = smov [#allocation12]   ;;  %s3215_s20 = smov [#allocation15]  }
  0x2c   : > { %s471_s22 = sshll.u32 %s3214_s16, 4  ;;  %s503_s14 = sshll.u32 %s3215_s20, 4  ;;  %s472_s22 = int_to_ptr.vmem [resolvable:$true] %s471_s22  ;;  %s504_s14 = int_to_ptr.vmem [resolvable:$true] %s503_s14 }
  0x2d   : > { %s3873_s3 = sld [smem:[#allocation39_spill]]  ;;  %p3414_p2 = pneg %p3402_p0 }
  0x33   : > { %s2906_s24 = scalar_lea.hbm %s3873_s3, 2048 }
  0x34   : > { %p2907_p1 = scmp.ne.s32.totalorder %s3873_s3, %s2906_s24  ;;  %p2913_p6 = scmp.lt.u32.totalorder %s2906_s24, %s3873_s3 }
  0x36   : > { %p2909_p4 = pnand %p3414_p2, %p2907_p1 }
  0x38   : > { %p2910_p5 = pneg %p2909_p4 }
  0x3a   : > { %p2915_p7 = pnand %p2913_p6, %p2910_p5 }
  0x3c   : > { %2918 = shalt.err (!%p2915_p7)
}
  0x3d   : > { %s2919_s0 = scalar_lea.vmem %s472_s22, 2048  ;;  %p2927_p8 = scmp.lt.s32.totalorder %s472_s22, %s472_s22 }
  0x3e   : > { %p2920_p9 = scmp.ne.s32.totalorder %s472_s22, %s2919_s0  ;;  %p2928_p3 = scmp.lt.s32.totalorder %s2919_s0, %s2919_s0 }
  0x40   : > { %p2922_p11 = pnand %p2920_p9, %p3414_p2  ;;  %p2929_p12 = por %p2928_p3, %p2927_p8 }
  0x42   : > { %p2923_p13 = pneg %p2922_p11 }
  0x44   : > { %p2930_p10 = pnand %p2929_p12, %p2923_p13 }
  0x46   : > { %2933 = shalt.err (!%p2930_p10)
}
  0x47   : > { %s3216_s30 = smov 64   ;;  %s3217_s20 = smov 4  }
  0x48   : > { %2681 = dma.hbm_to_vmem [thread:$0]  (!%p3402_p0), %s3873_s3, 2048, %s472_s22, [#allocation13], %s3216_s30, %s3216_s30, %s3217_s20  }
  0x49   : > { %s3875_s7 = sld [smem:[#allocation40_spill]] }
  0x4f   : > { %s2934_s16 = scalar_lea.hbm %s3875_s7, 2048 }
  0x50   : > { %p2935_p3 = scmp.ne.s32.totalorder %s3875_s7, %s2934_s16  ;;  %p2941_p12 = scmp.lt.u32.totalorder %s2934_s16, %s3875_s7 }
  0x52   : > { %p2937_p8 = pnand %p2935_p3, %p3414_p2 }
  0x54   : > { %p2938_p10 = pneg %p2937_p8 }
  0x56   : > { %p2943_p1 = pnand %p2941_p12, %p2938_p10 }
  0x58   : > { %2946 = shalt.err (!%p2943_p1)
}
  0x59   : > { %s2947_s24 = scalar_lea.vmem %s504_s14, 2048  ;;  %p2955_p7 = scmp.lt.s32.totalorder %s504_s14, %s504_s14 }
  0x5a   : > { %p2948_p4 = scmp.ne.s32.totalorder %s504_s14, %s2947_s24  ;;  %p2956_p9 = scmp.lt.s32.totalorder %s2947_s24, %s2947_s24 }
  0x5c   : > { %p2950_p5 = pnand %p2948_p4, %p3414_p2  ;;  %p2957_p11 = por %p2956_p9, %p2955_p7 }
  0x5e   : > { %p2951_p6 = pneg %p2950_p5 }
  0x60   : > { %p2958_p13 = pnand %p2957_p11, %p2951_p6 }
  0x62   : > { %2961 = shalt.err (!%p2958_p13)
}
  0x63   : > { %2687 = dma.hbm_to_vmem [thread:$0]  (!%p3402_p0), %s3875_s7, 2048, %s504_s14, [#allocation16], %s3216_s30, %s3216_s30, %s3217_s20  }
  0x64   : > { %s3218_s26 = smov [#allocation18]   ;;  %s2962_s18 = scalar_lea.hbm %s3823_s11, 2048 }
  0x65   : > { %s535_s22 = sshll.u32 %s3218_s26, 4  ;;  %p2963_p3 = scmp.ne.s32.totalorder %s3823_s11, %s2962_s18  ;;  %s536_s22 = int_to_ptr.vmem [resolvable:$true] %s535_s22 }
  0x66   : > { %p2969_p12 = scmp.lt.u32.totalorder %s2962_s18, %s3823_s11 }
  0x67   : > { %p2965_p8 = pnand %p2963_p3, %p3414_p2 }
  0x69   : > { %p2966_p10 = pneg %p2965_p8 }
  0x6b   : > { %p2971_p1 = pnand %p2969_p12, %p2966_p10 }
  0x6d   : > { %2974 = shalt.err (!%p2971_p1)
}
  0x6e   : > { %s2975_s14 = scalar_lea.vmem %s536_s22, 2048  ;;  %p2983_p7 = scmp.lt.s32.totalorder %s536_s22, %s536_s22 }
  0x6f   : > { %p2976_p4 = scmp.ne.s32.totalorder %s536_s22, %s2975_s14  ;;  %p2984_p9 = scmp.lt.s32.totalorder %s2975_s14, %s2975_s14 }
  0x71   : > { %p2978_p5 = pnand %p2976_p4, %p3414_p2  ;;  %p2985_p11 = por %p2984_p9, %p2983_p7 }
  0x73   : > { %p2979_p6 = pneg %p2978_p5 }
  0x75   : > { %p2986_p13 = pnand %p2985_p11, %p2979_p6 }
  0x77   : > { %2989 = shalt.err (!%p2986_p13)
}
  0x78   : > { %2693 = dma.hbm_to_vmem [thread:$0]  (!%p3402_p0), %s3823_s11, 2048, %s536_s22, [#allocation19], %s3216_s30, %s3216_s30, %s3217_s20  }
  0x79   : > { %s3219_s15 = smov [#allocation9]   ;;  %s3220_s23 = smov [#allocation14]  }
  0x7a   : > { %s455_s26 = sshll.u32 %s3219_s15, 4  ;;  %s487_s19 = sshll.u32 %s3220_s23, 4  ;;  %s456_s26 = int_to_ptr.vmem [resolvable:$true] %s455_s26  ;;  %s3475_s19 = int_to_ptr.vmem [resolvable:$true] %s487_s19 }
  0x7b   : > { %s3876_s0 = sld [smem:[#allocation38_spill]] }
  0x81   : > { %s3877_s14 = smov %s3876_s0  ;;  %s2990_s24 = scalar_lea.hbm %s3876_s0, 2048 }
  0x82   : > { %p2991_p3 = scmp.ne.s32.totalorder %s3877_s14, %s2990_s24  ;;  %p2997_p12 = scmp.lt.u32.totalorder %s2990_s24, %s3877_s14 }
  0x84   : > { %p2993_p8 = pnand %p2991_p3, %p3414_p2 }
  0x86   : > { %p2994_p10 = pneg %p2993_p8 }
  0x88   : > { %p2999_p1 = pnand %p2997_p12, %p2994_p10 }
  0x8a   : > { %3002 = shalt.err (!%p2999_p1)
}
  0x8b   : > { %s3003_s12 = scalar_lea.vmem %s456_s26, 2048  ;;  %p3011_p7 = scmp.lt.s32.totalorder %s456_s26, %s456_s26 }
  0x8c   : > { %p3004_p4 = scmp.ne.s32.totalorder %s456_s26, %s3003_s12  ;;  %p3012_p9 = scmp.lt.s32.totalorder %s3003_s12, %s3003_s12 }
  0x8e   : > { %p3006_p5 = pnand %p3004_p4, %p3414_p2  ;;  %p3013_p11 = por %p3012_p9, %p3011_p7 }
  0x90   : > { %p3007_p6 = pneg %p3006_p5 }
  0x92   : > { %p3014_p13 = pnand %p3013_p11, %p3007_p6 }
  0x94   : > { %3017 = shalt.err (!%p3014_p13)
}
  0x95   : > { %2678 = dma.hbm_to_vmem [thread:$0]  (!%p3402_p0), %s3877_s14, 2048, %s456_s26, [#allocation10], %s3216_s30, %s3216_s30, %s3217_s20  }
  0x96   : > { %s3018_s18 = scalar_lea.hbm %s3817_s5, 1024 }
  0x97   : > { %p3019_p3 = scmp.ne.s32.totalorder %s3817_s5, %s3018_s18  ;;  %p3025_p12 = scmp.lt.u32.totalorder %s3018_s18, %s3817_s5 }
  0x99   : > { %p3021_p8 = pnand %p3019_p3, %p3414_p2 }
  0x9b   : > { %p3022_p10 = pneg %p3021_p8 }
  0x9d   : > { %p3027_p1 = pnand %p3025_p12, %p3022_p10 }
  0x9f   : > { %3030 = shalt.err (!%p3027_p1)
}
  0xa0   : > { %s3031_s26 = scalar_lea.vmem %s3475_s19, 1024  ;;  %p3039_p7 = scmp.lt.s32.totalorder %s3475_s19, %s3475_s19 }
  0xa1   : > { %p3032_p4 = scmp.ne.s32.totalorder %s3475_s19, %s3031_s26  ;;  %p3040_p9 = scmp.lt.s32.totalorder %s3031_s26, %s3031_s26 }
  0xa3   : > { %p3034_p5 = pnand %p3032_p4, %p3414_p2  ;;  %p3041_p11 = por %p3040_p9, %p3039_p7 }
  0xa5   : > { %p3035_p6 = pneg %p3034_p5 }
  0xa7   : > { %p3042_p13 = pnand %p3041_p11, %p3035_p6 }
  0xa9   : > { %3045 = shalt.err (!%p3042_p13)
}
  0xaa   : > { %2684 = dma.hbm_to_vmem [thread:$0]  (!%p3402_p0), %s3817_s5, 1024, %s3475_s19, [#allocation13], %s3216_s30, %s3216_s30, %s3217_s20  }
  0xab   : > { %s3221_s7 = smov [#allocation17]   ;;  %s3222_s15 = smov [#allocation20]  }
  0xac   : > { %s519_s10 = sshll.u32 %s3221_s7, 4  ;;  %s551_s23 = sshll.u32 %s3222_s15, 4  ;;  %s520_s10 = int_to_ptr.vmem [resolvable:$true] %s519_s10  ;;  %s3524_s23 = int_to_ptr.vmem [resolvable:$true] %s551_s23 }
  0xad   : > { %s3046_s0 = scalar_lea.hbm %s3821_s9, 2048 }
  0xae   : > { %p3047_p3 = scmp.ne.s32.totalorder %s3821_s9, %s3046_s0  ;;  %p3053_p12 = scmp.lt.u32.totalorder %s3046_s0, %s3821_s9 }
  0xb0   : > { %p3049_p8 = pnand %p3047_p3, %p3414_p2 }
  0xb2   : > { %p3050_p10 = pneg %p3049_p8 }
  0xb4   : > { %p3055_p1 = pnand %p3053_p12, %p3050_p10 }
  0xb6   : > { %3058 = shalt.err (!%p3055_p1)
}
  0xb7   : > { %s3059_s22 = scalar_lea.vmem %s520_s10, 2048  ;;  %p3067_p7 = scmp.lt.s32.totalorder %s520_s10, %s520_s10 }
  0xb8   : > { %p3060_p4 = scmp.ne.s32.totalorder %s520_s10, %s3059_s22  ;;  %p3068_p9 = scmp.lt.s32.totalorder %s3059_s22, %s3059_s22 }
  0xba   : > { %p3062_p5 = pnand %p3060_p4, %p3414_p2  ;;  %p3069_p11 = por %p3068_p9, %p3067_p7 }
  0xbc   : > { %p3063_p6 = pneg %p3062_p5 }
  0xbe   : > { %p3070_p13 = pnand %p3069_p11, %p3063_p6 }
  0xc0   : > { %3073 = shalt.err (!%p3070_p13)
}
  0xc1   : > { %2690 = dma.hbm_to_vmem [thread:$0]  (!%p3402_p0), %s3821_s9, 2048, %s520_s10, [#allocation16], %s3216_s30, %s3216_s30, %s3217_s20  }
  0xc2   : > { %s3074_s16 = scalar_lea.hbm %s3825_s13, 2048 }
  0xc3   : > { %p3075_p3 = scmp.ne.s32.totalorder %s3825_s13, %s3074_s16  ;;  %p3081_p12 = scmp.lt.u32.totalorder %s3074_s16, %s3825_s13 }
  0xc5   : > { %p3077_p8 = pnand %p3075_p3, %p3414_p2 }
  0xc7   : > { %p3078_p10 = pneg %p3077_p8 }
  0xc9   : > { %p3083_p1 = pnand %p3081_p12, %p3078_p10 }
  0xcb   : > { %3086 = shalt.err (!%p3083_p1)
}
  0xcc   : > { %s3087_s10 = scalar_lea.vmem %s3524_s23, 2048  ;;  %p3095_p7 = scmp.lt.s32.totalorder %s3524_s23, %s3524_s23 }
  0xcd   : > { %p3088_p4 = scmp.ne.s32.totalorder %s3524_s23, %s3087_s10  ;;  %p3096_p9 = scmp.lt.s32.totalorder %s3087_s10, %s3087_s10 }
  0xcf   : > { %p3090_p5 = pnand %p3088_p4, %p3414_p2  ;;  %p3097_p11 = por %p3096_p9, %p3095_p7 }
  0xd1   : > { %p3091_p6 = pneg %p3090_p5 }
  0xd3   : > { %p3098_p13 = pnand %p3097_p11, %p3091_p6 }
  0xd5   : > { %3101 = shalt.err (!%p3098_p13)
}
  0xd6   : > { %2696 = dma.hbm_to_vmem [thread:$0]  (!%p3402_p0), %s3825_s13, 2048, %s3524_s23, [#allocation19], %s3216_s30, %s3216_s30, %s3217_s20  }
  0xd7   : > { %p3878_p3 = scmp.ne.s32.totalorder %s3869_s1, 0 }
  0xd8   : > { %p3879_p2 = scmp.ne.s32.totalorder (!%p3878_p3), %s3870_s29, 0 }
  0xd9   : > { %589 = sbr.rel (%p3878_p3) target bundleno = 1662 (0x67e), region = 88 }
  0xe0   : > { %3163 = dma.done.wait (%p3879_p2), [#allocation10], 2048  }
  0xe1   : > { %3165 = vsyncadd (%p3879_p2), [#allocation10], 4294965248 }
  0xe2   : > { %3167 = dma.done.wait (%p3879_p2), [#allocation13], 3072  }
  0xe3   : > { %3169 = vsyncadd (%p3879_p2), [#allocation13], 4294964224 }
  0xe4   : > { %3171 = dma.done.wait (%p3879_p2), [#allocation16], 4096  }
  0xe5   : > { %3173 = vsyncadd (%p3879_p2), [#allocation16], 4294963200 }
  0xe6   : > { %3175 = dma.done.wait (%p3879_p2), [#allocation19], 4096  }
  0xe7   : > { %3177 = vsyncadd (%p3879_p2), [#allocation19], 4294963200  ;;  %s666_s17 = sand.u32 1, %s3188_s25   ;;  %s3593_s1 = sshll.u32 %s3196_s27, 1 }
  0xe8   : > { %s2320_s21 = sshll.u32 %s666_s17, 4  ;;  %p670_p0 = scmp.lt.s32.totalorder %s3200_s28, 1 }
  0xe9   : > { %p672_p8 = scmp.lt.s32.totalorder %s3593_s1, 3  ;;  %s3880_s18 = sld [smem:[#allocation37_spill]] }
  0xea   : > { %s671_s30 = scalar_select %p670_p0, %s3200_s28, 1 }
  0xeb   : > { %s673_s20 = scalar_select %p672_p8, %s3593_s1, 3 }
  0xec   : > { %s2322_s23 = sshll.u32 %s671_s30, 2  ;;  %s3606_s0 = scalar_lea.vmem [#allocation21], %s2320_s21 }
  0xed   : > { %s675_s12 = sadd.s32 %s2322_s23, %s673_s20  ;;  %p2324_p10 = scmp.ne.s32.totalorder %s3196_s27, 0 }
  0xee   : > { %s2323_s29 = sshll.u32 %s675_s12, 2  ;;  %v3223_v0 = vmov (!%p2324_p10), 0.0  }
  0xef   : > { %s3604_s16 = scalar_lea.vmem %s3880_s18, %s2323_s29  ;;  %684 = sbr.rel (%p2324_p10) target bundleno = 246 (0xf6), region = 120  ;;  %685 = vst [vmem:[#allocation2] sm:$0xff] (!%p2324_p10), %v3223_v0  ;;  %686 = vst [vmem:[#allocation2 + $0x8] sm:$0xff] (!%p2324_p10), %v3223_v0 }
  0xf0   : > { %687 = vst [vmem:[#allocation3] sm:$0xff] (!%p2324_p10), %v3223_v0  ;;  %688 = vst [vmem:[#allocation3 + $0x8] sm:$0xff] (!%p2324_p10), %v3223_v0 }
  0xf1   : > { %689 = vst [vmem:[#allocation4] sm:$0xff] (!%p2324_p10), %v3223_v0  ;;  %690 = vst [vmem:[#allocation4 + $0x8] sm:$0xff] (!%p2324_p10), %v3223_v0 }
  0xf2   : > { %691 = vst [vmem:[#allocation5] sm:$0xff] (!%p2324_p10), %v3223_v0  ;;  %692 = vst [vmem:[#allocation5 + $0x8] sm:$0xff] (!%p2324_p10), %v3223_v0 }
  0xf3   : > { %693 = vst [vmem:[#allocation6] sm:$0xff] (!%p2324_p10), %v3223_v0  ;;  %694 = vst [vmem:[#allocation6 + $0x8] sm:$0xff] (!%p2324_p10), %v3223_v0 }
  0xf4   : > { %695 = vst [vmem:[#allocation7] sm:$0xff] (!%p2324_p10), %v3223_v0  ;;  %696 = vst [vmem:[#allocation7 + $0x8] sm:$0xff] (!%p2324_p10), %v3223_v0 }
  0xf5   : > { %697 = vst [vmem:[#allocation8] sm:$0xff] (!%p2324_p10), %v3223_v0  ;;  %698 = vst [vmem:[#allocation8 + $0x8] sm:$0xff] (!%p2324_p10), %v3223_v0 }
  0xf6 PF: > { %v2794_v1 = vld [vmem:[#allocation9 + $0x40] sm:$0xff]   ;;  %v2796_v3 = vld [vmem:[#allocation9 + $0x48] sm:$0xff]   ;;  %v2798_v5 = vld [vmem:[#allocation9 + $0x50] sm:$0xff]   ;;  %vm703_vm0 = vcmask 31744   ;;  %v708_v13 = vlaneseq  ;;  %v3224_v45 = vmov 0.0   ;;  %vm3225_vm3 = vmmov 0  }
  0xf7   : > { %v2795_v2 = vld [vmem:[#allocation9] sm:$0xff]   ;;  %2455 = vmatprep.subr.bf16.mxu0 %v2794_v1  ;;  %v2797_v4 = vld [vmem:[#allocation9 + $0x8] sm:$0xff]   ;;  %v2799_v6 = vld [vmem:[#allocation9 + $0x10] sm:$0xff]   ;;  %s3881_s23 = sld [smem:[#allocation41_spill]]  ;;  %s3882_s7 = sld [smem:[#allocation44_spill]] }
  0xf8   : > { %2456 = vmatpush3.bf16.msra.mxu0 %v2795_v2  ;;  %v2800_v7 = vld [vmem:[#allocation9 + $0x58] sm:$0xff]   ;;  %v2802_v9 = vld [vmem:[#allocation9 + $0x60] sm:$0xff]   ;;  %v2804_v11 = vld [vmem:[#allocation9 + $0x68] sm:$0xff]   ;;  %v3610_v22 = vshrl.u32 %v708_v13, 7  ;;  %s3883_s15 = sld [smem:[#allocation42_spill]]  ;;  %s3884_s27 = sld [smem:[#allocation43_spill]] }
  0xf9   : > { %2457 = vmatprep.subr.bf16.mxu0 %v2796_v3  ;;  %v2801_v8 = vld [vmem:[#allocation9 + $0x18] sm:$0xff]   ;;  %v2803_v10 = vld [vmem:[#allocation9 + $0x20] sm:$0xff]   ;;  %v2452_v12 = vld [vmem:[%s3604_s16] sm:$0xff]   ;;  %s2447_s24 = sshll.u32 %s3200_s28, 2  ;;  %s3885_s10 = sld [smem:[#allocation45_spill]] }
  0xfa   : > { %v2805_v14 = vld [vmem:[#allocation9 + $0x28] sm:$0xff]   ;;  %v2453_v15 = vunpack.c.l.bf16 %v2452_v12  ;;  %v2454_v16 = vunpack.c.h.bf16 %v2452_v12  ;;  %v2806_v17 = vld [vmem:[#allocation9 + $0x70] sm:$0xff]   ;;  %v711_v18 = vld [vmem:[#allocation3] sm:$0xff]  ;;  %vm717_vm1 = vcmp.lt.s32.totalorder %v3610_v22, 1  ;;  %vm724_vm2 = vcmp.ge.s32.totalorder %v3610_v22, 1  ;;  %s2147_s19 = sadd.s32 %s2447_s24, %s3593_s1  ;;  %s3886_s22 = sld [smem:[#allocation33_spill]] }
  0xfb   : > { %v2810_v19 = vld [vmem:[#allocation12 + $0x40] sm:$0xff]   ;;  %v712_v21 = vld [vmem:[#allocation3 + $0x8] sm:$0xff]  ;;  %v2807_v23 = vld [vmem:[#allocation9 + $0x30] sm:$0xff]   ;;  %v720_v27 = vrot.slane %v711_v18, 7  ;;  %vm1228_vm4 = vcmp.lt.s32.totalorder %v3610_v22, 2  ;;  %vm1235_vm5 = vcmp.ge.s32.totalorder %v3610_v22, 2 }
  0xfc   : > { %2458 = vmatpush3.bf16.msra.mxu0 %v2797_v4  ;;  %704 = vst.msk [vmem:[#allocation2] sm:$0xff] %vm703_vm0, %v2453_v15  ;;  %705 = vst.msk [vmem:[#allocation2 + $0x8] sm:$0xff] %vm703_vm0, %v2454_v16  ;;  %v2811_v20 = vld [vmem:[#allocation12] sm:$0xff]   ;;  %2477 = vmatprep.subr.bf16.mxu1 %v2810_v19  ;;  %v2813_v24 = vld [vmem:[#allocation12 + $0x48] sm:$0xff]   ;;  %v721_v28 = vrot.slane %v712_v21, 7  ;;  %vm1627_vm6 = vcmp.lt.s32.totalorder %v3610_v22, 4 }
  0xfd   : > { %2459 = vmatprep.subr.bf16.mxu0 %v2798_v5  ;;  %2478 = vmatpush3.bf16.msra.mxu1 %v2811_v20  ;;  %v2808_v25 = vld [vmem:[#allocation9 + $0x78] sm:$0xff]   ;;  %v2814_v26 = vld [vmem:[#allocation12 + $0x8] sm:$0xff]   ;;  %v2816_v29 = vld [vmem:[#allocation12 + $0x50] sm:$0xff]   ;;  %vm1634_vm7 = vcmp.ge.s32.totalorder %v3610_v22, 4  ;;  %s2448_s21 = sshll.u32 %s2147_s19, 7  ;;  %s2150_s28 = sshll.u32 %s3606_s0, 4  ;;  %s3754_s28 = int_to_ptr.vmem [resolvable:$true] %s2150_s28 }
  0xfe   : > { %2479 = vmatprep.subr.bf16.mxu1 %v2813_v24  ;;  %v2817_v30 = vld [vmem:[#allocation12 + $0x10] sm:$0xff]   ;;  %v2809_v31 = vld [vmem:[#allocation9 + $0x38] sm:$0xff]   ;;  %v723_v37 = vsel %vm717_vm1, %v721_v28, %v720_v27  ;;  %v2812_v43 = vld [vmem:[#allocation14] sm:$0xff]   ;;  %s3760_s1 = scalar_lea.sflag [#allocation11], %s666_s17  ;;  %s3102_s29 = scalar_lea.vmem %s3754_s28, 256 }
  0xff   : > { %v2819_v38 = vld [vmem:[#allocation12 + $0x58] sm:$0xff]   ;;  %v2815_v46 = vld [vmem:[#allocation14 + $0x8] sm:$0xff]   ;;  %v2818_v47 = vld [vmem:[#allocation14 + $0x10] sm:$0xff]   ;;  %p3103_p12 = scmp.ne.s32.totalorder %s3754_s28, %s3102_s29 }
 0x100   : > { %2460 = vmatpush3.bf16.msra.mxu0 %v2799_v6  ;;  %v2820_v41 = vld [vmem:[#allocation12 + $0x18] sm:$0xff]   ;;  %v2822_v49 = vld [vmem:[#allocation12 + $0x60] sm:$0xff]   ;;  %v2825_v52 = vld [vmem:[#allocation12 + $0x68] sm:$0xff]   ;;  %p3888_p1 = scmp.ne.s32.totalorder %s3886_s22, 0 }
 0x101   : > { %2461 = vmatprep.subr.bf16.mxu0 %v2800_v7  ;;  %2480 = vmatpush3.bf16.msra.mxu1 %v2814_v26  ;;  %v2821_v48 = vld [vmem:[#allocation14 + $0x18] sm:$0xff]   ;;  %v2823_v50 = vld [vmem:[#allocation12 + $0x20] sm:$0xff]   ;;  %v2826_v53 = vld [vmem:[#allocation12 + $0x28] sm:$0xff]  }
 0x102   : > { %2481 = vmatprep.subr.bf16.mxu1 %v2816_v29  ;;  %v2824_v51 = vld [vmem:[#allocation14 + $0x20] sm:$0xff]   ;;  %v2827_v54 = vld [vmem:[#allocation14 + $0x28] sm:$0xff]   ;;  %v2828_v55 = vld [vmem:[#allocation12 + $0x70] sm:$0xff]   ;;  %p3104_p4 = pnand %p3103_p12, %p3888_p1 }
 0x103   : > { %v706_v32 = vld [vmem:[#allocation2] sm:$0xff]  ;;  %v707_v33 = vld [vmem:[#allocation2 + $0x8] sm:$0xff]  ;;  %v2834_v61 = vld [vmem:[#allocation15 + $0x40] sm:$0xff]  }
 0x104   : > { %2462 = vmatpush3.bf16.msra.mxu0 %v2801_v8  ;;  %v715_v34 = vrot.slane %v706_v32, 7  ;;  %v716_v35 = vrot.slane %v707_v33, 7  ;;  %v733_v36 = vpack.c.bf16 %v707_v33, %v706_v32  ;;  %1102 = vst [vmem:[#allocation3] sm:$0xff] %v706_v32  ;;  %1103 = vst [vmem:[#allocation3 + $0x8] sm:$0xff] %v707_v33  ;;  %v2829_v56 = vld [vmem:[#allocation12 + $0x30] sm:$0xff]   ;;  %v2831_v58 = vld [vmem:[#allocation12 + $0x78] sm:$0xff]   ;;  %p3105_p5 = pneg %p3104_p4 }
 0x105   : > { %2463 = vmatprep.subr.bf16.mxu0 %v2802_v9  ;;  %2482 = vmatpush3.bf16.msra.mxu1 %v2817_v30  ;;  %v2830_v57 = vld [vmem:[#allocation14 + $0x30] sm:$0xff]   ;;  %v2832_v59 = vld [vmem:[#allocation12 + $0x38] sm:$0xff]   ;;  %v2835_v20 = vld [vmem:[#allocation15] sm:$0xff]  }
 0x106   : > { %901 = vmatprep.mubr.bf16.mxu0 %v733_v36  ;;  %v718_v39 = vsel %vm717_vm1, %v715_v34, %v716_v35  ;;  %v719_v40 = vsel %vm717_vm1, %v716_v35, %v715_v34  ;;  %2483 = vmatprep.subr.bf16.mxu1 %v2819_v38  ;;  %v2833_v60 = vld [vmem:[#allocation14 + $0x38] sm:$0xff]   ;;  %v2325_v63 = vld [vmem:[%s3814_s2] ss:$0 sm:$0xff]  ;;  %v2837_v24 = vld [vmem:[#allocation15 + $0x8] sm:$0xff]  }
 0x107   : > { %v730_v42 = vsel %vm724_vm2, %v719_v40, %v723_v37  ;;  %v714_v3 = vld [vmem:[#allocation4 + $0x8] sm:$0xff]  ;;  %v713_v7 = vld [vmem:[#allocation4] sm:$0xff]  ;;  %v2842_v30 = vld [vmem:[#allocation15 + $0x60] sm:$0xff]  }
 0x108   : > { %2464 = vmatpush3.bf16.msra.mxu0 %v2803_v10  ;;  %v732_v44 = vpack.c.bf16 %v718_v39, %v730_v42  ;;  %v916_v9 = vrot.slane %v713_v7, 7  ;;  %v2839_v26 = vld [vmem:[#allocation15 + $0x10] sm:$0xff]   ;;  %v2840_v27 = vld [vmem:[#allocation15 + $0x58] sm:$0xff]   ;;  %v2843_v32 = vld [vmem:[#allocation15 + $0x20] sm:$0xff]  }
 0x109   : > { %2465 = vmatprep.subr.bf16.mxu0 %v2804_v11  ;;  %2484 = vmatpush3.bf16.msra.mxu1 %v2820_v41  ;;  %v917_v11 = vrot.slane %v714_v3, 7  ;;  %v2841_v28 = vld [vmem:[#allocation15 + $0x18] sm:$0xff]   ;;  %v2844_v35 = vld [vmem:[#allocation15 + $0x68] sm:$0xff]   ;;  %v2846_v37 = vld [vmem:[#allocation15 + $0x70] sm:$0xff]  }
 0x10a   : > { %2485 = vmatprep.subr.bf16.mxu1 %v2822_v49  ;;  %v2847_v38 = vld [vmem:[#allocation15 + $0x30] sm:$0xff]   ;;  %v2848_v39 = vld [vmem:[#allocation15 + $0x78] sm:$0xff]   ;;  %v2850_v41 = vld [vmem:[#allocation17 + $0x40] sm:$0xff]  }
 0x10b   : > { %v919_v16 = vsel %vm717_vm1, %v917_v11, %v916_v9  ;;  %v2849_v40 = vld [vmem:[#allocation15 + $0x38] sm:$0xff]   ;;  %v2851_v42 = vld [vmem:[#allocation17] sm:$0xff]   ;;  %v2436_v22 = vld [vmem:[%s3885_s10] ss:$0 sm:$0xff] }
 0x10c   : > { %2466 = vmatpush3.bf16.msra.mxu0 %v2805_v14  ;;  %v2857_v49 = vld [vmem:[#allocation17 + $0x18] sm:$0xff]  }
 0x10d   : > { %2467 = vmatprep.subr.bf16.mxu0 %v2806_v17  ;;  %2486 = vmatpush3.bf16.msra.mxu1 %v2823_v50 }
 0x10e   : > { %2487 = vmatprep.subr.bf16.mxu1 %v2825_v52 }
 0x110   : > { %2468 = vmatpush3.bf16.msra.mxu0 %v2807_v23  ;;  %v2836_v23 = vld [vmem:[#allocation15 + $0x48] sm:$0xff]  }
 0x111   : > { %2469 = vmatprep.subr.bf16.mxu0 %v2808_v25  ;;  %2488 = vmatpush3.bf16.msra.mxu1 %v2826_v53  ;;  %v2838_v25 = vld [vmem:[#allocation15 + $0x50] sm:$0xff]  }
 0x112   : > { %2489 = vmatprep.subr.bf16.mxu1 %v2828_v55  ;;  %v2359_v53 = vld [vmem:[%s3818_s6] ss:$0 sm:$0xff] }
 0x114   : > { %2470 = vmatpush3.bf16.msra.mxu0 %v2809_v31 }
 0x115   : > { %2605 = vmatprep.subr.bf16.mxu0 %v3224_v45  ;;  %2490 = vmatpush3.bf16.msra.mxu1 %v2829_v56 }
 0x116   : > { %2491 = vmatprep.subr.bf16.mxu1 %v2831_v58 }
 0x117   : > { %902 = vmatmul.mubr.bf16.vlgmr.msra.gmra.mrb[0].mxu0 %v732_v44  ;;  %v2853_v44 = vld [vmem:[#allocation17 + $0x8] sm:$0xff]  }
 0x118   : > { %2606 = vmatpush3.bf16.msra.mxu0 %v2812_v43  ;;  %2621 = vmatprep.mubr.msk.bf16.mxu0 %vm3225_vm3, %v3224_v45  ;;  %v2852_v43 = vld [vmem:[#allocation17 + $0x48] sm:$0xff]  }
 0x119   : > { %2607 = vmatprep.subr.bf16.mxu0 %v3224_v45  ;;  %2492 = vmatpush3.bf16.msra.mxu1 %v2832_v59 }
 0x11a   : > { %2508 = vmatprep.subr.bf16.mxu1 %v2834_v61 }
 0x11c   : > { %2608 = vmatpush3.bf16.msra.mxu0 %v2815_v46  ;;  %v2854_v46 = vld [vmem:[#allocation17 + $0x50] sm:$0xff]  }
 0x11d   : > { %2609 = vmatprep.subr.bf16.mxu0 %v3224_v45 }
 0x120   : > { %2610 = vmatpush3.bf16.msra.mxu0 %v2818_v47  ;;  %v2855_v47 = vld [vmem:[#allocation17 + $0x10] sm:$0xff]  }
 0x121   : > { %2611 = vmatprep.subr.bf16.mxu0 %v3224_v45 }
 0x124   : > { %2612 = vmatpush3.bf16.msra.mxu0 %v2821_v48  ;;  %v2856_v48 = vld [vmem:[#allocation17 + $0x58] sm:$0xff]  }
 0x125   : > { %2613 = vmatprep.subr.bf16.mxu0 %v3224_v45 }
 0x128   : > { %2614 = vmatpush3.bf16.msra.mxu0 %v2824_v51  ;;  %v2342_v51 = vld [vmem:[%s3816_s4] ss:$0 sm:$0xff] }
 0x129   : > { %2615 = vmatprep.subr.bf16.mxu0 %v3224_v45 }
 0x12c   : > { %2616 = vmatpush3.bf16.msra.mxu0 %v2827_v54 }
 0x12d   : > { %2617 = vmatprep.subr.bf16.mxu0 %v3224_v45 }
 0x130   : > { %2618 = vmatpush3.bf16.msra.mxu0 %v2830_v57 }
 0x131   : > { %2619 = vmatprep.subr.bf16.mxu0 %v3224_v45 }
 0x134   : > { %2620 = vmatpush3.bf16.msra.mxu0 %v2833_v60 }
 0x135   : > { %2530 = vmatprep.subr.bf16.mxu0 %v2850_v41  ;;  %v1224_v41 = vld [vmem:[#allocation6] sm:$0xff] }
 0x137   : > { %2622 = vmatmul.mubr.bf16.vlgmr.msra.gmra.mrb[4].mxu0 %v733_v36  ;;  %v2845_v36 = vld [vmem:[#allocation15 + $0x28] sm:$0xff]  }
 0x138   : > { %2531 = vmatpush3.bf16.msra.mxu0 %v2851_v42 }
 0x139   : > { %2532 = vmatprep.subr.bf16.mxu0 %v2852_v43  ;;  %v1427_v43 = vrot.slane %v1224_v41, 6  ;;  %v2886_v41 = vld [vmem:[%s3882_s7 + $0x20] sm:$0xff]  }
 0x13c   : > { %2533 = vmatpush3.bf16.msra.mxu0 %v2853_v44 }
 0x13d   : > { %2534 = vmatprep.subr.bf16.mxu0 %v2854_v46 }
 0x140   : > { %2535 = vmatpush3.bf16.msra.mxu0 %v2855_v47 }
 0x141   : > { %2536 = vmatprep.subr.bf16.mxu0 %v2856_v48 }
 0x144   : > { %2537 = vmatpush3.bf16.msra.mxu0 %v2857_v49 }
 0x1ea   : > { %v2471_v62 = vpop.f32.mrb[0].mxu0 }
 0x1eb   : > { %v2472_v0 = vpop.f32.mrb[1].mxu0 }
 0x1ec   : > { %v2473_v1 = vadd.f32 %v2472_v0, %v2471_v62  ;;  %v2474_v2 = vpop.f32.mrb[2].mxu0  ;;  %v1223_v62 = vld [vmem:[#allocation5 + $0x8] sm:$0xff]  ;;  %v1222_v0 = vld [vmem:[#allocation5] sm:$0xff] }
 0x1ed   : > { %v2475_v4 = vpop.f32.mrb[3].mxu0  ;;  %v1231_v3 = vrot.slane %v1222_v0, 6  ;;  %v2881_v0 = vld [vmem:[#allocation18 + $0x38] sm:$0xff]  }
 0x1ee   : > { %v904_v5 = vadd.f32 %v2473_v1, %v2325_v63  ;;  %v2476_v6 = vadd.f32 %v2475_v4, %v2474_v2  ;;  %v1232_v4 = vrot.slane %v1223_v62, 6  ;;  %v2879_v62 = vld [vmem:[#allocation18 + $0x30] sm:$0xff]  }
 0x1f0   : > { %v910_v8 = vmax.f32 %v904_v5, 0.0  ;;  %v907_v10 = vadd.f32 %v2476_v6, %v2325_v63 }
 0x1f2   : > { %1104 = vst [vmem:[#allocation4] sm:$0xff] %v910_v8  ;;  %v911_v12 = vmax.f32 %v907_v10, 0.0  ;;  %v912_v13 = vrot.slane %v910_v8, 7 }
 0x1f4   : > { %v913_v14 = vrot.slane %v911_v12, 7  ;;  %1105 = vst [vmem:[#allocation4 + $0x8] sm:$0xff] %v911_v12  ;;  %v923_v15 = vpack.c.bf16 %v911_v12, %v910_v8  ;;  %v1234_v8 = vsel %vm1228_vm4, %v1232_v4, %v1231_v3  ;;  %v2892_v3 = vld [vmem:[#allocation20 + $0x48] sm:$0xff]  }
 0x1f5   : > { %v2893_v4 = vld [vmem:[#allocation20 + $0x8] sm:$0xff]  }
 0x1f6   : > { %1091 = vmatprep.mubr.bf16.mxu1 %v923_v15  ;;  %v914_v17 = vsel %vm717_vm1, %v912_v13, %v913_v14  ;;  %v915_v18 = vsel %vm717_vm1, %v913_v14, %v912_v13 }
 0x1f7   : > { %v920_v19 = vsel %vm724_vm2, %v915_v18, %v919_v16  ;;  %v2858_v16 = vld [vmem:[#allocation17 + $0x60] sm:$0xff]   ;;  %v2860_v18 = vld [vmem:[#allocation17 + $0x68] sm:$0xff]  }
 0x1f8   : > { %v922_v21 = vpack.c.bf16 %v914_v17, %v920_v19  ;;  %v2859_v17 = vld [vmem:[#allocation17 + $0x20] sm:$0xff]   ;;  %2538 = vmatprep.subr.bf16.mxu0 %v2858_v16  ;;  %v2861_v19 = vld [vmem:[#allocation17 + $0x28] sm:$0xff]  }
 0x1f9   : > { %2539 = vmatpush3.bf16.msra.mxu0 %v2859_v17 }
 0x1fa   : > { %1092 = vmatmul.mubr.bf16.vlgmr.msra.gmra.mrb[0].mxu1 %v922_v21  ;;  %2540 = vmatprep.subr.bf16.mxu0 %v2860_v18  ;;  %v2863_v21 = vld [vmem:[#allocation17 + $0x30] sm:$0xff]  }
 0x1fb   : > { %2509 = vmatpush3.bf16.msra.mxu1 %v2835_v20  ;;  %v2862_v20 = vld [vmem:[#allocation17 + $0x70] sm:$0xff]  }
 0x1fc   : > { %2510 = vmatprep.subr.bf16.mxu1 %v2836_v23  ;;  %v2864_v23 = vld [vmem:[#allocation17 + $0x78] sm:$0xff]  }
 0x1fd   : > { %2541 = vmatpush3.bf16.msra.mxu0 %v2861_v19 }
 0x1fe   : > { %2542 = vmatprep.subr.bf16.mxu0 %v2862_v20 }
 0x1ff   : > { %2511 = vmatpush3.bf16.msra.mxu1 %v2837_v24  ;;  %v2865_v24 = vld [vmem:[#allocation17 + $0x38] sm:$0xff]  }
 0x200   : > { %2512 = vmatprep.subr.bf16.mxu1 %v2838_v25  ;;  %v2866_v25 = vld [vmem:[#allocation18 + $0x40] sm:$0xff]  }
 0x201   : > { %2543 = vmatpush3.bf16.msra.mxu0 %v2863_v21  ;;  %v1622_v21 = vld [vmem:[#allocation7 + $0x8] sm:$0xff] }
 0x202   : > { %2544 = vmatprep.subr.bf16.mxu0 %v2864_v23 }
 0x203   : > { %2513 = vmatpush3.bf16.msra.mxu1 %v2839_v26  ;;  %v2867_v26 = vld [vmem:[#allocation18] sm:$0xff]  }
 0x204   : > { %2514 = vmatprep.subr.bf16.mxu1 %v2840_v27  ;;  %v2868_v27 = vld [vmem:[#allocation18 + $0x48] sm:$0xff]  }
 0x205   : > { %2545 = vmatpush3.bf16.msra.mxu0 %v2865_v24  ;;  %v1621_v24 = vld [vmem:[#allocation7] sm:$0xff] }
 0x207   : > { %2515 = vmatpush3.bf16.msra.mxu1 %v2841_v28  ;;  %v2869_v28 = vld [vmem:[#allocation18 + $0x8] sm:$0xff]  }
 0x208   : > { %2516 = vmatprep.subr.bf16.mxu1 %v2842_v30  ;;  %v2871_v30 = vld [vmem:[#allocation18 + $0x10] sm:$0xff]  }
 0x20a   : > { %v1211_v29 = vpop.f32.mrb[4].mxu0 }
 0x20b   : > { %v2623_v31 = vpop.f32.mrb[5].mxu0  ;;  %2517 = vmatpush3.bf16.msra.mxu1 %v2843_v32  ;;  %v1212_v58 = vadd.f32 %v2359_v53, %v1211_v29  ;;  %v2870_v29 = vld [vmem:[#allocation18 + $0x50] sm:$0xff]  }
 0x20c   : > { %v1214_v33 = vpop.f32.mrb[6].mxu0  ;;  %2518 = vmatprep.subr.bf16.mxu1 %v2844_v35  ;;  %v2872_v31 = vld [vmem:[#allocation18 + $0x58] sm:$0xff]  }
 0x20d   : > { %v2624_v34 = vpop.f32.mrb[7].mxu0  ;;  %v1215_v2 = vadd.f32 %v2359_v53, %v1214_v33  ;;  %v2368_v33 = vld [vmem:[%s3820_s8] ss:$0 sm:$0xff] }
 0x20f   : > { %2519 = vmatpush3.bf16.msra.mxu1 %v2845_v36 }
 0x210   : > { %2520 = vmatprep.subr.bf16.mxu1 %v2846_v37  ;;  %v1225_v37 = vld [vmem:[#allocation6 + $0x8] sm:$0xff] }
 0x211   : > { %v1428_v46 = vrot.slane %v1225_v37, 6 }
 0x213   : > { %2521 = vmatpush3.bf16.msra.mxu1 %v2847_v38 }
 0x214   : > { %2522 = vmatprep.subr.bf16.mxu1 %v2848_v39 }
 0x217   : > { %2523 = vmatpush3.bf16.msra.mxu1 %v2849_v40 }
 0x218   : > { %2552 = vmatprep.subr.bf16.mxu1 %v2866_v25 }
 0x2cd   : > { %v2493_v50 = vpop.f32.mrb[0].mxu1 }
 0x2ce   : > { %v2494_v52 = vpop.f32.mrb[1].mxu1 }
 0x2cf   : > { %v2495_v54 = vadd.f32 %v2494_v52, %v2493_v50  ;;  %v2496_v55 = vpop.f32.mrb[2].mxu1 }
 0x2d0   : > { %v2497_v56 = vpop.f32.mrb[3].mxu1 }
 0x2d1   : > { %v1094_v57 = vadd.f32 %v2495_v54, %v2342_v51  ;;  %v2498_v59 = vadd.f32 %v2497_v56, %v2496_v55  ;;  %v2873_v56 = vld [vmem:[#allocation18 + $0x18] sm:$0xff]  }
 0x2d3   : > { %v1100_v60 = vmax.f32 %v1094_v57, 0.0  ;;  %v1097_v61 = vadd.f32 %v2498_v59, %v2342_v51  ;;  %v1430_v51 = vsel %vm1228_vm4, %v1428_v46, %v1427_v43  ;;  %v2874_v57 = vld [vmem:[#allocation18 + $0x60] sm:$0xff]   ;;  %v2876_v59 = vld [vmem:[#allocation18 + $0x68] sm:$0xff]  }
 0x2d4   : > { %v2888_v43 = vld [vmem:[%s3882_s7 + $0x30] sm:$0xff]  }
 0x2d5   : > { %v1218_v63 = vadd.f32 %v1212_v58, %v1100_v60  ;;  %v1101_v1 = vmax.f32 %v1097_v61, 0.0  ;;  %v2875_v58 = vld [vmem:[#allocation18 + $0x20] sm:$0xff]   ;;  %v2877_v60 = vld [vmem:[#allocation18 + $0x28] sm:$0xff]   ;;  %v2878_v61 = vld [vmem:[#allocation18 + $0x70] sm:$0xff]  }
 0x2d6   : > { %v2898_v46 = vld [vmem:[#allocation20 + $0x60] sm:$0xff]  }
 0x2d7   : > { %v3649_v5 = vmax.f32 %v1218_v63, 0.0  ;;  %v1219_v6 = vadd.f32 %v1215_v2, %v1101_v1  ;;  %v2880_v63 = vld [vmem:[#allocation18 + $0x78] sm:$0xff]   ;;  %v2890_v1 = vld [vmem:[#allocation20 + $0x40] sm:$0xff]  }
 0x2d8   : > { %v2891_v2 = vld [vmem:[#allocation20] sm:$0xff]   ;;  %2574 = vmatprep.subr.bf16.mxu0 %v2890_v1 }
 0x2d9   : > { %1613 = vst [vmem:[#allocation5] sm:$0xff] %v3649_v5  ;;  %v3653_v7 = vmax.f32 %v1219_v6, 0.0  ;;  %v1226_v9 = vrot.slane %v3649_v5, 6  ;;  %v2894_v6 = vld [vmem:[#allocation20 + $0x50] sm:$0xff]  }
 0x2db   : > { %v1227_v10 = vrot.slane %v3653_v7, 6  ;;  %1614 = vst [vmem:[#allocation5 + $0x8] sm:$0xff] %v3653_v7  ;;  %v1244_v11 = vpack.c.bf16 %v3653_v7, %v3649_v5 }
 0x2dd   : > { %1412 = vmatprep.mubr.bf16.mxu1 %v1244_v11  ;;  %v1229_v12 = vsel %vm1228_vm4, %v1226_v9, %v1227_v10  ;;  %v1230_v13 = vsel %vm1228_vm4, %v1227_v10, %v1226_v9  ;;  %v2896_v9 = vld [vmem:[#allocation20 + $0x58] sm:$0xff]  }
 0x2de   : > { %v1241_v14 = vsel %vm1235_vm5, %v1230_v13, %v1234_v8  ;;  %v2895_v8 = vld [vmem:[#allocation20 + $0x10] sm:$0xff]   ;;  %v2897_v10 = vld [vmem:[#allocation20 + $0x18] sm:$0xff]  }
 0x2df   : > { %v1243_v15 = vpack.c.bf16 %v1229_v12, %v1241_v14  ;;  %v2385_v12 = vld [vmem:[%s3881_s23] ss:$0 sm:$0xff]  ;;  %s3887_s23 = sld [smem:[#allocation46_spill]] }
 0x2e1   : > { %1413 = vmatmul.mubr.bf16.vlgmr.msra.gmra.mrb[4].mxu1 %v1243_v15 }
 0x2e2   : > { %2553 = vmatpush3.bf16.msra.mxu1 %v2867_v26  ;;  %v1630_v26 = vrot.slane %v1621_v24, 4 }
 0x2e3   : > { %2554 = vmatprep.subr.bf16.mxu1 %v2868_v27  ;;  %v1631_v27 = vrot.slane %v1622_v21, 4 }
 0x2e5   : > { %s3752_s12 = scalar_lea.hbm %s3887_s23, %s2448_s21 }
 0x2e6   : > { %2555 = vmatpush3.bf16.msra.mxu1 %v2869_v28 }
 0x2e7   : > { %2556 = vmatprep.subr.bf16.mxu1 %v2870_v29 }
 0x2ea   : > { %2557 = vmatpush3.bf16.msra.mxu1 %v2871_v30 }
 0x2eb   : > { %2558 = vmatprep.subr.bf16.mxu1 %v2872_v31  ;;  %v1633_v31 = vsel %vm1627_vm6, %v1631_v27, %v1630_v26 }
 0x2ee   : > { %2559 = vmatpush3.bf16.msra.mxu1 %v2873_v56 }
 0x2ef   : > { %2560 = vmatprep.subr.bf16.mxu1 %v2874_v57 }
 0x2f2   : > { %2561 = vmatpush3.bf16.msra.mxu1 %v2875_v58  ;;  %v1624_v58 = vld [vmem:[#allocation8 + $0x8] sm:$0xff] }
 0x2f3   : > { %2562 = vmatprep.subr.bf16.mxu1 %v2876_v59 }
 0x2f6   : > { %2563 = vmatpush3.bf16.msra.mxu1 %v2877_v60 }
 0x2f7   : > { %2564 = vmatprep.subr.bf16.mxu1 %v2878_v61 }
 0x2fa   : > { %2565 = vmatpush3.bf16.msra.mxu1 %v2879_v62  ;;  %v1623_v62 = vld [vmem:[#allocation8] sm:$0xff] }
 0x2fb   : > { %2566 = vmatprep.subr.bf16.mxu1 %v2880_v63 }
 0x2fe   : > { %2567 = vmatpush3.bf16.msra.mxu1 %v2881_v0  ;;  %v1826_v0 = vrot.slane %v1623_v62, 4 }
 0x2ff   : > { %2625 = vmatprep.subr.bf16.mxu1 %v3224_v45 }
 0x3b4   : > { %v2524_v32 = vpop.f32.mrb[4].mxu1 }
 0x3b5   : > { %v2525_v34 = vpop.f32.mrb[5].mxu1 }
 0x3b6   : > { %v2526_v35 = vadd.f32 %v2525_v34, %v2524_v32  ;;  %v2527_v36 = vpop.f32.mrb[6].mxu1 }
 0x3b7   : > { %v2528_v38 = vpop.f32.mrb[7].mxu1 }
 0x3b8   : > { %v1415_v39 = vadd.f32 %v2526_v35, %v2368_v33  ;;  %v2529_v40 = vadd.f32 %v2528_v38, %v2527_v36  ;;  %v2882_v36 = vld [vmem:[%s3882_s7] sm:$0xff]   ;;  %v2883_v38 = vld [vmem:[%s3882_s7 + $0x8] sm:$0xff]  }
 0x3ba   : > { %v1421_v42 = vmax.f32 %v1415_v39, 0.0  ;;  %v1418_v44 = vadd.f32 %v2529_v40, %v2368_v33  ;;  %v2884_v39 = vld [vmem:[%s3882_s7 + $0x10] sm:$0xff]   ;;  %v2885_v40 = vld [vmem:[%s3882_s7 + $0x18] sm:$0xff]  }
 0x3bc   : > { %1615 = vst [vmem:[#allocation6] sm:$0xff] %v1421_v42  ;;  %v1422_v47 = vmax.f32 %v1418_v44, 0.0  ;;  %v1423_v48 = vrot.slane %v1421_v42, 6  ;;  %v2889_v44 = vld [vmem:[%s3882_s7 + $0x38] sm:$0xff]  }
 0x3be   : > { %v1424_v49 = vrot.slane %v1422_v47, 6  ;;  %1616 = vst [vmem:[#allocation6 + $0x8] sm:$0xff] %v1422_v47  ;;  %v1434_v50 = vpack.c.bf16 %v1422_v47, %v1421_v42  ;;  %v2887_v42 = vld [vmem:[%s3882_s7 + $0x28] sm:$0xff]   ;;  %v2899_v47 = vld [vmem:[#allocation20 + $0x20] sm:$0xff]  }
 0x3c0   : > { %1602 = vmatprep.mubr.bf16.mxu0 %v1434_v50  ;;  %v1425_v52 = vsel %vm1228_vm4, %v1423_v48, %v1424_v49  ;;  %v1426_v53 = vsel %vm1228_vm4, %v1424_v49, %v1423_v48  ;;  %v2900_v48 = vld [vmem:[#allocation20 + $0x68] sm:$0xff]   ;;  %v2902_v50 = vld [vmem:[#allocation20 + $0x70] sm:$0xff]  }
 0x3c1   : > { %v1431_v54 = vsel %vm1235_vm5, %v1426_v53, %v1430_v51  ;;  %v2901_v49 = vld [vmem:[#allocation20 + $0x28] sm:$0xff]   ;;  %v2903_v51 = vld [vmem:[#allocation20 + $0x30] sm:$0xff]   ;;  %v2905_v53 = vld [vmem:[#allocation20 + $0x38] sm:$0xff]  }
 0x3c2   : > { %v1433_v55 = vpack.c.bf16 %v1425_v52, %v1431_v54  ;;  %v2904_v52 = vld [vmem:[#allocation20 + $0x78] sm:$0xff]  }
 0x3c4   : > { %1603 = vmatmul.mubr.bf16.vlgmr.msra.gmra.mrb[8].mxu0 %v1433_v55 }
 0x3c5   : > { %2575 = vmatpush3.bf16.msra.mxu0 %v2891_v2  ;;  %v1827_v2 = vrot.slane %v1624_v58, 4 }
 0x3c6   : > { %2576 = vmatprep.subr.bf16.mxu0 %v2892_v3 }
 0x3c9   : > { %2577 = vmatpush3.bf16.msra.mxu0 %v2893_v4 }
 0x3ca   : > { %2578 = vmatprep.subr.bf16.mxu0 %v2894_v6 }
 0x3cd   : > { %2579 = vmatpush3.bf16.msra.mxu0 %v2895_v8 }
 0x3ce   : > { %2580 = vmatprep.subr.bf16.mxu0 %v2896_v9  ;;  %v1829_v9 = vsel %vm1627_vm6, %v1827_v2, %v1826_v0 }
 0x3d1   : > { %2581 = vmatpush3.bf16.msra.mxu0 %v2897_v10 }
 0x3d2   : > { %2582 = vmatprep.subr.bf16.mxu0 %v2898_v46 }
 0x3d5   : > { %2583 = vmatpush3.bf16.msra.mxu0 %v2899_v47 }
 0x3d6   : > { %2584 = vmatprep.subr.bf16.mxu0 %v2900_v48 }
 0x3d9   : > { %2585 = vmatpush3.bf16.msra.mxu0 %v2901_v49 }
 0x3da   : > { %2586 = vmatprep.subr.bf16.mxu0 %v2902_v50 }
 0x3dd   : > { %2587 = vmatpush3.bf16.msra.mxu0 %v2903_v51 }
 0x3de   : > { %2588 = vmatprep.subr.bf16.mxu0 %v2904_v52 }
 0x3e1   : > { %2589 = vmatpush3.bf16.msra.mxu0 %v2905_v53 }
 0x497   : > { %v2546_v11 = vpop.f32.mrb[8].mxu0 }
 0x498   : > { %v2547_v13 = vpop.f32.mrb[9].mxu0 }
 0x499   : > { %v2548_v14 = vadd.f32 %v2547_v13, %v2546_v11  ;;  %v2549_v15 = vpop.f32.mrb[10].mxu0 }
 0x49a   : > { %v2550_v16 = vpop.f32.mrb[11].mxu0 }
 0x49b   : > { %v1605_v17 = vadd.f32 %v2548_v14, %v2385_v12  ;;  %v2551_v18 = vadd.f32 %v2550_v16, %v2549_v15 }
 0x49d   : > { %v1611_v19 = vmax.f32 %v1605_v17, 0.0  ;;  %v1608_v20 = vadd.f32 %v2551_v18, %v2385_v12 }
 0x49f   : > { %v1617_v23 = vadd.f32 %v1611_v19, %v3649_v5  ;;  %v1612_v25 = vmax.f32 %v1608_v20, 0.0  ;;  %v2419_v19 = vld [vmem:[%s3884_s27] ss:$0 sm:$0xff] }
 0x4a1   : > { %v1619_v28 = vmax.f32 %v1617_v23, 0.0  ;;  %v1618_v29 = vadd.f32 %v1612_v25, %v3653_v7 }
 0x4a3   : > { %2012 = vst [vmem:[#allocation7] sm:$0xff] %v1619_v28  ;;  %v1620_v30 = vmax.f32 %v1618_v29, 0.0  ;;  %v1625_v32 = vrot.slane %v1619_v28, 4 }
 0x4a5   : > { %v1626_v33 = vrot.slane %v1620_v30, 4  ;;  %2013 = vst [vmem:[#allocation7 + $0x8] sm:$0xff] %v1620_v30  ;;  %v1643_v34 = vpack.c.bf16 %v1620_v30, %v1619_v28 }
 0x4a7   : > { %1811 = vmatprep.mubr.bf16.mxu1 %v1643_v34  ;;  %v1628_v5 = vsel %vm1627_vm6, %v1625_v32, %v1626_v33  ;;  %v1629_v7 = vsel %vm1627_vm6, %v1626_v33, %v1625_v32 }
 0x4a8   : > { %v1640_v35 = vsel %vm1634_vm7, %v1629_v7, %v1633_v31 }
 0x4a9   : > { %v1642_v37 = vpack.c.bf16 %v1628_v5, %v1640_v35 }
 0x4ab   : > { %1812 = vmatmul.mubr.bf16.vlgmr.msra.gmra.mrb[8].mxu1 %v1642_v37 }
 0x4ac   : > { %2626 = vmatpush3.bf16.msra.mxu1 %v2882_v36  ;;  %2641 = vmatprep.mubr.msk.bf16.mxu1 %vm3225_vm3, %v3224_v45 }
 0x4ad   : > { %2627 = vmatprep.subr.bf16.mxu1 %v3224_v45 }
 0x4b0   : > { %2628 = vmatpush3.bf16.msra.mxu1 %v2883_v38 }
 0x4b1   : > { %2629 = vmatprep.subr.bf16.mxu1 %v3224_v45 }
 0x4b4   : > { %2630 = vmatpush3.bf16.msra.mxu1 %v2884_v39 }
 0x4b5   : > { %2631 = vmatprep.subr.bf16.mxu1 %v3224_v45 }
 0x4b8   : > { %2632 = vmatpush3.bf16.msra.mxu1 %v2885_v40 }
 0x4b9   : > { %2633 = vmatprep.subr.bf16.mxu1 %v3224_v45 }
 0x4bc   : > { %2634 = vmatpush3.bf16.msra.mxu1 %v2886_v41 }
 0x4bd   : > { %2635 = vmatprep.subr.bf16.mxu1 %v3224_v45 }
 0x4c0   : > { %2636 = vmatpush3.bf16.msra.mxu1 %v2887_v42 }
 0x4c1   : > { %2637 = vmatprep.subr.bf16.mxu1 %v3224_v45 }
 0x4c4   : > { %2638 = vmatpush3.bf16.msra.mxu1 %v2888_v43 }
 0x4c5   : > { %2639 = vmatprep.subr.bf16.mxu1 %v3224_v45  ;;  %v2402_v45 = vld [vmem:[%s3883_s15] ss:$0 sm:$0xff]  ;;  %s3226_s15 = smov [#allocation21]  }
 0x4c6   : > { %s3106_s18 = sshll.u32 %s3226_s15, 4  ;;  %s3107_s18 = int_to_ptr.vmem [resolvable:$false] %s3106_s18 }
 0x4c7   : > { %s3108_s16 = scalar_lea.vmem %s3107_s18, 512  ;;  %p3109_p6 = scmp.lt.s32.totalorder %s3754_s28, %s3107_s18 }
 0x4c8   : > { %2640 = vmatpush3.bf16.msra.mxu1 %v2889_v44  ;;  %p3110_p7 = scmp.lt.s32.totalorder %s3108_s16, %s3102_s29 }
 0x4ca   : > { %p3111_p9 = por %p3110_p7, %p3109_p6 }
 0x4cb   : > { %2642 = vmatmul.mubr.bf16.vlgmr.msra.gmra.mrb[12].mxu1 %v1643_v34 }
 0x4cc   : > { %p3112_p11 = pnand %p3111_p9, %p3105_p5 }
 0x57e   : > { %v2568_v54 = vpop.f32.mrb[8].mxu1 }
 0x57f   : > { %v2569_v55 = vpop.f32.mrb[9].mxu1 }
 0x580   : > { %v2570_v56 = vadd.f32 %v2569_v55, %v2568_v54  ;;  %v2571_v57 = vpop.f32.mrb[10].mxu1 }
 0x581   : > { %v2572_v59 = vpop.f32.mrb[11].mxu1 }
 0x582   : > { %v1814_v60 = vadd.f32 %v2570_v56, %v2402_v45  ;;  %v2573_v61 = vadd.f32 %v2572_v59, %v2571_v57 }
 0x584   : > { %v1820_v63 = vmax.f32 %v1814_v60, 0.0  ;;  %v1817_v1 = vadd.f32 %v2573_v61, %v2402_v45 }
 0x586   : > { %2014 = vst [vmem:[#allocation8] sm:$0xff] %v1820_v63  ;;  %v1821_v3 = vmax.f32 %v1817_v1, 0.0  ;;  %v1822_v4 = vrot.slane %v1820_v63, 4 }
 0x588   : > { %v1823_v6 = vrot.slane %v1821_v3, 4  ;;  %2015 = vst [vmem:[#allocation8 + $0x8] sm:$0xff] %v1821_v3  ;;  %v1833_v8 = vpack.c.bf16 %v1821_v3, %v1820_v63 }
 0x58a   : > { %2001 = vmatprep.mubr.bf16.mxu0 %v1833_v8  ;;  %v1824_v10 = vsel %vm1627_vm6, %v1822_v4, %v1823_v6  ;;  %v1825_v11 = vsel %vm1627_vm6, %v1823_v6, %v1822_v4 }
 0x58b   : > { %v1830_v12 = vsel %vm1634_vm7, %v1825_v11, %v1829_v9 }
 0x58c   : > { %v1832_v13 = vpack.c.bf16 %v1824_v10, %v1830_v12 }
 0x58e   : > { %2002 = vmatmul.mubr.bf16.vlgmr.msra.gmra.mrb[12].mxu0 %v1832_v13 }
 0x59e   : > { %v2121_v14 = vpop.f32.mrb[12].mxu1 }
 0x59f   : > { %v2643_v15 = vpop.f32.mrb[13].mxu1  ;;  %v2122_v27 = vadd.f32 %v2436_v22, %v2121_v14 }
 0x5a0   : > { %v2124_v16 = vpop.f32.mrb[14].mxu1 }
 0x5a1   : > { %v2644_v17 = vpop.f32.mrb[15].mxu1  ;;  %v2125_v30 = vadd.f32 %v2436_v22, %v2124_v16 }
 0x661   : > { %v2590_v18 = vpop.f32.mrb[12].mxu0 }
 0x662   : > { %v2591_v20 = vpop.f32.mrb[13].mxu0 }
 0x663   : > { %v2592_v21 = vadd.f32 %v2591_v20, %v2590_v18  ;;  %v2593_v23 = vpop.f32.mrb[14].mxu0 }
 0x664   : > { %v2594_v24 = vpop.f32.mrb[15].mxu0 }
 0x665   : > { %v2004_v25 = vadd.f32 %v2592_v21, %v2419_v19  ;;  %v2595_v26 = vadd.f32 %v2594_v24, %v2593_v23 }
 0x667   : > { %v2010_v28 = vmax.f32 %v2004_v25, 0.0  ;;  %v2007_v29 = vadd.f32 %v2595_v26, %v2419_v19 }
 0x669   : > { %v2128_v31 = vadd.f32 %v2122_v27, %v2010_v28  ;;  %v2011_v32 = vmax.f32 %v2007_v29, 0.0 }
 0x66b   : > { %v2130_v33 = vmax.f32 %v2128_v31, 0.0  ;;  %v2129_v34 = vadd.f32 %v2125_v30, %v2011_v32 }
 0x66d   : > { %2132 = vst [vmem:[%s3606_s0] sm:$0xff] %v2130_v33  ;;  %v2131_v5 = vmax.f32 %v2129_v34, 0.0 }
 0x66f   : > { %2133 = vst [vmem:[%s3606_s0 + $0x8] sm:$0xff] %v2131_v5 }
 0x670   : > { %3115 = shalt.err (!%p3112_p11)
}
 0x671   : > { %s3116_s17 = scalar_lea.hbm %s3752_s12, 256  ;;  %s3120_s24 = scalar_lea.hbm %s3887_s23, 1024 }
 0x672   : > { %p3117_p13 = scmp.ne.s32.totalorder %s3752_s12, %s3116_s17  ;;  %p3121_p0 = scmp.lt.u32.totalorder %s3752_s12, %s3887_s23 }
 0x673   : > { %p3122_p8 = scmp.lt.u32.totalorder %s3120_s24, %s3116_s17  ;;  %p3124_p12 = scmp.lt.u32.totalorder %s3116_s17, %s3752_s12 }
 0x674   : > { %p3118_p3 = pnand %p3117_p13, %p3888_p1 }
 0x675   : > { %p3123_p10 = por %p3122_p8, %p3121_p0 }
 0x676   : > { %p3119_p2 = pneg %p3118_p3 }
 0x677   : > { %p3125_p4 = por %p3124_p12, %p3123_p10 }
 0x679   : > { %p3126_p5 = pnand %p3125_p4, %p3119_p2 }
 0x67b   : > { %3129 = shalt.err (!%p3126_p5)
}
 0x67c   : > { %s3227_s10 = smov 128   ;;  %s3228_s19 = smov 8  }
 0x67d   : > { %2673 = dma.vmem_to_hbm [thread:$0]  (%p3888_p1), %s3754_s28, 256, %s3752_s12, %s3760_s1, %s3227_s10, %s3227_s10, %s3228_s19  }
 0x67e PF: > { %s3889_s21 = sld [smem:[#allocation31_spill]]  ;;  %s3890_s30 = sld [smem:[#allocation27_spill]] }
 0x67f   : > { %s3891_s20 = sld [smem:[#allocation35_spill]] }
 0x684   : > { %p2715_p6 = scmp.ge.s32.totalorder %s3889_s21, 2  ;;  %s2165_s29 = sand.u32 1, %s3890_s30  }
 0x685   : > { %p3892_p7 = scmp.ne.s32.totalorder %s3891_s20, 0  ;;  %s2166_s15 = scalar_lea.sflag [#allocation11], %s2165_s29 }
 0x687   : > { %p2698_p9 = pnand %p2715_p6, %p3892_p7 }
 0x689   : > { %3179 = dma.done.wait (!%p2698_p9), %s2166_s15, 256  }
 0x68a   : > { %3181 = vsyncadd (!%p2698_p9), %s2166_s15, 4294967040  ;;  %s34_s30 = sadd.s32 1, %s3889_s21   ;;  %s3893_s18 = sld [smem:[#allocation28_spill]] }
 0x68b   : > { %p31_p11 = scmp.ge.s32.totalorder %s34_s30, 6   ;;  %s3894_s26 = sld [smem:[#allocation36_spill]] }
 0x68c   : > { %s3895_s27 = sld [smem:[#allocation29_spill]]  ;;  %s3896_s28 = sld [smem:[#allocation30_spill]] }
 0x68d   : > { %s3897_s29 = sld [smem:[#allocation32_spill]]  ;;  %s3898_s0 = sld [smem:[#allocation34_spill]] }
 0x68e   : > { %s3899_s24 = smov %s3188_s25  ;;  %33 = sbr.rel (!%p31_p11) target bundleno = 20 (0x14), region = 156 }
 0x690   : > { %s3900_s25 = smov %s3893_s18 }
 0x695   :  { %2171 = vsyncpa [#allocation10], 1 }
 0x696   :  { %2173 = vsyncpa [#allocation10 + $0x1], 1 }
 0x697   :  { %2174 = vsyncpa [#allocation13], 1 }
 0x698   :  { %2175 = vsyncpa [#allocation16], 1 }
 0x699   :  { %2176 = vsyncpa [#allocation19], 1 }
 0x69a   :  { %2177 = vsyncpa [#allocation11], 1 }
 0x69b   :  { %2179 = vsyncpa [#allocation11 + $0x1], 1 }

// kernel: tpu_custom_call.1
= control target key start
LH: loop header
LB: loop body
LE: loop exit
PB: predicated region body
PF: predicated region fallthrough
CT: control target
= control target key end

     0   :  { %s3812_s0 = inlined_call_operand.vmem [shape: bf16[2,32,4], index: 0, kind: input, shape index: {}]   ;;  %s3813_s1 = inlined_call_operand.hbm [shape: bf16[256,128], index: 1, kind: input, shape index: {}]   ;;  %s3814_s2 = inlined_call_operand.vmem [shape: f32[1,128], index: 2, kind: input, shape index: {}]   ;;  %s3815_s3 = inlined_call_operand.hbm [shape: bf16[256,128], index: 3, kind: input, shape index: {}]   ;;  %s3816_s4 = inlined_call_operand.vmem [shape: f32[1,128], index: 4, kind: input, shape index: {}]   ;;  %s3817_s5 = inlined_call_operand.hbm [shape: bf16[128,128], index: 5, kind: input, shape index: {}]   ;;  %s3818_s6 = inlined_call_operand.vmem [shape: f32[1,128], index: 6, kind: input, shape index: {}]   ;;  %s3819_s7 = inlined_call_operand.hbm [shape: bf16[256,128], index: 7, kind: input, shape index: {}]   ;;  %s3820_s8 = inlined_call_operand.vmem [shape: f32[1,128], index: 8, kind: input, shape index: {}]   ;;  %s3821_s9 = inlined_call_operand.hbm [shape: bf16[256,128], index: 9, kind: input, shape index: {}]   ;;  %s3822_s10 = inlined_call_operand.vmem [shape: f32[1,128], index: 10, kind: input, shape index: {}]   ;;  %s3823_s11 = inlined_call_operand.hbm [shape: bf16[256,128], index: 11, kind: input, shape index: {}]   ;;  %s3824_s12 = inlined_call_operand.vmem [shape: f32[1,128], index: 12, kind: input, shape index: {}]   ;;  %s3825_s13 = inlined_call_operand.hbm [shape: bf16[256,128], index: 13, kind: input, shape index: {}]   ;;  %s3826_s14 = inlined_call_operand.vmem [shape: f32[1,128], index: 14, kind: input, shape index: {}]   ;;  %s3827_s15 = inlined_call_operand.vmem [shape: bf16[128,128], index: 15, kind: input, shape index: {}]   ;;  %s3828_s16 = inlined_call_operand.vmem [shape: f32[1,128], index: 16, kind: input, shape index: {}]   ;;  %s3829_s17 = inlined_call_operand.hbm [shape: f32[2,32,128], index: 17, kind: output, shape index: {}]  }
   0x1   :  { %3848 = sst [smem:[#allocation37_spill]] %s3812_s0 }
   0x2   :  { %3849 = sst [smem:[#allocation38_spill]] %s3813_s1 }
   0x3   :  { %3850 = sst [smem:[#allocation39_spill]] %s3815_s3 }
   0x4   :  { %3851 = sst [smem:[#allocation40_spill]] %s3819_s7 }
   0x5   :  { %3852 = sst [smem:[#allocation41_spill]] %s3822_s10 }
   0x6   :  { %3853 = sst [smem:[#allocation42_spill]] %s3824_s12 }
   0x7   :  { %3854 = sst [smem:[#allocation43_spill]] %s3826_s14 }
   0x8   :  { %3855 = sst [smem:[#allocation44_spill]] %s3827_s15 }
   0x9   :  { %3856 = sst [smem:[#allocation45_spill]] %s3828_s16 }
   0xa   :  { %3857 = sst [smem:[#allocation46_spill]] %s3829_s17 }
   0xb   :  { %22 = vsyncpa [#allocation10], 0 }
   0xc   :  { %23 = vsyncpa [#allocation13], 0 }
   0xd   :  { %24 = vsyncpa [#allocation16], 0 }
   0xe   :  { %25 = vsyncpa [#allocation19], 0 }
   0xf   :  { %26 = vsyncpa [#allocation11], 0 }
  0x10   :  { %28 = vsyncpa [#allocation11 + $0x1], 0  ;;  %s3319_s24 = smov 0   ;;  %s3321_s25 = smov 0  }
  0x11   :  { %s3323_s26 = smov 0   ;;  %s3325_s27 = smov 0  }
  0x12   :  { %s3327_s28 = smov 0   ;;  %s3329_s29 = smov 0  }
  0x13   :  { %s3331_s0 = smov 0   ;;  %s3333_s30 = smov 0  }
  0x14 LB: > { %3858 = sst [smem:[#allocation27_spill]] %s3184_s24  ;;  %s2301_s18 = sadd.s32 4294967295, %s3212_s30   ;;  %s3212_s30 = sphi %s3333_s30, %s34_s30   ;;  %s3208_s0 = sphi %s3331_s0, %s3898_s0   ;;  %s3204_s29 = sphi %s3329_s29, %s3897_s29   ;;  %s3200_s28 = sphi %s3327_s28, %s3896_s28   ;;  %s3196_s27 = sphi %s3325_s27, %s3895_s27   ;;  %s3192_s26 = sphi %s3323_s26, %s3894_s26   ;;  %s3188_s25 = sphi %s3321_s25, %s3900_s25   ;;  %s3184_s24 = sphi %s3319_s24, %s3899_s24  }
  0x15   : > { %3859 = sst [smem:[#allocation28_spill]] %s3192_s26  ;;  %s2302_s19 = sadd.s32 4294967294, %s3212_s30  }
  0x16   : > { %3860 = sst [smem:[#allocation29_spill]] %s3204_s29  ;;  %s43_s1 = sadd.s32 1, %s3204_s29 }
  0x17   : > { %3861 = sst [smem:[#allocation30_spill]] %s3208_s0  ;;  %s46_s20 = sadd.s32 1, %s3208_s0 }
  0x18   : > { %3862 = sst [smem:[#allocation31_spill]] %s3212_s30  ;;  %p44_p0 = scmp.ge.s32.totalorder %s43_s1, 2 }
  0x19   : > { %s419_s21 = sadd.s32 1, %s3192_s26  ;;  %p429_p1 = scmp.ne.s32.totalorder %s3192_s26, %s3188_s25 }
  0x1a   : > { %p430_p2 = scmp.eq.s32.totalorder %s2301_s18, 3  ;;  %s3902_s1 = smov (%p44_p0, %s43_s1), 0 }
  0x1b   : > { %3863 = sst [smem:[#allocation32_spill]] %s3902_s1  ;;  %s3904_s20 = smov (!%p44_p0, %s46_s20), %s3208_s0 }
  0x1c   : > { %s415_s22 = ssub.s32 %s3204_s29, %s3902_s1  ;;  %p3371_p3 = por %p430_p2, %p429_p1 }
  0x1d   : > { %p48_p4 = scmp.ge.s32.totalorder %s3904_s20, 2  ;;  %p435_p5 = scmp.ne.s32.totalorder %s3188_s25, %s3184_s24 }
  0x1e   : > { %s3864_s23 = scalar_select %p3371_p3, 1, 0 }
  0x1f   : > { %p436_p6 = scmp.eq.s32.totalorder %s2302_s19, 3  ;;  %p2303_p7 = scmp.ge.s32.totalorder %s3212_s30, 1 }
  0x20   : > { %3865 = sst [smem:[#allocation33_spill]] %s3864_s23  ;;  %s3906_s20 = smov (%p48_p4, %s3904_s20), 0 }
  0x21   : > { %3866 = sst [smem:[#allocation34_spill]] %s3906_s20  ;;  %p3380_p8 = por %p436_p6, %p435_p5 }
  0x22   : > { %p443_p9 = scmp.lt.s32.totalorder %s3212_s30, 5  ;;  %s414_s16 = ssub.s32 %s3208_s0, %s3906_s20 }
  0x23   : > { %s3867_s17 = scalar_select %p3380_p8, 1, 0 }
  0x24   : > { %s416_s14 = sor.u32 %s415_s22, %s414_s16  ;;  %p3387_p10 = pnand %p2303_p7, %p443_p9 }
  0x25   : > { %3868 = sst [smem:[#allocation35_spill]] %s3867_s17  ;;  %p417_p11 = scmp.eq.s32.totalorder %s416_s14, 0 }
  0x26   : > { %s3869_s1 = scalar_select %p3387_p10, 1, 0 }
  0x27   : > { %p3391_p12 = scmp.eq.s32.totalorder %s2301_s18, 0  ;;  %p2675_p13 = pneg %p3387_p10 }
  0x28   : > { %s3398_s19 = scalar_select %p417_p11, %s3192_s26, %s419_s21  }
  0x29   : > { %s3870_s29 = scalar_select %p3391_p12, 1, 0 }
  0x2a   : > { %3871 = sst [smem:[#allocation36_spill]] %s3398_s19  ;;  %p3402_p0 = pnand %p3391_p12, %p2675_p13 }
  0x2b   : > { %s3214_s16 = smov [#allocation12]   ;;  %s3215_s20 = smov [#allocation15]  }
  0x2c   : > { %s471_s22 = sshll.u32 %s3214_s16, 4  ;;  %s503_s14 = sshll.u32 %s3215_s20, 4  ;;  %s472_s22 = int_to_ptr.vmem [resolvable:$true] %s471_s22  ;;  %s504_s14 = int_to_ptr.vmem [resolvable:$true] %s503_s14 }
  0x2d   : > { %s3873_s3 = sld [smem:[#allocation39_spill]]  ;;  %p3414_p2 = pneg %p3402_p0 }
  0x33   : > { %s2906_s24 = scalar_lea.hbm %s3873_s3, 2048 }
  0x34   : > { %p2907_p1 = scmp.ne.s32.totalorder %s3873_s3, %s2906_s24  ;;  %p2913_p6 = scmp.lt.u32.totalorder %s2906_s24, %s3873_s3 }
  0x36   : > { %p2909_p4 = pnand %p3414_p2, %p2907_p1 }
  0x38   : > { %p2910_p5 = pneg %p2909_p4 }
  0x3a   : > { %p2915_p7 = pnand %p2913_p6, %p2910_p5 }
  0x3c   : > { %2918 = shalt.err (!%p2915_p7)
}
  0x3d   : > { %s2919_s0 = scalar_lea.vmem %s472_s22, 2048  ;;  %p2927_p8 = scmp.lt.s32.totalorder %s472_s22, %s472_s22 }
  0x3e   : > { %p2920_p9 = scmp.ne.s32.totalorder %s472_s22, %s2919_s0  ;;  %p2928_p3 = scmp.lt.s32.totalorder %s2919_s0, %s2919_s0 }
  0x40   : > { %p2922_p11 = pnand %p2920_p9, %p3414_p2  ;;  %p2929_p12 = por %p2928_p3, %p2927_p8 }
  0x42   : > { %p2923_p13 = pneg %p2922_p11 }
  0x44   : > { %p2930_p10 = pnand %p2929_p12, %p2923_p13 }
  0x46   : > { %2933 = shalt.err (!%p2930_p10)
}
  0x47   : > { %s3216_s30 = smov 64   ;;  %s3217_s20 = smov 4  }
  0x48   : > { %2681 = dma.hbm_to_vmem [thread:$0]  (!%p3402_p0), %s3873_s3, 2048, %s472_s22, [#allocation13], %s3216_s30, %s3216_s30, %s3217_s20  }
  0x49   : > { %s3875_s7 = sld [smem:[#allocation40_spill]] }
  0x4f   : > { %s2934_s16 = scalar_lea.hbm %s3875_s7, 2048 }
  0x50   : > { %p2935_p3 = scmp.ne.s32.totalorder %s3875_s7, %s2934_s16  ;;  %p2941_p12 = scmp.lt.u32.totalorder %s2934_s16, %s3875_s7 }
  0x52   : > { %p2937_p8 = pnand %p2935_p3, %p3414_p2 }
  0x54   : > { %p2938_p10 = pneg %p2937_p8 }
  0x56   : > { %p2943_p1 = pnand %p2941_p12, %p2938_p10 }
  0x58   : > { %2946 = shalt.err (!%p2943_p1)
}
  0x59   : > { %s2947_s24 = scalar_lea.vmem %s504_s14, 2048  ;;  %p2955_p7 = scmp.lt.s32.totalorder %s504_s14, %s504_s14 }
  0x5a   : > { %p2948_p4 = scmp.ne.s32.totalorder %s504_s14, %s2947_s24  ;;  %p2956_p9 = scmp.lt.s32.totalorder %s2947_s24, %s2947_s24 }
  0x5c   : > { %p2950_p5 = pnand %p2948_p4, %p3414_p2  ;;  %p2957_p11 = por %p2956_p9, %p2955_p7 }
  0x5e   : > { %p2951_p6 = pneg %p2950_p5 }
  0x60   : > { %p2958_p13 = pnand %p2957_p11, %p2951_p6 }
  0x62   : > { %2961 = shalt.err (!%p2958_p13)
}
  0x63   : > { %2687 = dma.hbm_to_vmem [thread:$0]  (!%p3402_p0), %s3875_s7, 2048, %s504_s14, [#allocation16], %s3216_s30, %s3216_s30, %s3217_s20  }
  0x64   : > { %s3218_s26 = smov [#allocation18]   ;;  %s2962_s18 = scalar_lea.hbm %s3823_s11, 2048 }
  0x65   : > { %s535_s22 = sshll.u32 %s3218_s26, 4  ;;  %p2963_p3 = scmp.ne.s32.totalorder %s3823_s11, %s2962_s18  ;;  %s536_s22 = int_to_ptr.vmem [resolvable:$true] %s535_s22 }
  0x66   : > { %p2969_p12 = scmp.lt.u32.totalorder %s2962_s18, %s3823_s11 }
  0x67   : > { %p2965_p8 = pnand %p2963_p3, %p3414_p2 }
  0x69   : > { %p2966_p10 = pneg %p2965_p8 }
  0x6b   : > { %p2971_p1 = pnand %p2969_p12, %p2966_p10 }
  0x6d   : > { %2974 = shalt.err (!%p2971_p1)
}
  0x6e   : > { %s2975_s14 = scalar_lea.vmem %s536_s22, 2048  ;;  %p2983_p7 = scmp.lt.s32.totalorder %s536_s22, %s536_s22 }
  0x6f   : > { %p2976_p4 = scmp.ne.s32.totalorder %s536_s22, %s2975_s14  ;;  %p2984_p9 = scmp.lt.s32.totalorder %s2975_s14, %s2975_s14 }
  0x71   : > { %p2978_p5 = pnand %p2976_p4, %p3414_p2  ;;  %p2985_p11 = por %p2984_p9, %p2983_p7 }
  0x73   : > { %p2979_p6 = pneg %p2978_p5 }
  0x75   : > { %p2986_p13 = pnand %p2985_p11, %p2979_p6 }
  0x77   : > { %2989 = shalt.err (!%p2986_p13)
}
  0x78   : > { %2693 = dma.hbm_to_vmem [thread:$0]  (!%p3402_p0), %s3823_s11, 2048, %s536_s22, [#allocation19], %s3216_s30, %s3216_s30, %s3217_s20  }
  0x79   : > { %s3219_s15 = smov [#allocation9]   ;;  %s3220_s23 = smov [#allocation14]  }
  0x7a   : > { %s455_s26 = sshll.u32 %s3219_s15, 4  ;;  %s487_s19 = sshll.u32 %s3220_s23, 4  ;;  %s456_s26 = int_to_ptr.vmem [resolvable:$true] %s455_s26  ;;  %s3475_s19 = int_to_ptr.vmem [resolvable:$true] %s487_s19 }
  0x7b   : > { %s3876_s0 = sld [smem:[#allocation38_spill]] }
  0x81   : > { %s3877_s14 = smov %s3876_s0  ;;  %s2990_s24 = scalar_lea.hbm %s3876_s0, 2048 }
  0x82   : > { %p2991_p3 = scmp.ne.s32.totalorder %s3877_s14, %s2990_s24  ;;  %p2997_p12 = scmp.lt.u32.totalorder %s2990_s24, %s3877_s14 }
  0x84   : > { %p2993_p8 = pnand %p2991_p3, %p3414_p2 }
  0x86   : > { %p2994_p10 = pneg %p2993_p8 }
  0x88   : > { %p2999_p1 = pnand %p2997_p12, %p2994_p10 }
  0x8a   : > { %3002 = shalt.err (!%p2999_p1)
}
  0x8b   : > { %s3003_s12 = scalar_lea.vmem %s456_s26, 2048  ;;  %p3011_p7 = scmp.lt.s32.totalorder %s456_s26, %s456_s26 }
  0x8c   : > { %p3004_p4 = scmp.ne.s32.totalorder %s456_s26, %s3003_s12  ;;  %p3012_p9 = scmp.lt.s32.totalorder %s3003_s12, %s3003_s12 }
  0x8e   : > { %p3006_p5 = pnand %p3004_p4, %p3414_p2  ;;  %p3013_p11 = por %p3012_p9, %p3011_p7 }
  0x90   : > { %p3007_p6 = pneg %p3006_p5 }
  0x92   : > { %p3014_p13 = pnand %p3013_p11, %p3007_p6 }
  0x94   : > { %3017 = shalt.err (!%p3014_p13)
}
  0x95   : > { %2678 = dma.hbm_to_vmem [thread:$0]  (!%p3402_p0), %s3877_s14, 2048, %s456_s26, [#allocation10], %s3216_s30, %s3216_s30, %s3217_s20  }
  0x96   : > { %s3018_s18 = scalar_lea.hbm %s3817_s5, 1024 }
  0x97   : > { %p3019_p3 = scmp.ne.s32.totalorder %s3817_s5, %s3018_s18  ;;  %p3025_p12 = scmp.lt.u32.totalorder %s3018_s18, %s3817_s5 }
  0x99   : > { %p3021_p8 = pnand %p3019_p3, %p3414_p2 }
  0x9b   : > { %p3022_p10 = pneg %p3021_p8 }
  0x9d   : > { %p3027_p1 = pnand %p3025_p12, %p3022_p10 }
  0x9f   : > { %3030 = shalt.err (!%p3027_p1)
}
  0xa0   : > { %s3031_s26 = scalar_lea.vmem %s3475_s19, 1024  ;;  %p3039_p7 = scmp.lt.s32.totalorder %s3475_s19, %s3475_s19 }
  0xa1   : > { %p3032_p4 = scmp.ne.s32.totalorder %s3475_s19, %s3031_s26  ;;  %p3040_p9 = scmp.lt.s32.totalorder %s3031_s26, %s3031_s26 }
  0xa3   : > { %p3034_p5 = pnand %p3032_p4, %p3414_p2  ;;  %p3041_p11 = por %p3040_p9, %p3039_p7 }
  0xa5   : > { %p3035_p6 = pneg %p3034_p5 }
  0xa7   : > { %p3042_p13 = pnand %p3041_p11, %p3035_p6 }
  0xa9   : > { %3045 = shalt.err (!%p3042_p13)
}
  0xaa   : > { %2684 = dma.hbm_to_vmem [thread:$0]  (!%p3402_p0), %s3817_s5, 1024, %s3475_s19, [#allocation13], %s3216_s30, %s3216_s30, %s3217_s20  }
  0xab   : > { %s3221_s7 = smov [#allocation17]   ;;  %s3222_s15 = smov [#allocation20]  }
  0xac   : > { %s519_s10 = sshll.u32 %s3221_s7, 4  ;;  %s551_s23 = sshll.u32 %s3222_s15, 4  ;;  %s520_s10 = int_to_ptr.vmem [resolvable:$true] %s519_s10  ;;  %s3524_s23 = int_to_ptr.vmem [resolvable:$true] %s551_s23 }
  0xad   : > { %s3046_s0 = scalar_lea.hbm %s3821_s9, 2048 }
  0xae   : > { %p3047_p3 = scmp.ne.s32.totalorder %s3821_s9, %s3046_s0  ;;  %p3053_p12 = scmp.lt.u32.totalorder %s3046_s0, %s3821_s9 }
  0xb0   : > { %p3049_p8 = pnand %p3047_p3, %p3414_p2 }
  0xb2   : > { %p3050_p10 = pneg %p3049_p8 }
  0xb4   : > { %p3055_p1 = pnand %p3053_p12, %p3050_p10 }
  0xb6   : > { %3058 = shalt.err (!%p3055_p1)
}
  0xb7   : > { %s3059_s22 = scalar_lea.vmem %s520_s10, 2048  ;;  %p3067_p7 = scmp.lt.s32.totalorder %s520_s10, %s520_s10 }
  0xb8   : > { %p3060_p4 = scmp.ne.s32.totalorder %s520_s10, %s3059_s22  ;;  %p3068_p9 = scmp.lt.s32.totalorder %s3059_s22, %s3059_s22 }
  0xba   : > { %p3062_p5 = pnand %p3060_p4, %p3414_p2  ;;  %p3069_p11 = por %p3068_p9, %p3067_p7 }
  0xbc   : > { %p3063_p6 = pneg %p3062_p5 }
  0xbe   : > { %p3070_p13 = pnand %p3069_p11, %p3063_p6 }
  0xc0   : > { %3073 = shalt.err (!%p3070_p13)
}
  0xc1   : > { %2690 = dma.hbm_to_vmem [thread:$0]  (!%p3402_p0), %s3821_s9, 2048, %s520_s10, [#allocation16], %s3216_s30, %s3216_s30, %s3217_s20  }
  0xc2   : > { %s3074_s16 = scalar_lea.hbm %s3825_s13, 2048 }
  0xc3   : > { %p3075_p3 = scmp.ne.s32.totalorder %s3825_s13, %s3074_s16  ;;  %p3081_p12 = scmp.lt.u32.totalorder %s3074_s16, %s3825_s13 }
  0xc5   : > { %p3077_p8 = pnand %p3075_p3, %p3414_p2 }
  0xc7   : > { %p3078_p10 = pneg %p3077_p8 }
  0xc9   : > { %p3083_p1 = pnand %p3081_p12, %p3078_p10 }
  0xcb   : > { %3086 = shalt.err (!%p3083_p1)
}
  0xcc   : > { %s3087_s10 = scalar_lea.vmem %s3524_s23, 2048  ;;  %p3095_p7 = scmp.lt.s32.totalorder %s3524_s23, %s3524_s23 }
  0xcd   : > { %p3088_p4 = scmp.ne.s32.totalorder %s3524_s23, %s3087_s10  ;;  %p3096_p9 = scmp.lt.s32.totalorder %s3087_s10, %s3087_s10 }
  0xcf   : > { %p3090_p5 = pnand %p3088_p4, %p3414_p2  ;;  %p3097_p11 = por %p3096_p9, %p3095_p7 }
  0xd1   : > { %p3091_p6 = pneg %p3090_p5 }
  0xd3   : > { %p3098_p13 = pnand %p3097_p11, %p3091_p6 }
  0xd5   : > { %3101 = shalt.err (!%p3098_p13)
}
  0xd6   : > { %2696 = dma.hbm_to_vmem [thread:$0]  (!%p3402_p0), %s3825_s13, 2048, %s3524_s23, [#allocation19], %s3216_s30, %s3216_s30, %s3217_s20  }
  0xd7   : > { %p3878_p3 = scmp.ne.s32.totalorder %s3869_s1, 0 }
  0xd8   : > { %p3879_p2 = scmp.ne.s32.totalorder (!%p3878_p3), %s3870_s29, 0 }
  0xd9   : > { %589 = sbr.rel (%p3878_p3) target bundleno = 1662 (0x67e), region = 88 }
  0xe0   : > { %3163 = dma.done.wait (%p3879_p2), [#allocation10], 2048  }
  0xe1   : > { %3165 = vsyncadd (%p3879_p2), [#allocation10], 4294965248 }
  0xe2   : > { %3167 = dma.done.wait (%p3879_p2), [#allocation13], 3072  }
  0xe3   : > { %3169 = vsyncadd (%p3879_p2), [#allocation13], 4294964224 }
  0xe4   : > { %3171 = dma.done.wait (%p3879_p2), [#allocation16], 4096  }
  0xe5   : > { %3173 = vsyncadd (%p3879_p2), [#allocation16], 4294963200 }
  0xe6   : > { %3175 = dma.done.wait (%p3879_p2), [#allocation19], 4096  }
  0xe7   : > { %3177 = vsyncadd (%p3879_p2), [#allocation19], 4294963200  ;;  %s666_s17 = sand.u32 1, %s3188_s25   ;;  %s3593_s1 = sshll.u32 %s3196_s27, 1 }
  0xe8   : > { %s2320_s21 = sshll.u32 %s666_s17, 4  ;;  %p670_p0 = scmp.lt.s32.totalorder %s3200_s28, 1 }
  0xe9   : > { %p672_p8 = scmp.lt.s32.totalorder %s3593_s1, 3  ;;  %s3880_s18 = sld [smem:[#allocation37_spill]] }
  0xea   : > { %s671_s30 = scalar_select %p670_p0, %s3200_s28, 1 }
  0xeb   : > { %s673_s20 = scalar_select %p672_p8, %s3593_s1, 3 }
  0xec   : > { %s2322_s23 = sshll.u32 %s671_s30, 2  ;;  %s3606_s0 = scalar_lea.vmem [#allocation21], %s2320_s21 }
  0xed   : > { %s675_s12 = sadd.s32 %s2322_s23, %s673_s20  ;;  %p2324_p10 = scmp.ne.s32.totalorder %s3196_s27, 0 }
  0xee   : > { %s2323_s29 = sshll.u32 %s675_s12, 2  ;;  %v3223_v0 = vmov (!%p2324_p10), 0.0  }
  0xef   : > { %s3604_s16 = scalar_lea.vmem %s3880_s18, %s2323_s29  ;;  %684 = sbr.rel (%p2324_p10) target bundleno = 246 (0xf6), region = 120  ;;  %685 = vst [vmem:[#allocation2] sm:$0xff] (!%p2324_p10), %v3223_v0  ;;  %686 = vst [vmem:[#allocation2 + $0x8] sm:$0xff] (!%p2324_p10), %v3223_v0 }
  0xf0   : > { %687 = vst [vmem:[#allocation3] sm:$0xff] (!%p2324_p10), %v3223_v0  ;;  %688 = vst [vmem:[#allocation3 + $0x8] sm:$0xff] (!%p2324_p10), %v3223_v0 }
  0xf1   : > { %689 = vst [vmem:[#allocation4] sm:$0xff] (!%p2324_p10), %v3223_v0  ;;  %690 = vst [vmem:[#allocation4 + $0x8] sm:$0xff] (!%p2324_p10), %v3223_v0 }
  0xf2   : > { %691 = vst [vmem:[#allocation5] sm:$0xff] (!%p2324_p10), %v3223_v0  ;;  %692 = vst [vmem:[#allocation5 + $0x8] sm:$0xff] (!%p2324_p10), %v3223_v0 }
  0xf3   : > { %693 = vst [vmem:[#allocation6] sm:$0xff] (!%p2324_p10), %v3223_v0  ;;  %694 = vst [vmem:[#allocation6 + $0x8] sm:$0xff] (!%p2324_p10), %v3223_v0 }
  0xf4   : > { %695 = vst [vmem:[#allocation7] sm:$0xff] (!%p2324_p10), %v3223_v0  ;;  %696 = vst [vmem:[#allocation7 + $0x8] sm:$0xff] (!%p2324_p10), %v3223_v0 }
  0xf5   : > { %697 = vst [vmem:[#allocation8] sm:$0xff] (!%p2324_p10), %v3223_v0  ;;  %698 = vst [vmem:[#allocation8 + $0x8] sm:$0xff] (!%p2324_p10), %v3223_v0 }
  0xf6 PF: > { %v2794_v1 = vld [vmem:[#allocation9 + $0x40] sm:$0xff]   ;;  %v2796_v3 = vld [vmem:[#allocation9 + $0x48] sm:$0xff]   ;;  %v2798_v5 = vld [vmem:[#allocation9 + $0x50] sm:$0xff]   ;;  %vm703_vm0 = vcmask 31744   ;;  %v708_v13 = vlaneseq  ;;  %v3224_v45 = vmov 0.0   ;;  %vm3225_vm3 = vmmov 0  }
  0xf7   : > { %v2795_v2 = vld [vmem:[#allocation9] sm:$0xff]   ;;  %2455 = vmatprep.subr.bf16.mxu0 %v2794_v1  ;;  %v2797_v4 = vld [vmem:[#allocation9 + $0x8] sm:$0xff]   ;;  %v2799_v6 = vld [vmem:[#allocation9 + $0x10] sm:$0xff]   ;;  %s3881_s23 = sld [smem:[#allocation41_spill]]  ;;  %s3882_s7 = sld [smem:[#allocation44_spill]] }
  0xf8   : > { %2456 = vmatpush3.bf16.msra.mxu0 %v2795_v2  ;;  %v2800_v7 = vld [vmem:[#allocation9 + $0x58] sm:$0xff]   ;;  %v2802_v9 = vld [vmem:[#allocation9 + $0x60] sm:$0xff]   ;;  %v2804_v11 = vld [vmem:[#allocation9 + $0x68] sm:$0xff]   ;;  %v3610_v22 = vshrl.u32 %v708_v13, 7  ;;  %s3883_s15 = sld [smem:[#allocation42_spill]]  ;;  %s3884_s27 = sld [smem:[#allocation43_spill]] }
  0xf9   : > { %2457 = vmatprep.subr.bf16.mxu0 %v2796_v3  ;;  %v2801_v8 = vld [vmem:[#allocation9 + $0x18] sm:$0xff]   ;;  %v2803_v10 = vld [vmem:[#allocation9 + $0x20] sm:$0xff]   ;;  %v2452_v12 = vld [vmem:[%s3604_s16] sm:$0xff]   ;;  %s2447_s24 = sshll.u32 %s3200_s28, 2  ;;  %s3885_s10 = sld [smem:[#allocation45_spill]] }
  0xfa   : > { %v2805_v14 = vld [vmem:[#allocation9 + $0x28] sm:$0xff]   ;;  %v2453_v15 = vunpack.c.l.bf16 %v2452_v12  ;;  %v2454_v16 = vunpack.c.h.bf16 %v2452_v12  ;;  %v2806_v17 = vld [vmem:[#allocation9 + $0x70] sm:$0xff]   ;;  %v711_v18 = vld [vmem:[#allocation3] sm:$0xff]  ;;  %vm717_vm1 = vcmp.lt.s32.totalorder %v3610_v22, 1  ;;  %vm724_vm2 = vcmp.ge.s32.totalorder %v3610_v22, 1  ;;  %s2147_s19 = sadd.s32 %s2447_s24, %s3593_s1  ;;  %s3886_s22 = sld [smem:[#allocation33_spill]] }
  0xfb   : > { %v2810_v19 = vld [vmem:[#allocation12 + $0x40] sm:$0xff]   ;;  %v712_v21 = vld [vmem:[#allocation3 + $0x8] sm:$0xff]  ;;  %v2807_v23 = vld [vmem:[#allocation9 + $0x30] sm:$0xff]   ;;  %v720_v27 = vrot.slane %v711_v18, 7  ;;  %vm1228_vm4 = vcmp.lt.s32.totalorder %v3610_v22, 2  ;;  %vm1235_vm5 = vcmp.ge.s32.totalorder %v3610_v22, 2 }
  0xfc   : > { %2458 = vmatpush3.bf16.msra.mxu0 %v2797_v4  ;;  %704 = vst.msk [vmem:[#allocation2] sm:$0xff] %vm703_vm0, %v2453_v15  ;;  %705 = vst.msk [vmem:[#allocation2 + $0x8] sm:$0xff] %vm703_vm0, %v2454_v16  ;;  %v2811_v20 = vld [vmem:[#allocation12] sm:$0xff]   ;;  %2477 = vmatprep.subr.bf16.mxu1 %v2810_v19  ;;  %v2813_v24 = vld [vmem:[#allocation12 + $0x48] sm:$0xff]   ;;  %v721_v28 = vrot.slane %v712_v21, 7  ;;  %vm1627_vm6 = vcmp.lt.s32.totalorder %v3610_v22, 4 }
  0xfd   : > { %2459 = vmatprep.subr.bf16.mxu0 %v2798_v5  ;;  %2478 = vmatpush3.bf16.msra.mxu1 %v2811_v20  ;;  %v2808_v25 = vld [vmem:[#allocation9 + $0x78] sm:$0xff]   ;;  %v2814_v26 = vld [vmem:[#allocation12 + $0x8] sm:$0xff]   ;;  %v2816_v29 = vld [vmem:[#allocation12 + $0x50] sm:$0xff]   ;;  %vm1634_vm7 = vcmp.ge.s32.totalorder %v3610_v22, 4  ;;  %s2448_s21 = sshll.u32 %s2147_s19, 7  ;;  %s2150_s28 = sshll.u32 %s3606_s0, 4  ;;  %s3754_s28 = int_to_ptr.vmem [resolvable:$true] %s2150_s28 }
  0xfe   : > { %2479 = vmatprep.subr.bf16.mxu1 %v2813_v24  ;;  %v2817_v30 = vld [vmem:[#allocation12 + $0x10] sm:$0xff]   ;;  %v2809_v31 = vld [vmem:[#allocation9 + $0x38] sm:$0xff]   ;;  %v723_v37 = vsel %vm717_vm1, %v721_v28, %v720_v27  ;;  %v2812_v43 = vld [vmem:[#allocation14] sm:$0xff]   ;;  %s3760_s1 = scalar_lea.sflag [#allocation11], %s666_s17  ;;  %s3102_s29 = scalar_lea.vmem %s3754_s28, 256 }
  0xff   : > { %v2819_v38 = vld [vmem:[#allocation12 + $0x58] sm:$0xff]   ;;  %v2815_v46 = vld [vmem:[#allocation14 + $0x8] sm:$0xff]   ;;  %v2818_v47 = vld [vmem:[#allocation14 + $0x10] sm:$0xff]   ;;  %p3103_p12 = scmp.ne.s32.totalorder %s3754_s28, %s3102_s29 }
 0x100   : > { %2460 = vmatpush3.bf16.msra.mxu0 %v2799_v6  ;;  %v2820_v41 = vld [vmem:[#allocation12 + $0x18] sm:$0xff]   ;;  %v2822_v49 = vld [vmem:[#allocation12 + $0x60] sm:$0xff]   ;;  %v2825_v52 = vld [vmem:[#allocation12 + $0x68] sm:$0xff]   ;;  %p3888_p1 = scmp.ne.s32.totalorder %s3886_s22, 0 }
 0x101   : > { %2461 = vmatprep.subr.bf16.mxu0 %v2800_v7  ;;  %2480 = vmatpush3.bf16.msra.mxu1 %v2814_v26  ;;  %v2821_v48 = vld [vmem:[#allocation14 + $0x18] sm:$0xff]   ;;  %v2823_v50 = vld [vmem:[#allocation12 + $0x20] sm:$0xff]   ;;  %v2826_v53 = vld [vmem:[#allocation12 + $0x28] sm:$0xff]  }
 0x102   : > { %2481 = vmatprep.subr.bf16.mxu1 %v2816_v29  ;;  %v2824_v51 = vld [vmem:[#allocation14 + $0x20] sm:$0xff]   ;;  %v2827_v54 = vld [vmem:[#allocation14 + $0x28] sm:$0xff]   ;;  %v2828_v55 = vld [vmem:[#allocation12 + $0x70] sm:$0xff]   ;;  %p3104_p4 = pnand %p3103_p12, %p3888_p1 }
 0x103   : > { %v706_v32 = vld [vmem:[#allocation2] sm:$0xff]  ;;  %v707_v33 = vld [vmem:[#allocation2 + $0x8] sm:$0xff]  ;;  %v2834_v61 = vld [vmem:[#allocation15 + $0x40] sm:$0xff]  }
 0x104   : > { %2462 = vmatpush3.bf16.msra.mxu0 %v2801_v8  ;;  %v715_v34 = vrot.slane %v706_v32, 7  ;;  %v716_v35 = vrot.slane %v707_v33, 7  ;;  %v733_v36 = vpack.c.bf16 %v707_v33, %v706_v32  ;;  %1102 = vst [vmem:[#allocation3] sm:$0xff] %v706_v32  ;;  %1103 = vst [vmem:[#allocation3 + $0x8] sm:$0xff] %v707_v33  ;;  %v2829_v56 = vld [vmem:[#allocation12 + $0x30] sm:$0xff]   ;;  %v2831_v58 = vld [vmem:[#allocation12 + $0x78] sm:$0xff]   ;;  %p3105_p5 = pneg %p3104_p4 }
 0x105   : > { %2463 = vmatprep.subr.bf16.mxu0 %v2802_v9  ;;  %2482 = vmatpush3.bf16.msra.mxu1 %v2817_v30  ;;  %v2830_v57 = vld [vmem:[#allocation14 + $0x30] sm:$0xff]   ;;  %v2832_v59 = vld [vmem:[#allocation12 + $0x38] sm:$0xff]   ;;  %v2835_v20 = vld [vmem:[#allocation15] sm:$0xff]  }
 0x106   : > { %901 = vmatprep.mubr.bf16.mxu0 %v733_v36  ;;  %v718_v39 = vsel %vm717_vm1, %v715_v34, %v716_v35  ;;  %v719_v40 = vsel %vm717_vm1, %v716_v35, %v715_v34  ;;  %2483 = vmatprep.subr.bf16.mxu1 %v2819_v38  ;;  %v2833_v60 = vld [vmem:[#allocation14 + $0x38] sm:$0xff]   ;;  %v2325_v63 = vld [vmem:[%s3814_s2] ss:$0 sm:$0xff]  ;;  %v2837_v24 = vld [vmem:[#allocation15 + $0x8] sm:$0xff]  }
 0x107   : > { %v730_v42 = vsel %vm724_vm2, %v719_v40, %v723_v37  ;;  %v714_v3 = vld [vmem:[#allocation4 + $0x8] sm:$0xff]  ;;  %v713_v7 = vld [vmem:[#allocation4] sm:$0xff]  ;;  %v2842_v30 = vld [vmem:[#allocation15 + $0x60] sm:$0xff]  }
 0x108   : > { %2464 = vmatpush3.bf16.msra.mxu0 %v2803_v10  ;;  %v732_v44 = vpack.c.bf16 %v718_v39, %v730_v42  ;;  %v916_v9 = vrot.slane %v713_v7, 7  ;;  %v2839_v26 = vld [vmem:[#allocation15 + $0x10] sm:$0xff]   ;;  %v2840_v27 = vld [vmem:[#allocation15 + $0x58] sm:$0xff]   ;;  %v2843_v32 = vld [vmem:[#allocation15 + $0x20] sm:$0xff]  }
 0x109   : > { %2465 = vmatprep.subr.bf16.mxu0 %v2804_v11  ;;  %2484 = vmatpush3.bf16.msra.mxu1 %v2820_v41  ;;  %v917_v11 = vrot.slane %v714_v3, 7  ;;  %v2841_v28 = vld [vmem:[#allocation15 + $0x18] sm:$0xff]   ;;  %v2844_v35 = vld [vmem:[#allocation15 + $0x68] sm:$0xff]   ;;  %v2846_v37 = vld [vmem:[#allocation15 + $0x70] sm:$0xff]  }
 0x10a   : > { %2485 = vmatprep.subr.bf16.mxu1 %v2822_v49  ;;  %v2847_v38 = vld [vmem:[#allocation15 + $0x30] sm:$0xff]   ;;  %v2848_v39 = vld [vmem:[#allocation15 + $0x78] sm:$0xff]   ;;  %v2850_v41 = vld [vmem:[#allocation17 + $0x40] sm:$0xff]  }
 0x10b   : > { %v919_v16 = vsel %vm717_vm1, %v917_v11, %v916_v9  ;;  %v2849_v40 = vld [vmem:[#allocation15 + $0x38] sm:$0xff]   ;;  %v2851_v42 = vld [vmem:[#allocation17] sm:$0xff]   ;;  %v2436_v22 = vld [vmem:[%s3885_s10] ss:$0 sm:$0xff] }
 0x10c   : > { %2466 = vmatpush3.bf16.msra.mxu0 %v2805_v14  ;;  %v2857_v49 = vld [vmem:[#allocation17 + $0x18] sm:$0xff]  }
 0x10d   : > { %2467 = vmatprep.subr.bf16.mxu0 %v2806_v17  ;;  %2486 = vmatpush3.bf16.msra.mxu1 %v2823_v50 }
 0x10e   : > { %2487 = vmatprep.subr.bf16.mxu1 %v2825_v52 }
 0x110   : > { %2468 = vmatpush3.bf16.msra.mxu0 %v2807_v23  ;;  %v2836_v23 = vld [vmem:[#allocation15 + $0x48] sm:$0xff]  }
 0x111   : > { %2469 = vmatprep.subr.bf16.mxu0 %v2808_v25  ;;  %2488 = vmatpush3.bf16.msra.mxu1 %v2826_v53  ;;  %v2838_v25 = vld [vmem:[#allocation15 + $0x50] sm:$0xff]  }
 0x112   : > { %2489 = vmatprep.subr.bf16.mxu1 %v2828_v55  ;;  %v2359_v53 = vld [vmem:[%s3818_s6] ss:$0 sm:$0xff] }
 0x114   : > { %2470 = vmatpush3.bf16.msra.mxu0 %v2809_v31 }
 0x115   : > { %2605 = vmatprep.subr.bf16.mxu0 %v3224_v45  ;;  %2490 = vmatpush3.bf16.msra.mxu1 %v2829_v56 }
 0x116   : > { %2491 = vmatprep.subr.bf16.mxu1 %v2831_v58 }
 0x117   : > { %902 = vmatmul.mubr.bf16.vlgmr.msra.gmra.mrb[0].mxu0 %v732_v44  ;;  %v2853_v44 = vld [vmem:[#allocation17 + $0x8] sm:$0xff]  }
 0x118   : > { %2606 = vmatpush3.bf16.msra.mxu0 %v2812_v43  ;;  %2621 = vmatprep.mubr.msk.bf16.mxu0 %vm3225_vm3, %v3224_v45  ;;  %v2852_v43 = vld [vmem:[#allocation17 + $0x48] sm:$0xff]  }
 0x119   : > { %2607 = vmatprep.subr.bf16.mxu0 %v3224_v45  ;;  %2492 = vmatpush3.bf16.msra.mxu1 %v2832_v59 }
 0x11a   : > { %2508 = vmatprep.subr.bf16.mxu1 %v2834_v61 }
 0x11c   : > { %2608 = vmatpush3.bf16.msra.mxu0 %v2815_v46  ;;  %v2854_v46 = vld [vmem:[#allocation17 + $0x50] sm:$0xff]  }
 0x11d   : > { %2609 = vmatprep.subr.bf16.mxu0 %v3224_v45 }
 0x120   : > { %2610 = vmatpush3.bf16.msra.mxu0 %v2818_v47  ;;  %v2855_v47 = vld [vmem:[#allocation17 + $0x10] sm:$0xff]  }
 0x121   : > { %2611 = vmatprep.subr.bf16.mxu0 %v3224_v45 }
 0x124   : > { %2612 = vmatpush3.bf16.msra.mxu0 %v2821_v48  ;;  %v2856_v48 = vld [vmem:[#allocation17 + $0x58] sm:$0xff]  }
 0x125   : > { %2613 = vmatprep.subr.bf16.mxu0 %v3224_v45 }
 0x128   : > { %2614 = vmatpush3.bf16.msra.mxu0 %v2824_v51  ;;  %v2342_v51 = vld [vmem:[%s3816_s4] ss:$0 sm:$0xff] }
 0x129   : > { %2615 = vmatprep.subr.bf16.mxu0 %v3224_v45 }
 0x12c   : > { %2616 = vmatpush3.bf16.msra.mxu0 %v2827_v54 }
 0x12d   : > { %2617 = vmatprep.subr.bf16.mxu0 %v3224_v45 }
 0x130   : > { %2618 = vmatpush3.bf16.msra.mxu0 %v2830_v57 }
 0x131   : > { %2619 = vmatprep.subr.bf16.mxu0 %v3224_v45 }
 0x134   : > { %2620 = vmatpush3.bf16.msra.mxu0 %v2833_v60 }
 0x135   : > { %2530 = vmatprep.subr.bf16.mxu0 %v2850_v41  ;;  %v1224_v41 = vld [vmem:[#allocation6] sm:$0xff] }
 0x137   : > { %2622 = vmatmul.mubr.bf16.vlgmr.msra.gmra.mrb[4].mxu0 %v733_v36  ;;  %v2845_v36 = vld [vmem:[#allocation15 + $0x28] sm:$0xff]  }
 0x138   : > { %2531 = vmatpush3.bf16.msra.mxu0 %v2851_v42 }
 0x139   : > { %2532 = vmatprep.subr.bf16.mxu0 %v2852_v43  ;;  %v1427_v43 = vrot.slane %v1224_v41, 6  ;;  %v2886_v41 = vld [vmem:[%s3882_s7 + $0x20] sm:$0xff]  }
 0x13c   : > { %2533 = vmatpush3.bf16.msra.mxu0 %v2853_v44 }
 0x13d   : > { %2534 = vmatprep.subr.bf16.mxu0 %v2854_v46 }
 0x140   : > { %2535 = vmatpush3.bf16.msra.mxu0 %v2855_v47 }
 0x141   : > { %2536 = vmatprep.subr.bf16.mxu0 %v2856_v48 }
 0x144   : > { %2537 = vmatpush3.bf16.msra.mxu0 %v2857_v49 }
 0x1ea   : > { %v2471_v62 = vpop.f32.mrb[0].mxu0 }
 0x1eb   : > { %v2472_v0 = vpop.f32.mrb[1].mxu0 }
 0x1ec   : > { %v2473_v1 = vadd.f32 %v2472_v0, %v2471_v62  ;;  %v2474_v2 = vpop.f32.mrb[2].mxu0  ;;  %v1223_v62 = vld [vmem:[#allocation5 + $0x8] sm:$0xff]  ;;  %v1222_v0 = vld [vmem:[#allocation5] sm:$0xff] }
 0x1ed   : > { %v2475_v4 = vpop.f32.mrb[3].mxu0  ;;  %v1231_v3 = vrot.slane %v1222_v0, 6  ;;  %v2881_v0 = vld [vmem:[#allocation18 + $0x38] sm:$0xff]  }
 0x1ee   : > { %v904_v5 = vadd.f32 %v2473_v1, %v2325_v63  ;;  %v2476_v6 = vadd.f32 %v2475_v4, %v2474_v2  ;;  %v1232_v4 = vrot.slane %v1223_v62, 6  ;;  %v2879_v62 = vld [vmem:[#allocation18 + $0x30] sm:$0xff]  }
 0x1f0   : > { %v910_v8 = vmax.f32 %v904_v5, 0.0  ;;  %v907_v10 = vadd.f32 %v2476_v6, %v2325_v63 }
 0x1f2   : > { %1104 = vst [vmem:[#allocation4] sm:$0xff] %v910_v8  ;;  %v911_v12 = vmax.f32 %v907_v10, 0.0  ;;  %v912_v13 = vrot.slane %v910_v8, 7 }
 0x1f4   : > { %v913_v14 = vrot.slane %v911_v12, 7  ;;  %1105 = vst [vmem:[#allocation4 + $0x8] sm:$0xff] %v911_v12  ;;  %v923_v15 = vpack.c.bf16 %v911_v12, %v910_v8  ;;  %v1234_v8 = vsel %vm1228_vm4, %v1232_v4, %v1231_v3  ;;  %v2892_v3 = vld [vmem:[#allocation20 + $0x48] sm:$0xff]  }
 0x1f5   : > { %v2893_v4 = vld [vmem:[#allocation20 + $0x8] sm:$0xff]  }
 0x1f6   : > { %1091 = vmatprep.mubr.bf16.mxu1 %v923_v15  ;;  %v914_v17 = vsel %vm717_vm1, %v912_v13, %v913_v14  ;;  %v915_v18 = vsel %vm717_vm1, %v913_v14, %v912_v13 }
 0x1f7   : > { %v920_v19 = vsel %vm724_vm2, %v915_v18, %v919_v16  ;;  %v2858_v16 = vld [vmem:[#allocation17 + $0x60] sm:$0xff]   ;;  %v2860_v18 = vld [vmem:[#allocation17 + $0x68] sm:$0xff]  }
 0x1f8   : > { %v922_v21 = vpack.c.bf16 %v914_v17, %v920_v19  ;;  %v2859_v17 = vld [vmem:[#allocation17 + $0x20] sm:$0xff]   ;;  %2538 = vmatprep.subr.bf16.mxu0 %v2858_v16  ;;  %v2861_v19 = vld [vmem:[#allocation17 + $0x28] sm:$0xff]  }
 0x1f9   : > { %2539 = vmatpush3.bf16.msra.mxu0 %v2859_v17 }
 0x1fa   : > { %1092 = vmatmul.mubr.bf16.vlgmr.msra.gmra.mrb[0].mxu1 %v922_v21  ;;  %2540 = vmatprep.subr.bf16.mxu0 %v2860_v18  ;;  %v2863_v21 = vld [vmem:[#allocation17 + $0x30] sm:$0xff]  }
 0x1fb   : > { %2509 = vmatpush3.bf16.msra.mxu1 %v2835_v20  ;;  %v2862_v20 = vld [vmem:[#allocation17 + $0x70] sm:$0xff]  }
 0x1fc   : > { %2510 = vmatprep.subr.bf16.mxu1 %v2836_v23  ;;  %v2864_v23 = vld [vmem:[#allocation17 + $0x78] sm:$0xff]  }
 0x1fd   : > { %2541 = vmatpush3.bf16.msra.mxu0 %v2861_v19 }
 0x1fe   : > { %2542 = vmatprep.subr.bf16.mxu0 %v2862_v20 }
 0x1ff   : > { %2511 = vmatpush3.bf16.msra.mxu1 %v2837_v24  ;;  %v2865_v24 = vld [vmem:[#allocation17 + $0x38] sm:$0xff]  }
 0x200   : > { %2512 = vmatprep.subr.bf16.mxu1 %v2838_v25  ;;  %v2866_v25 = vld [vmem:[#allocation18 + $0x40] sm:$0xff]  }
 0x201   : > { %2543 = vmatpush3.bf16.msra.mxu0 %v2863_v21  ;;  %v1622_v21 = vld [vmem:[#allocation7 + $0x8] sm:$0xff] }
 0x202   : > { %2544 = vmatprep.subr.bf16.mxu0 %v2864_v23 }
 0x203   : > { %2513 = vmatpush3.bf16.msra.mxu1 %v2839_v26  ;;  %v2867_v26 = vld [vmem:[#allocation18] sm:$0xff]  }
 0x204   : > { %2514 = vmatprep.subr.bf16.mxu1 %v2840_v27  ;;  %v2868_v27 = vld [vmem:[#allocation18 + $0x48] sm:$0xff]  }
 0x205   : > { %2545 = vmatpush3.bf16.msra.mxu0 %v2865_v24  ;;  %v1621_v24 = vld [vmem:[#allocation7] sm:$0xff] }
 0x207   : > { %2515 = vmatpush3.bf16.msra.mxu1 %v2841_v28  ;;  %v2869_v28 = vld [vmem:[#allocation18 + $0x8] sm:$0xff]  }
 0x208   : > { %2516 = vmatprep.subr.bf16.mxu1 %v2842_v30  ;;  %v2871_v30 = vld [vmem:[#allocation18 + $0x10] sm:$0xff]  }
 0x20a   : > { %v1211_v29 = vpop.f32.mrb[4].mxu0 }
 0x20b   : > { %v2623_v31 = vpop.f32.mrb[5].mxu0  ;;  %2517 = vmatpush3.bf16.msra.mxu1 %v2843_v32  ;;  %v1212_v58 = vadd.f32 %v2359_v53, %v1211_v29  ;;  %v2870_v29 = vld [vmem:[#allocation18 + $0x50] sm:$0xff]  }
 0x20c   : > { %v1214_v33 = vpop.f32.mrb[6].mxu0  ;;  %2518 = vmatprep.subr.bf16.mxu1 %v2844_v35  ;;  %v2872_v31 = vld [vmem:[#allocation18 + $0x58] sm:$0xff]  }
 0x20d   : > { %v2624_v34 = vpop.f32.mrb[7].mxu0  ;;  %v1215_v2 = vadd.f32 %v2359_v53, %v1214_v33  ;;  %v2368_v33 = vld [vmem:[%s3820_s8] ss:$0 sm:$0xff] }
 0x20f   : > { %2519 = vmatpush3.bf16.msra.mxu1 %v2845_v36 }
 0x210   : > { %2520 = vmatprep.subr.bf16.mxu1 %v2846_v37  ;;  %v1225_v37 = vld [vmem:[#allocation6 + $0x8] sm:$0xff] }
 0x211   : > { %v1428_v46 = vrot.slane %v1225_v37, 6 }
 0x213   : > { %2521 = vmatpush3.bf16.msra.mxu1 %v2847_v38 }
 0x214   : > { %2522 = vmatprep.subr.bf16.mxu1 %v2848_v39 }
 0x217   : > { %2523 = vmatpush3.bf16.msra.mxu1 %v2849_v40 }
 0x218   : > { %2552 = vmatprep.subr.bf16.mxu1 %v2866_v25 }
 0x2cd   : > { %v2493_v50 = vpop.f32.mrb[0].mxu1 }
 0x2ce   : > { %v2494_v52 = vpop.f32.mrb[1].mxu1 }
 0x2cf   : > { %v2495_v54 = vadd.f32 %v2494_v52, %v2493_v50  ;;  %v2496_v55 = vpop.f32.mrb[2].mxu1 }
 0x2d0   : > { %v2497_v56 = vpop.f32.mrb[3].mxu1 }
 0x2d1   : > { %v1094_v57 = vadd.f32 %v2495_v54, %v2342_v51  ;;  %v2498_v59 = vadd.f32 %v2497_v56, %v2496_v55  ;;  %v2873_v56 = vld [vmem:[#allocation18 + $0x18] sm:$0xff]  }
 0x2d3   : > { %v1100_v60 = vmax.f32 %v1094_v57, 0.0  ;;  %v1097_v61 = vadd.f32 %v2498_v59, %v2342_v51  ;;  %v1430_v51 = vsel %vm1228_vm4, %v1428_v46, %v1427_v43  ;;  %v2874_v57 = vld [vmem:[#allocation18 + $0x60] sm:$0xff]   ;;  %v2876_v59 = vld [vmem:[#allocation18 + $0x68] sm:$0xff]  }
 0x2d4   : > { %v2888_v43 = vld [vmem:[%s3882_s7 + $0x30] sm:$0xff]  }
 0x2d5   : > { %v1218_v63 = vadd.f32 %v1212_v58, %v1100_v60  ;;  %v1101_v1 = vmax.f32 %v1097_v61, 0.0  ;;  %v2875_v58 = vld [vmem:[#allocation18 + $0x20] sm:$0xff]   ;;  %v2877_v60 = vld [vmem:[#allocation18 + $0x28] sm:$0xff]   ;;  %v2878_v61 = vld [vmem:[#allocation18 + $0x70] sm:$0xff]  }
 0x2d6   : > { %v2898_v46 = vld [vmem:[#allocation20 + $0x60] sm:$0xff]  }
 0x2d7   : > { %v3649_v5 = vmax.f32 %v1218_v63, 0.0  ;;  %v1219_v6 = vadd.f32 %v1215_v2, %v1101_v1  ;;  %v2880_v63 = vld [vmem:[#allocation18 + $0x78] sm:$0xff]   ;;  %v2890_v1 = vld [vmem:[#allocation20 + $0x40] sm:$0xff]  }
 0x2d8   : > { %v2891_v2 = vld [vmem:[#allocation20] sm:$0xff]   ;;  %2574 = vmatprep.subr.bf16.mxu0 %v2890_v1 }
 0x2d9   : > { %1613 = vst [vmem:[#allocation5] sm:$0xff] %v3649_v5  ;;  %v3653_v7 = vmax.f32 %v1219_v6, 0.0  ;;  %v1226_v9 = vrot.slane %v3649_v5, 6  ;;  %v2894_v6 = vld [vmem:[#allocation20 + $0x50] sm:$0xff]  }
 0x2db   : > { %v1227_v10 = vrot.slane %v3653_v7, 6  ;;  %1614 = vst [vmem:[#allocation5 + $0x8] sm:$0xff] %v3653_v7  ;;  %v1244_v11 = vpack.c.bf16 %v3653_v7, %v3649_v5 }
 0x2dd   : > { %1412 = vmatprep.mubr.bf16.mxu1 %v1244_v11  ;;  %v1229_v12 = vsel %vm1228_vm4, %v1226_v9, %v1227_v10  ;;  %v1230_v13 = vsel %vm1228_vm4, %v1227_v10, %v1226_v9  ;;  %v2896_v9 = vld [vmem:[#allocation20 + $0x58] sm:$0xff]  }
 0x2de   : > { %v1241_v14 = vsel %vm1235_vm5, %v1230_v13, %v1234_v8  ;;  %v2895_v8 = vld [vmem:[#allocation20 + $0x10] sm:$0xff]   ;;  %v2897_v10 = vld [vmem:[#allocation20 + $0x18] sm:$0xff]  }
 0x2df   : > { %v1243_v15 = vpack.c.bf16 %v1229_v12, %v1241_v14  ;;  %v2385_v12 = vld [vmem:[%s3881_s23] ss:$0 sm:$0xff]  ;;  %s3887_s23 = sld [smem:[#allocation46_spill]] }
 0x2e1   : > { %1413 = vmatmul.mubr.bf16.vlgmr.msra.gmra.mrb[4].mxu1 %v1243_v15 }
 0x2e2   : > { %2553 = vmatpush3.bf16.msra.mxu1 %v2867_v26  ;;  %v1630_v26 = vrot.slane %v1621_v24, 4 }
 0x2e3   : > { %2554 = vmatprep.subr.bf16.mxu1 %v2868_v27  ;;  %v1631_v27 = vrot.slane %v1622_v21, 4 }
 0x2e5   : > { %s3752_s12 = scalar_lea.hbm %s3887_s23, %s2448_s21 }
 0x2e6   : > { %2555 = vmatpush3.bf16.msra.mxu1 %v2869_v28 }
 0x2e7   : > { %2556 = vmatprep.subr.bf16.mxu1 %v2870_v29 }
 0x2ea   : > { %2557 = vmatpush3.bf16.msra.mxu1 %v2871_v30 }
 0x2eb   : > { %2558 = vmatprep.subr.bf16.mxu1 %v2872_v31  ;;  %v1633_v31 = vsel %vm1627_vm6, %v1631_v27, %v1630_v26 }
 0x2ee   : > { %2559 = vmatpush3.bf16.msra.mxu1 %v2873_v56 }
 0x2ef   : > { %2560 = vmatprep.subr.bf16.mxu1 %v2874_v57 }
 0x2f2   : > { %2561 = vmatpush3.bf16.msra.mxu1 %v2875_v58  ;;  %v1624_v58 = vld [vmem:[#allocation8 + $0x8] sm:$0xff] }
 0x2f3   : > { %2562 = vmatprep.subr.bf16.mxu1 %v2876_v59 }
 0x2f6   : > { %2563 = vmatpush3.bf16.msra.mxu1 %v2877_v60 }
 0x2f7   : > { %2564 = vmatprep.subr.bf16.mxu1 %v2878_v61 }
 0x2fa   : > { %2565 = vmatpush3.bf16.msra.mxu1 %v2879_v62  ;;  %v1623_v62 = vld [vmem:[#allocation8] sm:$0xff] }
 0x2fb   : > { %2566 = vmatprep.subr.bf16.mxu1 %v2880_v63 }
 0x2fe   : > { %2567 = vmatpush3.bf16.msra.mxu1 %v2881_v0  ;;  %v1826_v0 = vrot.slane %v1623_v62, 4 }
 0x2ff   : > { %2625 = vmatprep.subr.bf16.mxu1 %v3224_v45 }
 0x3b4   : > { %v2524_v32 = vpop.f32.mrb[4].mxu1 }
 0x3b5   : > { %v2525_v34 = vpop.f32.mrb[5].mxu1 }
 0x3b6   : > { %v2526_v35 = vadd.f32 %v2525_v34, %v2524_v32  ;;  %v2527_v36 = vpop.f32.mrb[6].mxu1 }
 0x3b7   : > { %v2528_v38 = vpop.f32.mrb[7].mxu1 }
 0x3b8   : > { %v1415_v39 = vadd.f32 %v2526_v35, %v2368_v33  ;;  %v2529_v40 = vadd.f32 %v2528_v38, %v2527_v36  ;;  %v2882_v36 = vld [vmem:[%s3882_s7] sm:$0xff]   ;;  %v2883_v38 = vld [vmem:[%s3882_s7 + $0x8] sm:$0xff]  }
 0x3ba   : > { %v1421_v42 = vmax.f32 %v1415_v39, 0.0  ;;  %v1418_v44 = vadd.f32 %v2529_v40, %v2368_v33  ;;  %v2884_v39 = vld [vmem:[%s3882_s7 + $0x10] sm:$0xff]   ;;  %v2885_v40 = vld [vmem:[%s3882_s7 + $0x18] sm:$0xff]  }
 0x3bc   : > { %1615 = vst [vmem:[#allocation6] sm:$0xff] %v1421_v42  ;;  %v1422_v47 = vmax.f32 %v1418_v44, 0.0  ;;  %v1423_v48 = vrot.slane %v1421_v42, 6  ;;  %v2889_v44 = vld [vmem:[%s3882_s7 + $0x38] sm:$0xff]  }
 0x3be   : > { %v1424_v49 = vrot.slane %v1422_v47, 6  ;;  %1616 = vst [vmem:[#allocation6 + $0x8] sm:$0xff] %v1422_v47  ;;  %v1434_v50 = vpack.c.bf16 %v1422_v47, %v1421_v42  ;;  %v2887_v42 = vld [vmem:[%s3882_s7 + $0x28] sm:$0xff]   ;;  %v2899_v47 = vld [vmem:[#allocation20 + $0x20] sm:$0xff]  }
 0x3c0   : > { %1602 = vmatprep.mubr.bf16.mxu0 %v1434_v50  ;;  %v1425_v52 = vsel %vm1228_vm4, %v1423_v48, %v1424_v49  ;;  %v1426_v53 = vsel %vm1228_vm4, %v1424_v49, %v1423_v48  ;;  %v2900_v48 = vld [vmem:[#allocation20 + $0x68] sm:$0xff]   ;;  %v2902_v50 = vld [vmem:[#allocation20 + $0x70] sm:$0xff]  }
 0x3c1   : > { %v1431_v54 = vsel %vm1235_vm5, %v1426_v53, %v1430_v51  ;;  %v2901_v49 = vld [vmem:[#allocation20 + $0x28] sm:$0xff]   ;;  %v2903_v51 = vld [vmem:[#allocation20 + $0x30] sm:$0xff]   ;;  %v2905_v53 = vld [vmem:[#allocation20 + $0x38] sm:$0xff]  }
 0x3c2   : > { %v1433_v55 = vpack.c.bf16 %v1425_v52, %v1431_v54  ;;  %v2904_v52 = vld [vmem:[#allocation20 + $0x78] sm:$0xff]  }
 0x3c4   : > { %1603 = vmatmul.mubr.bf16.vlgmr.msra.gmra.mrb[8].mxu0 %v1433_v55 }
 0x3c5   : > { %2575 = vmatpush3.bf16.msra.mxu0 %v2891_v2  ;;  %v1827_v2 = vrot.slane %v1624_v58, 4 }
 0x3c6   : > { %2576 = vmatprep.subr.bf16.mxu0 %v2892_v3 }
 0x3c9   : > { %2577 = vmatpush3.bf16.msra.mxu0 %v2893_v4 }
 0x3ca   : > { %2578 = vmatprep.subr.bf16.mxu0 %v2894_v6 }
 0x3cd   : > { %2579 = vmatpush3.bf16.msra.mxu0 %v2895_v8 }
 0x3ce   : > { %2580 = vmatprep.subr.bf16.mxu0 %v2896_v9  ;;  %v1829_v9 = vsel %vm1627_vm6, %v1827_v2, %v1826_v0 }
 0x3d1   : > { %2581 = vmatpush3.bf16.msra.mxu0 %v2897_v10 }
 0x3d2   : > { %2582 = vmatprep.subr.bf16.mxu0 %v2898_v46 }
 0x3d5   : > { %2583 = vmatpush3.bf16.msra.mxu0 %v2899_v47 }
 0x3d6   : > { %2584 = vmatprep.subr.bf16.mxu0 %v2900_v48 }
 0x3d9   : > { %2585 = vmatpush3.bf16.msra.mxu0 %v2901_v49 }
 0x3da   : > { %2586 = vmatprep.subr.bf16.mxu0 %v2902_v50 }
 0x3dd   : > { %2587 = vmatpush3.bf16.msra.mxu0 %v2903_v51 }
 0x3de   : > { %2588 = vmatprep.subr.bf16.mxu0 %v2904_v52 }
 0x3e1   : > { %2589 = vmatpush3.bf16.msra.mxu0 %v2905_v53 }
 0x497   : > { %v2546_v11 = vpop.f32.mrb[8].mxu0 }
 0x498   : > { %v2547_v13 = vpop.f32.mrb[9].mxu0 }
 0x499   : > { %v2548_v14 = vadd.f32 %v2547_v13, %v2546_v11  ;;  %v2549_v15 = vpop.f32.mrb[10].mxu0 }
 0x49a   : > { %v2550_v16 = vpop.f32.mrb[11].mxu0 }
 0x49b   : > { %v1605_v17 = vadd.f32 %v2548_v14, %v2385_v12  ;;  %v2551_v18 = vadd.f32 %v2550_v16, %v2549_v15 }
 0x49d   : > { %v1611_v19 = vmax.f32 %v1605_v17, 0.0  ;;  %v1608_v20 = vadd.f32 %v2551_v18, %v2385_v12 }
 0x49f   : > { %v1617_v23 = vadd.f32 %v1611_v19, %v3649_v5  ;;  %v1612_v25 = vmax.f32 %v1608_v20, 0.0  ;;  %v2419_v19 = vld [vmem:[%s3884_s27] ss:$0 sm:$0xff] }
 0x4a1   : > { %v1619_v28 = vmax.f32 %v1617_v23, 0.0  ;;  %v1618_v29 = vadd.f32 %v1612_v25, %v3653_v7 }
 0x4a3   : > { %2012 = vst [vmem:[#allocation7] sm:$0xff] %v1619_v28  ;;  %v1620_v30 = vmax.f32 %v1618_v29, 0.0  ;;  %v1625_v32 = vrot.slane %v1619_v28, 4 }
 0x4a5   : > { %v1626_v33 = vrot.slane %v1620_v30, 4  ;;  %2013 = vst [vmem:[#allocation7 + $0x8] sm:$0xff] %v1620_v30  ;;  %v1643_v34 = vpack.c.bf16 %v1620_v30, %v1619_v28 }
 0x4a7   : > { %1811 = vmatprep.mubr.bf16.mxu1 %v1643_v34  ;;  %v1628_v5 = vsel %vm1627_vm6, %v1625_v32, %v1626_v33  ;;  %v1629_v7 = vsel %vm1627_vm6, %v1626_v33, %v1625_v32 }
 0x4a8   : > { %v1640_v35 = vsel %vm1634_vm7, %v1629_v7, %v1633_v31 }
 0x4a9   : > { %v1642_v37 = vpack.c.bf16 %v1628_v5, %v1640_v35 }
 0x4ab   : > { %1812 = vmatmul.mubr.bf16.vlgmr.msra.gmra.mrb[8].mxu1 %v1642_v37 }
 0x4ac   : > { %2626 = vmatpush3.bf16.msra.mxu1 %v2882_v36  ;;  %2641 = vmatprep.mubr.msk.bf16.mxu1 %vm3225_vm3, %v3224_v45 }
 0x4ad   : > { %2627 = vmatprep.subr.bf16.mxu1 %v3224_v45 }
 0x4b0   : > { %2628 = vmatpush3.bf16.msra.mxu1 %v2883_v38 }
 0x4b1   : > { %2629 = vmatprep.subr.bf16.mxu1 %v3224_v45 }
 0x4b4   : > { %2630 = vmatpush3.bf16.msra.mxu1 %v2884_v39 }
 0x4b5   : > { %2631 = vmatprep.subr.bf16.mxu1 %v3224_v45 }
 0x4b8   : > { %2632 = vmatpush3.bf16.msra.mxu1 %v2885_v40 }
 0x4b9   : > { %2633 = vmatprep.subr.bf16.mxu1 %v3224_v45 }
 0x4bc   : > { %2634 = vmatpush3.bf16.msra.mxu1 %v2886_v41 }
 0x4bd   : > { %2635 = vmatprep.subr.bf16.mxu1 %v3224_v45 }
 0x4c0   : > { %2636 = vmatpush3.bf16.msra.mxu1 %v2887_v42 }
 0x4c1   : > { %2637 = vmatprep.subr.bf16.mxu1 %v3224_v45 }
 0x4c4   : > { %2638 = vmatpush3.bf16.msra.mxu1 %v2888_v43 }
 0x4c5   : > { %2639 = vmatprep.subr.bf16.mxu1 %v3224_v45  ;;  %v2402_v45 = vld [vmem:[%s3883_s15] ss:$0 sm:$0xff]  ;;  %s3226_s15 = smov [#allocation21]  }
 0x4c6   : > { %s3106_s18 = sshll.u32 %s3226_s15, 4  ;;  %s3107_s18 = int_to_ptr.vmem [resolvable:$false] %s3106_s18 }
 0x4c7   : > { %s3108_s16 = scalar_lea.vmem %s3107_s18, 512  ;;  %p3109_p6 = scmp.lt.s32.totalorder %s3754_s28, %s3107_s18 }
 0x4c8   : > { %2640 = vmatpush3.bf16.msra.mxu1 %v2889_v44  ;;  %p3110_p7 = scmp.lt.s32.totalorder %s3108_s16, %s3102_s29 }
 0x4ca   : > { %p3111_p9 = por %p3110_p7, %p3109_p6 }
 0x4cb   : > { %2642 = vmatmul.mubr.bf16.vlgmr.msra.gmra.mrb[12].mxu1 %v1643_v34 }
 0x4cc   : > { %p3112_p11 = pnand %p3111_p9, %p3105_p5 }
 0x57e   : > { %v2568_v54 = vpop.f32.mrb[8].mxu1 }
 0x57f   : > { %v2569_v55 = vpop.f32.mrb[9].mxu1 }
 0x580   : > { %v2570_v56 = vadd.f32 %v2569_v55, %v2568_v54  ;;  %v2571_v57 = vpop.f32.mrb[10].mxu1 }
 0x581   : > { %v2572_v59 = vpop.f32.mrb[11].mxu1 }
 0x582   : > { %v1814_v60 = vadd.f32 %v2570_v56, %v2402_v45  ;;  %v2573_v61 = vadd.f32 %v2572_v59, %v2571_v57 }
 0x584   : > { %v1820_v63 = vmax.f32 %v1814_v60, 0.0  ;;  %v1817_v1 = vadd.f32 %v2573_v61, %v2402_v45 }
 0x586   : > { %2014 = vst [vmem:[#allocation8] sm:$0xff] %v1820_v63  ;;  %v1821_v3 = vmax.f32 %v1817_v1, 0.0  ;;  %v1822_v4 = vrot.slane %v1820_v63, 4 }
 0x588   : > { %v1823_v6 = vrot.slane %v1821_v3, 4  ;;  %2015 = vst [vmem:[#allocation8 + $0x8] sm:$0xff] %v1821_v3  ;;  %v1833_v8 = vpack.c.bf16 %v1821_v3, %v1820_v63 }
 0x58a   : > { %2001 = vmatprep.mubr.bf16.mxu0 %v1833_v8  ;;  %v1824_v10 = vsel %vm1627_vm6, %v1822_v4, %v1823_v6  ;;  %v1825_v11 = vsel %vm1627_vm6, %v1823_v6, %v1822_v4 }
 0x58b   : > { %v1830_v12 = vsel %vm1634_vm7, %v1825_v11, %v1829_v9 }
 0x58c   : > { %v1832_v13 = vpack.c.bf16 %v1824_v10, %v1830_v12 }
 0x58e   : > { %2002 = vmatmul.mubr.bf16.vlgmr.msra.gmra.mrb[12].mxu0 %v1832_v13 }
 0x59e   : > { %v2121_v14 = vpop.f32.mrb[12].mxu1 }
 0x59f   : > { %v2643_v15 = vpop.f32.mrb[13].mxu1  ;;  %v2122_v27 = vadd.f32 %v2436_v22, %v2121_v14 }
 0x5a0   : > { %v2124_v16 = vpop.f32.mrb[14].mxu1 }
 0x5a1   : > { %v2644_v17 = vpop.f32.mrb[15].mxu1  ;;  %v2125_v30 = vadd.f32 %v2436_v22, %v2124_v16 }
 0x661   : > { %v2590_v18 = vpop.f32.mrb[12].mxu0 }
 0x662   : > { %v2591_v20 = vpop.f32.mrb[13].mxu0 }
 0x663   : > { %v2592_v21 = vadd.f32 %v2591_v20, %v2590_v18  ;;  %v2593_v23 = vpop.f32.mrb[14].mxu0 }
 0x664   : > { %v2594_v24 = vpop.f32.mrb[15].mxu0 }
 0x665   : > { %v2004_v25 = vadd.f32 %v2592_v21, %v2419_v19  ;;  %v2595_v26 = vadd.f32 %v2594_v24, %v2593_v23 }
 0x667   : > { %v2010_v28 = vmax.f32 %v2004_v25, 0.0  ;;  %v2007_v29 = vadd.f32 %v2595_v26, %v2419_v19 }
 0x669   : > { %v2128_v31 = vadd.f32 %v2122_v27, %v2010_v28  ;;  %v2011_v32 = vmax.f32 %v2007_v29, 0.0 }
 0x66b   : > { %v2130_v33 = vmax.f32 %v2128_v31, 0.0  ;;  %v2129_v34 = vadd.f32 %v2125_v30, %v2011_v32 }
 0x66d   : > { %2132 = vst [vmem:[%s3606_s0] sm:$0xff] %v2130_v33  ;;  %v2131_v5 = vmax.f32 %v2129_v34, 0.0 }
 0x66f   : > { %2133 = vst [vmem:[%s3606_s0 + $0x8] sm:$0xff] %v2131_v5 }
 0x670   : > { %3115 = shalt.err (!%p3112_p11)
}
 0x671   : > { %s3116_s17 = scalar_lea.hbm %s3752_s12, 256  ;;  %s3120_s24 = scalar_lea.hbm %s3887_s23, 1024 }
 0x672   : > { %p3117_p13 = scmp.ne.s32.totalorder %s3752_s12, %s3116_s17  ;;  %p3121_p0 = scmp.lt.u32.totalorder %s3752_s12, %s3887_s23 }
 0x673   : > { %p3122_p8 = scmp.lt.u32.totalorder %s3120_s24, %s3116_s17  ;;  %p3124_p12 = scmp.lt.u32.totalorder %s3116_s17, %s3752_s12 }
 0x674   : > { %p3118_p3 = pnand %p3117_p13, %p3888_p1 }
 0x675   : > { %p3123_p10 = por %p3122_p8, %p3121_p0 }
 0x676   : > { %p3119_p2 = pneg %p3118_p3 }
 0x677   : > { %p3125_p4 = por %p3124_p12, %p3123_p10 }
 0x679   : > { %p3126_p5 = pnand %p3125_p4, %p3119_p2 }
 0x67b   : > { %3129 = shalt.err (!%p3126_p5)
}
 0x67c   : > { %s3227_s10 = smov 128   ;;  %s3228_s19 = smov 8  }
 0x67d   : > { %2673 = dma.vmem_to_hbm [thread:$0]  (%p3888_p1), %s3754_s28, 256, %s3752_s12, %s3760_s1, %s3227_s10, %s3227_s10, %s3228_s19  }
 0x67e PF: > { %s3889_s21 = sld [smem:[#allocation31_spill]]  ;;  %s3890_s30 = sld [smem:[#allocation27_spill]] }
 0x67f   : > { %s3891_s20 = sld [smem:[#allocation35_spill]] }
 0x684   : > { %p2715_p6 = scmp.ge.s32.totalorder %s3889_s21, 2  ;;  %s2165_s29 = sand.u32 1, %s3890_s30  }
 0x685   : > { %p3892_p7 = scmp.ne.s32.totalorder %s3891_s20, 0  ;;  %s2166_s15 = scalar_lea.sflag [#allocation11], %s2165_s29 }
 0x687   : > { %p2698_p9 = pnand %p2715_p6, %p3892_p7 }
 0x689   : > { %3179 = dma.done.wait (!%p2698_p9), %s2166_s15, 256  }
 0x68a   : > { %3181 = vsyncadd (!%p2698_p9), %s2166_s15, 4294967040  ;;  %s34_s30 = sadd.s32 1, %s3889_s21   ;;  %s3893_s18 = sld [smem:[#allocation28_spill]] }
 0x68b   : > { %p31_p11 = scmp.ge.s32.totalorder %s34_s30, 6   ;;  %s3894_s26 = sld [smem:[#allocation36_spill]] }
 0x68c   : > { %s3895_s27 = sld [smem:[#allocation29_spill]]  ;;  %s3896_s28 = sld [smem:[#allocation30_spill]] }
 0x68d   : > { %s3897_s29 = sld [smem:[#allocation32_spill]]  ;;  %s3898_s0 = sld [smem:[#allocation34_spill]] }
 0x68e   : > { %s3899_s24 = smov %s3188_s25  ;;  %33 = sbr.rel (!%p31_p11) target bundleno = 20 (0x14), region = 156 }
 0x690   : > { %s3900_s25 = smov %s3893_s18 }
 0x695   :  { %2171 = vsyncpa [#allocation10], 1 }
 0x696   :  { %2173 = vsyncpa [#allocation10 + $0x1], 1 }
 0x697   :  { %2174 = vsyncpa [#allocation13], 1 }
 0x698   :  { %2175 = vsyncpa [#allocation16], 1 }
 0x699   :  { %2176 = vsyncpa [#allocation19], 1 }
 0x69a   :  { %2177 = vsyncpa [#allocation11], 1 }
 0x69b   :  { %2179 = vsyncpa [#allocation11 + $0x1], 1 }

</bundles_post_ra>
